<compile_context>
chip_gen: v7x
topology: tpu7x:2x2x1
jax: 0.10.0
libtpu: 0.0.40
codegen_flags: <defaults>
</compile_context>

<pallas_src>
import functools

import jax
import jax.numpy as jnp
from jax.experimental import pallas as pl
from jax.experimental.pallas import tpu as pltpu

CFG = dict(
    num_tokens=64,
    dim=32,
    depth=2,
    max_seq_len=16,
    heads=4,
    casual=True,            # (sic) key name from the reference config
    return_embeddings=True,
    num_label=2,
)

LANE = 128  # TPU lane width; QA-head output padded to this for lane-dense stores


# --------------------------------------------------------------------------------------
# In-kernel helpers (pure jnp, traced inside the Pallas kernel)
# --------------------------------------------------------------------------------------
def _layer_norm(x, g, b, eps=1e-5):
    mu = jnp.mean(x, axis=-1, keepdims=True)
    var = jnp.mean((x - mu) ** 2, axis=-1, keepdims=True)
    return (x - mu) * jax.lax.rsqrt(var + eps) * g + b


def _gelu(x):
    # TODO(synk): tanh approximation; nn.GELU default is the exact erf form.
    c = 0.7978845608028654  # sqrt(2 / pi)
    return 0.5 * x * (1.0 + jnp.tanh(c * (x + 0.044715 * x * x * x)))


# --------------------------------------------------------------------------------------
# Fused Pallas kernel: depth x (LN -> MHA -> residual -> LN -> GELU FFN -> residual)
#                      followed by the QA head projection.
# --------------------------------------------------------------------------------------
def fused_forward_kernel(x_ref, vecs_ref, b1_ref, wqkv_ref, wo_ref, w1_ref, w2_ref,
                         qaw_ref, qab_ref, o_ref, *, B, S, heads, causal):
    BS, D = x_ref.shape
    dh = D // heads
    depth = wqkv_ref.shape[0]

    # activation carried as an f32 value (vregs) across the whole fused forward
    x = x_ref[...]                                               # (BS, D) f32

    # hoisted: additive 0/-1e9 causal mask, built once, reused by every layer/head
    if causal:
        row = jax.lax.broadcasted_iota(jnp.int32, (S, S), 0)
        col = jax.lax.broadcasted_iota(jnp.int32, (S, S), 1)
        mask_add = jnp.where(row >= col, 0.0, -1e9).astype(jnp.float32)[None, :, :]

    for l in range(depth):                                       # static unroll (depth tiny)
        # ---- attention block --------------------------------------------------------
        h = _layer_norm(x, vecs_ref[l, 0:1, :], vecs_ref[l, 1:2, :])
        # 1/sqrt(dh) is pre-folded into the Q columns of Wqkv at init.
        qkv = jnp.dot(h.astype(jnp.bfloat16), wqkv_ref[l],
                      preferred_element_type=jnp.float32)        # (BS, 3D) f32
        qkv_bf = qkv.astype(jnp.bfloat16)                        # single cast per layer

        attn = jnp.zeros((BS, D), jnp.float32)
        for hd in range(heads):                                  # static, heads is small
            lo = hd * dh
            q = qkv_bf[:, lo:lo + dh].reshape(B, S, dh)
            k = qkv_bf[:, D + lo:D + lo + dh].reshape(B, S, dh)
            v = qkv_bf[:, 2 * D + lo:2 * D + lo + dh].reshape(B, S, dh)
            s = jnp.einsum('bqd,bkd->bqk', q, k,
                           preferred_element_type=jnp.float32)   # (B, S, S) f32
            if causal:
                s = s + mask_add                                 # additive mask (VPU add)
            s = s - jnp.max(s, axis=-1, keepdims=True)
            p = jnp.exp(s)
            denom = jnp.sum(p, axis=-1, keepdims=True)           # (B, S, 1)
            o = jnp.einsum('bqk,bkd->bqd', p.astype(jnp.bfloat16), v,
                           preferred_element_type=jnp.float32)   # (B, S, dh) un-normalized
            o = o * pl.reciprocal(denom, approx=True)            # normalize small tensor (EUP)
            # accumulate this head's contribution through its Wo slice (no lane concat)
            attn = attn + jnp.dot(o.reshape(BS, dh).astype(jnp.bfloat16),
                                  wo_ref[l, lo:lo + dh, :],
                                  preferred_element_type=jnp.float32)
        x = x + attn

        # ---- feed-forward block -----------------------------------------------------
        h2 = _layer_norm(x, vecs_ref[l, 2:3, :], vecs_ref[l, 3:4, :])
        ff = _gelu(jnp.dot(h2.astype(jnp.bfloat16), w1_ref[l],
                           preferred_element_type=jnp.float32) + b1_ref[l])
        ff = jnp.dot(ff.astype(jnp.bfloat16), w2_ref[l],
                     preferred_element_type=jnp.float32) + vecs_ref[l, 4:5, :]
        x = x + ff

    # ---- fused QA head epilogue (lane-dense, padded to LANE columns) -----------------
    o_ref[...] = (jnp.dot(x.astype(jnp.bfloat16), qaw_ref[...],
                          preferred_element_type=jnp.float32) + qab_ref[...])


# --------------------------------------------------------------------------------------
# Pallas wrapper
# --------------------------------------------------------------------------------------
def _full_spec(shape):
    n = len(shape)
    return pl.BlockSpec(shape, lambda i, _n=n: (0,) * _n)


def run_fused_forward(x2d, kp, *, B, S, heads, causal):
    BS, D = x2d.shape
    depth = kp['wqkv'].shape[0]
    Dff = kp['w1'].shape[2]

    kern = functools.partial(fused_forward_kernel, B=B, S=S, heads=heads, causal=causal)
    in_specs = [
        _full_spec((BS, D)),                 # x
        _full_spec((depth, 5, D)),           # packed [ln1_g, ln1_b, ln2_g, ln2_b, b2]
        _full_spec((depth, 1, Dff)),         # b1
        _full_spec((depth, D, 3 * D)),       # fused Wqkv (Q cols pre-scaled)
        _full_spec((depth, D, D)),           # Wo
        _full_spec((depth, D, Dff)),         # W1
        _full_spec((depth, Dff, D)),         # W2
        _full_spec((D, LANE)),               # QA head weight (padded, bf16)
        _full_spec((1, LANE)),               # QA head bias (padded, f32)
    ]
    return pl.pallas_call(
        kern,
        grid=(1,),
        in_specs=in_specs,
        out_specs=_full_spec((BS, LANE)),
        out_shape=jax.ShapeDtypeStruct((BS, LANE), jnp.float32),
        compiler_params=pltpu.CompilerParams(dimension_semantics=("arbitrary",)),
    )(x2d, kp['vecs'], kp['b1'], kp['wqkv'], kp['wo'], kp['w1'], kp['w2'],
      kp['qa_w_pad'], kp['qa_b_pad'])


# --------------------------------------------------------------------------------------
# Model: parameters (kernel-ready, packed at init) + forward
# --------------------------------------------------------------------------------------
def init_params(key, cfg):
    D, Dff, depth = cfg['dim'], 4 * cfg['dim'], cfg['depth']
    heads = cfg['heads']
    dh = D // heads
    L = cfg['num_label']
    keys = iter(jax.random.split(key, 16))

    def nrm(shape, scale=0.02):
        return (scale * jax.random.normal(next(keys), shape)).astype(jnp.float32)

    # fused Wqkv with the 1/sqrt(dh) attention scale folded into the Q columns
    wqkv = nrm((depth, D, 3 * D))
    wqkv = wqkv.at[:, :, :D].multiply(1.0 / (dh ** 0.5))

    # packed per-layer small vectors: [ln1_g, ln1_b, ln2_g, ln2_b, b2] -> (depth, 5, D)
    vecs = jnp.concatenate([
        jnp.ones((depth, 1, D), jnp.float32),    # ln1 gamma
        jnp.zeros((depth, 1, D), jnp.float32),   # ln1 beta
        jnp.ones((depth, 1, D), jnp.float32),    # ln2 gamma
        jnp.zeros((depth, 1, D), jnp.float32),   # ln2 beta
        jnp.zeros((depth, 1, D), jnp.float32),   # b2
    ], axis=1)

    # QA head pre-padded to LANE columns (lane-dense kernel output)
    qa_w = nrm((D, L))
    qa_w_pad = jnp.zeros((D, LANE), jnp.float32).at[:, :L].set(qa_w)
    qa_b_pad = jnp.zeros((1, LANE), jnp.float32)

    bf = lambda a: a.astype(jnp.bfloat16)
    return dict(
        tok_emb=nrm((cfg['num_tokens'], D)),
        pos_emb=nrm((cfg['max_seq_len'], D)),
        vecs=vecs,
        b1=jnp.zeros((depth, 1, Dff), jnp.float32),
        wqkv=bf(wqkv),
        wo=bf(nrm((depth, D, D))),
        w1=bf(nrm((depth, D, Dff))),
        w2=bf(nrm((depth, Dff, D))),
        qa_w_pad=bf(qa_w_pad),
        qa_b_pad=qa_b_pad,
    )


def _cross_entropy_ignore(logits, targets, ignore_index):
    # Matches nn.CrossEntropyLoss(ignore_index=...) mean reduction semantics.
    valid = targets != ignore_index
    safe_t = jnp.where(valid, targets, 0)
    logp = jax.nn.log_softmax(logits, axis=-1)
    nll = -jnp.take_along_axis(logp, safe_t[:, None], axis=-1)[:, 0]
    nll = jnp.where(valid, nll, 0.0)
    denom = jnp.maximum(valid.sum(), 1).astype(nll.dtype)
    return nll.sum() / denom


def reformer_qa_forward(params, input_ids, start_positions=None, end_positions=None,
                        cfg=CFG):
    B, S = input_ids.shape
    D = params['tok_emb'].shape[1]
    L = cfg['num_label']

    # token + positional embedding (plain-JAX glue)
    x = jnp.take(params['tok_emb'], input_ids, axis=0)            # (B, S, D)
    x = x + params['pos_emb'][:S][None, :, :]
    x2d = x.reshape(B * S, D).astype(jnp.float32)

    # fused reformer_lm body + QA head (one Pallas kernel)
    logits_pad = run_fused_forward(x2d, params, B=B, S=S, heads=cfg['heads'],
                                   causal=cfg['casual'])          # (B*S, LANE)
    logits = logits_pad[:, :L].reshape(B, S, L)
    start_logits = logits[..., 0]
    end_logits = logits[..., 1]
    outputs = (start_logits, end_logits)

    if start_positions is not None and end_positions is not None:
        start_positions = start_positions.reshape(-1)
        end_positions = end_positions.reshape(-1)
        ignored_index = start_logits.shape[1]
        sp = jnp.clip(start_positions, 0, ignored_index)
        ep = jnp.clip(end_positions, 0, ignored_index)
        start_loss = _cross_entropy_ignore(start_logits, sp, ignored_index)
        end_loss = _cross_entropy_ignore(end_logits, ep, ignored_index)
        total_loss = (start_loss + end_loss) / 2
        outputs = (total_loss,) + outputs
    return outputs


if __name__ == "__main__":
    key = jax.random.PRNGKey(0)
    pkey, ikey = jax.random.split(key)
    params = init_params(pkey, CFG)

    B, S = 2, CFG['max_seq_len']
    input_ids = jax.random.randint(ikey, (B, S), 0, CFG['num_tokens'], dtype=jnp.int32)

    infer_fn = jax.jit(lambda p, ids: reformer_qa_forward(p, ids))
    loss_fn = jax.jit(lambda p, ids, sp, ep: reformer_qa_forward(p, ids, sp, ep))

    # inference path
    start_logits, end_logits = infer_fn(params, input_ids)
    jax.block_until_ready((start_logits, end_logits))
    assert start_logits.shape == (B, S) and end_logits.shape == (B, S)

    # training path (loss)
    sp = jnp.array([1, 3], dtype=jnp.int32)
    ep = jnp.array([5, 7], dtype=jnp.int32)
    loss, s_l, e_l = loss_fn(params, input_ids, sp, ep)
    jax.block_until_ready((loss, s_l, e_l))
    assert loss.shape == ()

    print("KERNEL_OK")
</pallas_src>

<mosaic_0001>
module attributes {stable_mosaic.version = 11 : i64} {
  func.func @fused_forward_kernel(%arg0: i32, %arg1: memref<32x32xf32, #tpu.memory_space<vmem>>, %arg2: memref<2x5x32xf32, #tpu.memory_space<vmem>>, %arg3: memref<2x1x128xf32, #tpu.memory_space<vmem>>, %arg4: memref<2x32x96xbf16, #tpu.memory_space<vmem>>, %arg5: memref<2x32x32xbf16, #tpu.memory_space<vmem>>, %arg6: memref<2x32x128xbf16, #tpu.memory_space<vmem>>, %arg7: memref<2x128x32xbf16, #tpu.memory_space<vmem>>, %arg8: memref<32x128xbf16, #tpu.memory_space<vmem>>, %arg9: memref<1x128xf32, #tpu.memory_space<vmem>>, %arg10: memref<32x128xf32, #tpu.memory_space<vmem>>) attributes {dimension_semantics = [#tpu.dimension_semantics<arbitrary>], iteration_bounds = array<i64: 1>, scalar_prefetch = 0 : i64, scratch_operands = 0 : i64, tpu.core_type = #tpu.core_type<tc>, window_params = [{pipeline_mode = #tpu.pipeline_mode<synchronous>, transform_indices = @transform_0, window_bounds = array<i64: 32, 32>}, {pipeline_mode = #tpu.pipeline_mode<synchronous>, transform_indices = @transform_1, window_bounds = array<i64: 2, 5, 32>}, {pipeline_mode = #tpu.pipeline_mode<synchronous>, transform_indices = @transform_2, window_bounds = array<i64: 2, 1, 128>}, {pipeline_mode = #tpu.pipeline_mode<synchronous>, transform_indices = @transform_3, window_bounds = array<i64: 2, 32, 96>}, {pipeline_mode = #tpu.pipeline_mode<synchronous>, transform_indices = @transform_4, window_bounds = array<i64: 2, 32, 32>}, {pipeline_mode = #tpu.pipeline_mode<synchronous>, transform_indices = @transform_5, window_bounds = array<i64: 2, 32, 128>}, {pipeline_mode = #tpu.pipeline_mode<synchronous>, transform_indices = @transform_6, window_bounds = array<i64: 2, 128, 32>}, {pipeline_mode = #tpu.pipeline_mode<synchronous>, transform_indices = @transform_7, window_bounds = array<i64: 32, 128>}, {pipeline_mode = #tpu.pipeline_mode<synchronous>, transform_indices = @transform_8, window_bounds = array<i64: 1, 128>}, {pipeline_mode = #tpu.pipeline_mode<synchronous>, transform_indices = @transform_9, window_bounds = array<i64: 32, 128>}]} {
    %c0 = arith.constant 0 : index
    %c0_0 = arith.constant 0 : index
    %0 = vector.load %arg1[%c0, %c0_0] : memref<32x32xf32, #tpu.memory_space<vmem>>, vector<32x32xf32>
    %1 = tpu.iota {dimensions = array<i32: 0>} : vector<16x16xi32>
    %2 = tpu.iota {dimensions = array<i32: 1>} : vector<16x16xi32>
    %3 = arith.cmpi sge, %1, %2 : vector<16x16xi32>
    %cst = arith.constant 0.000000e+00 : f32
    %cst_1 = arith.constant -1.000000e+09 : f32
    %4 = vector.broadcast %cst : f32 to vector<16x16xf32>
    %5 = vector.broadcast %cst_1 : f32 to vector<16x16xf32>
    %6 = arith.select %3, %4, %5 : vector<16x16xi1>, vector<16x16xf32>
    %7 = vector.shape_cast %6 : vector<16x16xf32> to vector<1x16x16xf32>
    %c0_2 = arith.constant 0 : index
    %c0_3 = arith.constant 0 : index
    %c0_4 = arith.constant 0 : index
    %8 = vector.load %arg2[%c0_2, %c0_3, %c0_4] : memref<2x5x32xf32, #tpu.memory_space<vmem>>, vector<1x1x32xf32>
    %9 = vector.shape_cast %8 : vector<1x1x32xf32> to vector<1x32xf32>
    %c0_5 = arith.constant 0 : index
    %c1 = arith.constant 1 : index
    %c0_6 = arith.constant 0 : index
    %10 = vector.load %arg2[%c0_5, %c1, %c0_6] : memref<2x5x32xf32, #tpu.memory_space<vmem>>, vector<1x1x32xf32>
    %11 = vector.shape_cast %10 : vector<1x1x32xf32> to vector<1x32xf32>
    %cst_7 = arith.constant dense<0.000000e+00> : vector<32xf32>
    %12 = vector.multi_reduction <add>, %0, %cst_7 [1] : vector<32x32xf32> to vector<32xf32>
    %13 = vector.shape_cast %12 : vector<32xf32> to vector<32x1xf32>
    %cst_8 = arith.constant 3.200000e+01 : f32
    %14 = vector.broadcast %cst_8 : f32 to vector<32x1xf32>
    %15 = arith.divf %13, %14 : vector<32x1xf32>
    %16 = vector.broadcast %15 : vector<32x1xf32> to vector<32x32xf32>
    %17 = arith.subf %0, %16 : vector<32x32xf32>
    %18 = arith.mulf %17, %17 : vector<32x32xf32>
    %cst_9 = arith.constant dense<0.000000e+00> : vector<32xf32>
    %19 = vector.multi_reduction <add>, %18, %cst_9 [1] : vector<32x32xf32> to vector<32xf32>
    %20 = vector.shape_cast %19 : vector<32xf32> to vector<32x1xf32>
    %cst_10 = arith.constant 3.200000e+01 : f32
    %21 = vector.broadcast %cst_10 : f32 to vector<32x1xf32>
    %22 = arith.divf %20, %21 : vector<32x1xf32>
    %23 = vector.broadcast %15 : vector<32x1xf32> to vector<32x32xf32>
    %24 = arith.subf %0, %23 : vector<32x32xf32>
    %cst_11 = arith.constant 9.99999974E-6 : f32
    %25 = vector.broadcast %cst_11 : f32 to vector<32x1xf32>
    %26 = arith.addf %22, %25 : vector<32x1xf32>
    %27 = math.rsqrt %26 : vector<32x1xf32>
    %28 = vector.broadcast %27 : vector<32x1xf32> to vector<32x32xf32>
    %29 = arith.mulf %24, %28 : vector<32x32xf32>
    %30 = vector.broadcast %9 : vector<1x32xf32> to vector<32x32xf32>
    %31 = arith.mulf %29, %30 : vector<32x32xf32>
    %32 = vector.broadcast %11 : vector<1x32xf32> to vector<32x32xf32>
    %33 = arith.addf %31, %32 : vector<32x32xf32>
    %34 = arith.truncf %33 : vector<32x32xf32> to vector<32x32xbf16>
    %c0_12 = arith.constant 0 : index
    %c0_13 = arith.constant 0 : index
    %c0_14 = arith.constant 0 : index
    %35 = vector.load %arg4[%c0_12, %c0_13, %c0_14] : memref<2x32x96xbf16, #tpu.memory_space<vmem>>, vector<1x32x96xbf16>
    %36 = vector.shape_cast %35 : vector<1x32x96xbf16> to vector<32x96xbf16>
    %cst_15 = arith.constant dense<0.000000e+00> : vector<32x96xf32>
    %37 = tpu.matmul %34, %36, %cst_15 {dimension_numbers = #tpu.dot_dimension_numbers<[1], [0], [0], [1], [0, 0, 1, 1], [], []>} : vector<32x32xbf16>, vector<32x96xbf16>, vector<32x96xf32> -> vector<32x96xf32>
    %38 = arith.truncf %37 : vector<32x96xf32> to vector<32x96xbf16>
    %cst_16 = arith.constant 0.000000e+00 : f32
    %39 = vector.broadcast %cst_16 : f32 to vector<32x32xf32>
    %40 = vector.extract_strided_slice %38 {offsets = [0, 0], sizes = [32, 8], strides = [1, 1]} : vector<32x96xbf16> to vector<32x8xbf16>
    %41 = vector.shape_cast %40 : vector<32x8xbf16> to vector<2x16x8xbf16>
    %42 = vector.extract_strided_slice %38 {offsets = [0, 32], sizes = [32, 8], strides = [1, 1]} : vector<32x96xbf16> to vector<32x8xbf16>
    %43 = vector.shape_cast %42 : vector<32x8xbf16> to vector<2x16x8xbf16>
    %44 = vector.extract_strided_slice %38 {offsets = [0, 64], sizes = [32, 8], strides = [1, 1]} : vector<32x96xbf16> to vector<32x8xbf16>
    %45 = vector.shape_cast %44 : vector<32x8xbf16> to vector<2x16x8xbf16>
    "tpu.trace_start"() <{level = 10 : i32, message = "bqd,bkd->bqk"}> : () -> ()
    %cst_17 = arith.constant dense<0.000000e+00> : vector<2x16x16xf32>
    %46 = tpu.matmul %41, %43, %cst_17 {dimension_numbers = #tpu.dot_dimension_numbers<[2], [2], [1], [1], [0, 0, 0, 1, 1, 1], [0], [0]>} : vector<2x16x8xbf16>, vector<2x16x8xbf16>, vector<2x16x16xf32> -> vector<2x16x16xf32>
    "tpu.trace_stop"() : () -> ()
    %47 = vector.broadcast %7 : vector<1x16x16xf32> to vector<2x16x16xf32>
    %48 = arith.addf %46, %47 : vector<2x16x16xf32>
    %cst_18 = arith.constant dense<0xFF800000> : vector<2x16xf32>
    %49 = vector.multi_reduction <maximumf>, %48, %cst_18 [2] : vector<2x16x16xf32> to vector<2x16xf32>
    %50 = vector.shape_cast %49 : vector<2x16xf32> to vector<2x16x1xf32>
    %51 = vector.broadcast %50 : vector<2x16x1xf32> to vector<2x16x16xf32>
    %52 = arith.subf %48, %51 : vector<2x16x16xf32>
    %53 = math.exp %52 : vector<2x16x16xf32>
    %cst_19 = arith.constant dense<0.000000e+00> : vector<2x16xf32>
    %54 = vector.multi_reduction <add>, %53, %cst_19 [2] : vector<2x16x16xf32> to vector<2x16xf32>
    %55 = vector.shape_cast %54 : vector<2x16xf32> to vector<2x16x1xf32>
    %56 = arith.truncf %53 : vector<2x16x16xf32> to vector<2x16x16xbf16>
    "tpu.trace_start"() <{level = 10 : i32, message = "bqk,bkd->bqd"}> : () -> ()
    %cst_20 = arith.constant dense<0.000000e+00> : vector<2x16x8xf32>
    %57 = tpu.matmul %56, %45, %cst_20 {dimension_numbers = #tpu.dot_dimension_numbers<[2], [1], [1], [2], [0, 0, 0, 1, 1, 2], [0], [0]>} : vector<2x16x16xbf16>, vector<2x16x8xbf16>, vector<2x16x8xf32> -> vector<2x16x8xf32>
    "tpu.trace_stop"() : () -> ()
    %58 = tpu.reciprocal %55 {approx = true} : vector<2x16x1xf32> -> vector<2x16x1xf32>
    %59 = vector.broadcast %58 : vector<2x16x1xf32> to vector<2x16x8xf32>
    %60 = arith.mulf %57, %59 : vector<2x16x8xf32>
    %61 = vector.shape_cast %60 : vector<2x16x8xf32> to vector<32x8xf32>
    %62 = arith.truncf %61 : vector<32x8xf32> to vector<32x8xbf16>
    %c0_21 = arith.constant 0 : index
    %c0_22 = arith.constant 0 : index
    %c0_23 = arith.constant 0 : index
    %63 = vector.load %arg5[%c0_21, %c0_22, %c0_23] : memref<2x32x32xbf16, #tpu.memory_space<vmem>>, vector<1x8x32xbf16>
    %64 = vector.shape_cast %63 : vector<1x8x32xbf16> to vector<8x32xbf16>
    %cst_24 = arith.constant dense<0.000000e+00> : vector<32x32xf32>
    %65 = tpu.matmul %62, %64, %cst_24 {dimension_numbers = #tpu.dot_dimension_numbers<[1], [0], [0], [1], [0, 0, 1, 1], [], []>} : vector<32x8xbf16>, vector<8x32xbf16>, vector<32x32xf32> -> vector<32x32xf32>
    %66 = arith.addf %39, %65 : vector<32x32xf32>
    %67 = vector.extract_strided_slice %38 {offsets = [0, 8], sizes = [32, 8], strides = [1, 1]} : vector<32x96xbf16> to vector<32x8xbf16>
    %68 = vector.shape_cast %67 : vector<32x8xbf16> to vector<2x16x8xbf16>
    %69 = vector.extract_strided_slice %38 {offsets = [0, 40], sizes = [32, 8], strides = [1, 1]} : vector<32x96xbf16> to vector<32x8xbf16>
    %70 = vector.shape_cast %69 : vector<32x8xbf16> to vector<2x16x8xbf16>
    %71 = vector.extract_strided_slice %38 {offsets = [0, 72], sizes = [32, 8], strides = [1, 1]} : vector<32x96xbf16> to vector<32x8xbf16>
    %72 = vector.shape_cast %71 : vector<32x8xbf16> to vector<2x16x8xbf16>
    "tpu.trace_start"() <{level = 10 : i32, message = "bqd,bkd->bqk"}> : () -> ()
    %cst_25 = arith.constant dense<0.000000e+00> : vector<2x16x16xf32>
    %73 = tpu.matmul %68, %70, %cst_25 {dimension_numbers = #tpu.dot_dimension_numbers<[2], [2], [1], [1], [0, 0, 0, 1, 1, 1], [0], [0]>} : vector<2x16x8xbf16>, vector<2x16x8xbf16>, vector<2x16x16xf32> -> vector<2x16x16xf32>
    "tpu.trace_stop"() : () -> ()
    %74 = vector.broadcast %7 : vector<1x16x16xf32> to vector<2x16x16xf32>
    %75 = arith.addf %73, %74 : vector<2x16x16xf32>
    %cst_26 = arith.constant dense<0xFF800000> : vector<2x16xf32>
    %76 = vector.multi_reduction <maximumf>, %75, %cst_26 [2] : vector<2x16x16xf32> to vector<2x16xf32>
    %77 = vector.shape_cast %76 : vector<2x16xf32> to vector<2x16x1xf32>
    %78 = vector.broadcast %77 : vector<2x16x1xf32> to vector<2x16x16xf32>
    %79 = arith.subf %75, %78 : vector<2x16x16xf32>
    %80 = math.exp %79 : vector<2x16x16xf32>
    %cst_27 = arith.constant dense<0.000000e+00> : vector<2x16xf32>
    %81 = vector.multi_reduction <add>, %80, %cst_27 [2] : vector<2x16x16xf32> to vector<2x16xf32>
    %82 = vector.shape_cast %81 : vector<2x16xf32> to vector<2x16x1xf32>
    %83 = arith.truncf %80 : vector<2x16x16xf32> to vector<2x16x16xbf16>
    "tpu.trace_start"() <{level = 10 : i32, message = "bqk,bkd->bqd"}> : () -> ()
    %cst_28 = arith.constant dense<0.000000e+00> : vector<2x16x8xf32>
    %84 = tpu.matmul %83, %72, %cst_28 {dimension_numbers = #tpu.dot_dimension_numbers<[2], [1], [1], [2], [0, 0, 0, 1, 1, 2], [0], [0]>} : vector<2x16x16xbf16>, vector<2x16x8xbf16>, vector<2x16x8xf32> -> vector<2x16x8xf32>
    "tpu.trace_stop"() : () -> ()
    %85 = tpu.reciprocal %82 {approx = true} : vector<2x16x1xf32> -> vector<2x16x1xf32>
    %86 = vector.broadcast %85 : vector<2x16x1xf32> to vector<2x16x8xf32>
    %87 = arith.mulf %84, %86 : vector<2x16x8xf32>
    %88 = vector.shape_cast %87 : vector<2x16x8xf32> to vector<32x8xf32>
    %89 = arith.truncf %88 : vector<32x8xf32> to vector<32x8xbf16>
    %c0_29 = arith.constant 0 : index
    %c8 = arith.constant 8 : index
    %c0_30 = arith.constant 0 : index
    %90 = vector.load %arg5[%c0_29, %c8, %c0_30] : memref<2x32x32xbf16, #tpu.memory_space<vmem>>, vector<1x8x32xbf16>
    %91 = vector.shape_cast %90 : vector<1x8x32xbf16> to vector<8x32xbf16>
    %cst_31 = arith.constant dense<0.000000e+00> : vector<32x32xf32>
    %92 = tpu.matmul %89, %91, %cst_31 {dimension_numbers = #tpu.dot_dimension_numbers<[1], [0], [0], [1], [0, 0, 1, 1], [], []>} : vector<32x8xbf16>, vector<8x32xbf16>, vector<32x32xf32> -> vector<32x32xf32>
    %93 = arith.addf %66, %92 : vector<32x32xf32>
    %94 = vector.extract_strided_slice %38 {offsets = [0, 16], sizes = [32, 8], strides = [1, 1]} : vector<32x96xbf16> to vector<32x8xbf16>
    %95 = vector.shape_cast %94 : vector<32x8xbf16> to vector<2x16x8xbf16>
    %96 = vector.extract_strided_slice %38 {offsets = [0, 48], sizes = [32, 8], strides = [1, 1]} : vector<32x96xbf16> to vector<32x8xbf16>
    %97 = vector.shape_cast %96 : vector<32x8xbf16> to vector<2x16x8xbf16>
    %98 = vector.extract_strided_slice %38 {offsets = [0, 80], sizes = [32, 8], strides = [1, 1]} : vector<32x96xbf16> to vector<32x8xbf16>
    %99 = vector.shape_cast %98 : vector<32x8xbf16> to vector<2x16x8xbf16>
    "tpu.trace_start"() <{level = 10 : i32, message = "bqd,bkd->bqk"}> : () -> ()
    %cst_32 = arith.constant dense<0.000000e+00> : vector<2x16x16xf32>
    %100 = tpu.matmul %95, %97, %cst_32 {dimension_numbers = #tpu.dot_dimension_numbers<[2], [2], [1], [1], [0, 0, 0, 1, 1, 1], [0], [0]>} : vector<2x16x8xbf16>, vector<2x16x8xbf16>, vector<2x16x16xf32> -> vector<2x16x16xf32>
    "tpu.trace_stop"() : () -> ()
    %101 = vector.broadcast %7 : vector<1x16x16xf32> to vector<2x16x16xf32>
    %102 = arith.addf %100, %101 : vector<2x16x16xf32>
    %cst_33 = arith.constant dense<0xFF800000> : vector<2x16xf32>
    %103 = vector.multi_reduction <maximumf>, %102, %cst_33 [2] : vector<2x16x16xf32> to vector<2x16xf32>
    %104 = vector.shape_cast %103 : vector<2x16xf32> to vector<2x16x1xf32>
    %105 = vector.broadcast %104 : vector<2x16x1xf32> to vector<2x16x16xf32>
    %106 = arith.subf %102, %105 : vector<2x16x16xf32>
    %107 = math.exp %106 : vector<2x16x16xf32>
    %cst_34 = arith.constant dense<0.000000e+00> : vector<2x16xf32>
    %108 = vector.multi_reduction <add>, %107, %cst_34 [2] : vector<2x16x16xf32> to vector<2x16xf32>
    %109 = vector.shape_cast %108 : vector<2x16xf32> to vector<2x16x1xf32>
    %110 = arith.truncf %107 : vector<2x16x16xf32> to vector<2x16x16xbf16>
    "tpu.trace_start"() <{level = 10 : i32, message = "bqk,bkd->bqd"}> : () -> ()
    %cst_35 = arith.constant dense<0.000000e+00> : vector<2x16x8xf32>
    %111 = tpu.matmul %110, %99, %cst_35 {dimension_numbers = #tpu.dot_dimension_numbers<[2], [1], [1], [2], [0, 0, 0, 1, 1, 2], [0], [0]>} : vector<2x16x16xbf16>, vector<2x16x8xbf16>, vector<2x16x8xf32> -> vector<2x16x8xf32>
    "tpu.trace_stop"() : () -> ()
    %112 = tpu.reciprocal %109 {approx = true} : vector<2x16x1xf32> -> vector<2x16x1xf32>
    %113 = vector.broadcast %112 : vector<2x16x1xf32> to vector<2x16x8xf32>
    %114 = arith.mulf %111, %113 : vector<2x16x8xf32>
    %115 = vector.shape_cast %114 : vector<2x16x8xf32> to vector<32x8xf32>
    %116 = arith.truncf %115 : vector<32x8xf32> to vector<32x8xbf16>
    %c0_36 = arith.constant 0 : index
    %c16 = arith.constant 16 : index
    %c0_37 = arith.constant 0 : index
    %117 = vector.load %arg5[%c0_36, %c16, %c0_37] : memref<2x32x32xbf16, #tpu.memory_space<vmem>>, vector<1x8x32xbf16>
    %118 = vector.shape_cast %117 : vector<1x8x32xbf16> to vector<8x32xbf16>
    %cst_38 = arith.constant dense<0.000000e+00> : vector<32x32xf32>
    %119 = tpu.matmul %116, %118, %cst_38 {dimension_numbers = #tpu.dot_dimension_numbers<[1], [0], [0], [1], [0, 0, 1, 1], [], []>} : vector<32x8xbf16>, vector<8x32xbf16>, vector<32x32xf32> -> vector<32x32xf32>
    %120 = arith.addf %93, %119 : vector<32x32xf32>
    %121 = vector.extract_strided_slice %38 {offsets = [0, 24], sizes = [32, 8], strides = [1, 1]} : vector<32x96xbf16> to vector<32x8xbf16>
    %122 = vector.shape_cast %121 : vector<32x8xbf16> to vector<2x16x8xbf16>
    %123 = vector.extract_strided_slice %38 {offsets = [0, 56], sizes = [32, 8], strides = [1, 1]} : vector<32x96xbf16> to vector<32x8xbf16>
    %124 = vector.shape_cast %123 : vector<32x8xbf16> to vector<2x16x8xbf16>
    %125 = vector.extract_strided_slice %38 {offsets = [0, 88], sizes = [32, 8], strides = [1, 1]} : vector<32x96xbf16> to vector<32x8xbf16>
    %126 = vector.shape_cast %125 : vector<32x8xbf16> to vector<2x16x8xbf16>
    "tpu.trace_start"() <{level = 10 : i32, message = "bqd,bkd->bqk"}> : () -> ()
    %cst_39 = arith.constant dense<0.000000e+00> : vector<2x16x16xf32>
    %127 = tpu.matmul %122, %124, %cst_39 {dimension_numbers = #tpu.dot_dimension_numbers<[2], [2], [1], [1], [0, 0, 0, 1, 1, 1], [0], [0]>} : vector<2x16x8xbf16>, vector<2x16x8xbf16>, vector<2x16x16xf32> -> vector<2x16x16xf32>
    "tpu.trace_stop"() : () -> ()
    %128 = vector.broadcast %7 : vector<1x16x16xf32> to vector<2x16x16xf32>
    %129 = arith.addf %127, %128 : vector<2x16x16xf32>
    %cst_40 = arith.constant dense<0xFF800000> : vector<2x16xf32>
    %130 = vector.multi_reduction <maximumf>, %129, %cst_40 [2] : vector<2x16x16xf32> to vector<2x16xf32>
    %131 = vector.shape_cast %130 : vector<2x16xf32> to vector<2x16x1xf32>
    %132 = vector.broadcast %131 : vector<2x16x1xf32> to vector<2x16x16xf32>
    %133 = arith.subf %129, %132 : vector<2x16x16xf32>
    %134 = math.exp %133 : vector<2x16x16xf32>
    %cst_41 = arith.constant dense<0.000000e+00> : vector<2x16xf32>
    %135 = vector.multi_reduction <add>, %134, %cst_41 [2] : vector<2x16x16xf32> to vector<2x16xf32>
    %136 = vector.shape_cast %135 : vector<2x16xf32> to vector<2x16x1xf32>
    %137 = arith.truncf %134 : vector<2x16x16xf32> to vector<2x16x16xbf16>
    "tpu.trace_start"() <{level = 10 : i32, message = "bqk,bkd->bqd"}> : () -> ()
    %cst_42 = arith.constant dense<0.000000e+00> : vector<2x16x8xf32>
    %138 = tpu.matmul %137, %126, %cst_42 {dimension_numbers = #tpu.dot_dimension_numbers<[2], [1], [1], [2], [0, 0, 0, 1, 1, 2], [0], [0]>} : vector<2x16x16xbf16>, vector<2x16x8xbf16>, vector<2x16x8xf32> -> vector<2x16x8xf32>
    "tpu.trace_stop"() : () -> ()
    %139 = tpu.reciprocal %136 {approx = true} : vector<2x16x1xf32> -> vector<2x16x1xf32>
    %140 = vector.broadcast %139 : vector<2x16x1xf32> to vector<2x16x8xf32>
    %141 = arith.mulf %138, %140 : vector<2x16x8xf32>
    %142 = vector.shape_cast %141 : vector<2x16x8xf32> to vector<32x8xf32>
    %143 = arith.truncf %142 : vector<32x8xf32> to vector<32x8xbf16>
    %c0_43 = arith.constant 0 : index
    %c24 = arith.constant 24 : index
    %c0_44 = arith.constant 0 : index
    %144 = vector.load %arg5[%c0_43, %c24, %c0_44] : memref<2x32x32xbf16, #tpu.memory_space<vmem>>, vector<1x8x32xbf16>
    %145 = vector.shape_cast %144 : vector<1x8x32xbf16> to vector<8x32xbf16>
    %cst_45 = arith.constant dense<0.000000e+00> : vector<32x32xf32>
    %146 = tpu.matmul %143, %145, %cst_45 {dimension_numbers = #tpu.dot_dimension_numbers<[1], [0], [0], [1], [0, 0, 1, 1], [], []>} : vector<32x8xbf16>, vector<8x32xbf16>, vector<32x32xf32> -> vector<32x32xf32>
    %147 = arith.addf %120, %146 : vector<32x32xf32>
    %148 = arith.addf %0, %147 : vector<32x32xf32>
    %c0_46 = arith.constant 0 : index
    %c2 = arith.constant 2 : index
    %c0_47 = arith.constant 0 : index
    %149 = vector.load %arg2[%c0_46, %c2, %c0_47] : memref<2x5x32xf32, #tpu.memory_space<vmem>>, vector<1x1x32xf32>
    %150 = vector.shape_cast %149 : vector<1x1x32xf32> to vector<1x32xf32>
    %c0_48 = arith.constant 0 : index
    %c3 = arith.constant 3 : index
    %c0_49 = arith.constant 0 : index
    %151 = vector.load %arg2[%c0_48, %c3, %c0_49] : memref<2x5x32xf32, #tpu.memory_space<vmem>>, vector<1x1x32xf32>
    %152 = vector.shape_cast %151 : vector<1x1x32xf32> to vector<1x32xf32>
    %cst_50 = arith.constant dense<0.000000e+00> : vector<32xf32>
    %153 = vector.multi_reduction <add>, %148, %cst_50 [1] : vector<32x32xf32> to vector<32xf32>
    %154 = vector.shape_cast %153 : vector<32xf32> to vector<32x1xf32>
    %cst_51 = arith.constant 3.200000e+01 : f32
    %155 = vector.broadcast %cst_51 : f32 to vector<32x1xf32>
    %156 = arith.divf %154, %155 : vector<32x1xf32>
    %157 = vector.broadcast %156 : vector<32x1xf32> to vector<32x32xf32>
    %158 = arith.subf %148, %157 : vector<32x32xf32>
    %159 = arith.mulf %158, %158 : vector<32x32xf32>
    %cst_52 = arith.constant dense<0.000000e+00> : vector<32xf32>
    %160 = vector.multi_reduction <add>, %159, %cst_52 [1] : vector<32x32xf32> to vector<32xf32>
    %161 = vector.shape_cast %160 : vector<32xf32> to vector<32x1xf32>
    %cst_53 = arith.constant 3.200000e+01 : f32
    %162 = vector.broadcast %cst_53 : f32 to vector<32x1xf32>
    %163 = arith.divf %161, %162 : vector<32x1xf32>
    %164 = vector.broadcast %156 : vector<32x1xf32> to vector<32x32xf32>
    %165 = arith.subf %148, %164 : vector<32x32xf32>
    %cst_54 = arith.constant 9.99999974E-6 : f32
    %166 = vector.broadcast %cst_54 : f32 to vector<32x1xf32>
    %167 = arith.addf %163, %166 : vector<32x1xf32>
    %168 = math.rsqrt %167 : vector<32x1xf32>
    %169 = vector.broadcast %168 : vector<32x1xf32> to vector<32x32xf32>
    %170 = arith.mulf %165, %169 : vector<32x32xf32>
    %171 = vector.broadcast %150 : vector<1x32xf32> to vector<32x32xf32>
    %172 = arith.mulf %170, %171 : vector<32x32xf32>
    %173 = vector.broadcast %152 : vector<1x32xf32> to vector<32x32xf32>
    %174 = arith.addf %172, %173 : vector<32x32xf32>
    %175 = arith.truncf %174 : vector<32x32xf32> to vector<32x32xbf16>
    %c0_55 = arith.constant 0 : index
    %c0_56 = arith.constant 0 : index
    %c0_57 = arith.constant 0 : index
    %176 = vector.load %arg6[%c0_55, %c0_56, %c0_57] : memref<2x32x128xbf16, #tpu.memory_space<vmem>>, vector<1x32x128xbf16>
    %177 = vector.shape_cast %176 : vector<1x32x128xbf16> to vector<32x128xbf16>
    %cst_58 = arith.constant dense<0.000000e+00> : vector<32x128xf32>
    %178 = tpu.matmul %175, %177, %cst_58 {dimension_numbers = #tpu.dot_dimension_numbers<[1], [0], [0], [1], [0, 0, 1, 1], [], []>} : vector<32x32xbf16>, vector<32x128xbf16>, vector<32x128xf32> -> vector<32x128xf32>
    %c0_59 = arith.constant 0 : index
    %c0_60 = arith.constant 0 : index
    %c0_61 = arith.constant 0 : index
    %179 = vector.load %arg3[%c0_59, %c0_60, %c0_61] : memref<2x1x128xf32, #tpu.memory_space<vmem>>, vector<1x1x128xf32>
    %180 = vector.shape_cast %179 : vector<1x1x128xf32> to vector<1x128xf32>
    %181 = vector.broadcast %180 : vector<1x128xf32> to vector<32x128xf32>
    %182 = arith.addf %178, %181 : vector<32x128xf32>
    %cst_62 = arith.constant 5.000000e-01 : f32
    %183 = vector.broadcast %cst_62 : f32 to vector<32x128xf32>
    %184 = arith.mulf %183, %182 : vector<32x128xf32>
    %cst_63 = arith.constant 4.471500e-02 : f32
    %185 = vector.broadcast %cst_63 : f32 to vector<32x128xf32>
    %186 = arith.mulf %185, %182 : vector<32x128xf32>
    %187 = arith.mulf %186, %182 : vector<32x128xf32>
    %188 = arith.mulf %187, %182 : vector<32x128xf32>
    %189 = arith.addf %182, %188 : vector<32x128xf32>
    %cst_64 = arith.constant 0.797884583 : f32
    %190 = vector.broadcast %cst_64 : f32 to vector<32x128xf32>
    %191 = arith.mulf %190, %189 : vector<32x128xf32>
    %192 = math.tanh %191 : vector<32x128xf32>
    %cst_65 = arith.constant 1.000000e+00 : f32
    %193 = vector.broadcast %cst_65 : f32 to vector<32x128xf32>
    %194 = arith.addf %193, %192 : vector<32x128xf32>
    %195 = arith.mulf %184, %194 : vector<32x128xf32>
    %196 = arith.truncf %195 : vector<32x128xf32> to vector<32x128xbf16>
    %c0_66 = arith.constant 0 : index
    %c0_67 = arith.constant 0 : index
    %c0_68 = arith.constant 0 : index
    %197 = vector.load %arg7[%c0_66, %c0_67, %c0_68] : memref<2x128x32xbf16, #tpu.memory_space<vmem>>, vector<1x128x32xbf16>
    %198 = vector.shape_cast %197 : vector<1x128x32xbf16> to vector<128x32xbf16>
    %cst_69 = arith.constant dense<0.000000e+00> : vector<32x32xf32>
    %199 = tpu.matmul %196, %198, %cst_69 {dimension_numbers = #tpu.dot_dimension_numbers<[1], [0], [0], [1], [0, 0, 1, 1], [], []>} : vector<32x128xbf16>, vector<128x32xbf16>, vector<32x32xf32> -> vector<32x32xf32>
    %c0_70 = arith.constant 0 : index
    %c4 = arith.constant 4 : index
    %c0_71 = arith.constant 0 : index
    %200 = vector.load %arg2[%c0_70, %c4, %c0_71] : memref<2x5x32xf32, #tpu.memory_space<vmem>>, vector<1x1x32xf32>
    %201 = vector.shape_cast %200 : vector<1x1x32xf32> to vector<1x32xf32>
    %202 = vector.broadcast %201 : vector<1x32xf32> to vector<32x32xf32>
    %203 = arith.addf %199, %202 : vector<32x32xf32>
    %204 = arith.addf %148, %203 : vector<32x32xf32>
    %c1_72 = arith.constant 1 : index
    %c0_73 = arith.constant 0 : index
    %c0_74 = arith.constant 0 : index
    %205 = vector.load %arg2[%c1_72, %c0_73, %c0_74] : memref<2x5x32xf32, #tpu.memory_space<vmem>>, vector<1x1x32xf32>
    %206 = vector.shape_cast %205 : vector<1x1x32xf32> to vector<1x32xf32>
    %c1_75 = arith.constant 1 : index
    %c1_76 = arith.constant 1 : index
    %c0_77 = arith.constant 0 : index
    %207 = vector.load %arg2[%c1_75, %c1_76, %c0_77] : memref<2x5x32xf32, #tpu.memory_space<vmem>>, vector<1x1x32xf32>
    %208 = vector.shape_cast %207 : vector<1x1x32xf32> to vector<1x32xf32>
    %cst_78 = arith.constant dense<0.000000e+00> : vector<32xf32>
    %209 = vector.multi_reduction <add>, %204, %cst_78 [1] : vector<32x32xf32> to vector<32xf32>
    %210 = vector.shape_cast %209 : vector<32xf32> to vector<32x1xf32>
    %cst_79 = arith.constant 3.200000e+01 : f32
    %211 = vector.broadcast %cst_79 : f32 to vector<32x1xf32>
    %212 = arith.divf %210, %211 : vector<32x1xf32>
    %213 = vector.broadcast %212 : vector<32x1xf32> to vector<32x32xf32>
    %214 = arith.subf %204, %213 : vector<32x32xf32>
    %215 = arith.mulf %214, %214 : vector<32x32xf32>
    %cst_80 = arith.constant dense<0.000000e+00> : vector<32xf32>
    %216 = vector.multi_reduction <add>, %215, %cst_80 [1] : vector<32x32xf32> to vector<32xf32>
    %217 = vector.shape_cast %216 : vector<32xf32> to vector<32x1xf32>
    %cst_81 = arith.constant 3.200000e+01 : f32
    %218 = vector.broadcast %cst_81 : f32 to vector<32x1xf32>
    %219 = arith.divf %217, %218 : vector<32x1xf32>
    %220 = vector.broadcast %212 : vector<32x1xf32> to vector<32x32xf32>
    %221 = arith.subf %204, %220 : vector<32x32xf32>
    %cst_82 = arith.constant 9.99999974E-6 : f32
    %222 = vector.broadcast %cst_82 : f32 to vector<32x1xf32>
    %223 = arith.addf %219, %222 : vector<32x1xf32>
    %224 = math.rsqrt %223 : vector<32x1xf32>
    %225 = vector.broadcast %224 : vector<32x1xf32> to vector<32x32xf32>
    %226 = arith.mulf %221, %225 : vector<32x32xf32>
    %227 = vector.broadcast %206 : vector<1x32xf32> to vector<32x32xf32>
    %228 = arith.mulf %226, %227 : vector<32x32xf32>
    %229 = vector.broadcast %208 : vector<1x32xf32> to vector<32x32xf32>
    %230 = arith.addf %228, %229 : vector<32x32xf32>
    %231 = arith.truncf %230 : vector<32x32xf32> to vector<32x32xbf16>
    %c1_83 = arith.constant 1 : index
    %c0_84 = arith.constant 0 : index
    %c0_85 = arith.constant 0 : index
    %232 = vector.load %arg4[%c1_83, %c0_84, %c0_85] : memref<2x32x96xbf16, #tpu.memory_space<vmem>>, vector<1x32x96xbf16>
    %233 = vector.shape_cast %232 : vector<1x32x96xbf16> to vector<32x96xbf16>
    %cst_86 = arith.constant dense<0.000000e+00> : vector<32x96xf32>
    %234 = tpu.matmul %231, %233, %cst_86 {dimension_numbers = #tpu.dot_dimension_numbers<[1], [0], [0], [1], [0, 0, 1, 1], [], []>} : vector<32x32xbf16>, vector<32x96xbf16>, vector<32x96xf32> -> vector<32x96xf32>
    %235 = arith.truncf %234 : vector<32x96xf32> to vector<32x96xbf16>
    %cst_87 = arith.constant 0.000000e+00 : f32
    %236 = vector.broadcast %cst_87 : f32 to vector<32x32xf32>
    %237 = vector.extract_strided_slice %235 {offsets = [0, 0], sizes = [32, 8], strides = [1, 1]} : vector<32x96xbf16> to vector<32x8xbf16>
    %238 = vector.shape_cast %237 : vector<32x8xbf16> to vector<2x16x8xbf16>
    %239 = vector.extract_strided_slice %235 {offsets = [0, 32], sizes = [32, 8], strides = [1, 1]} : vector<32x96xbf16> to vector<32x8xbf16>
    %240 = vector.shape_cast %239 : vector<32x8xbf16> to vector<2x16x8xbf16>
    %241 = vector.extract_strided_slice %235 {offsets = [0, 64], sizes = [32, 8], strides = [1, 1]} : vector<32x96xbf16> to vector<32x8xbf16>
    %242 = vector.shape_cast %241 : vector<32x8xbf16> to vector<2x16x8xbf16>
    "tpu.trace_start"() <{level = 10 : i32, message = "bqd,bkd->bqk"}> : () -> ()
    %cst_88 = arith.constant dense<0.000000e+00> : vector<2x16x16xf32>
    %243 = tpu.matmul %238, %240, %cst_88 {dimension_numbers = #tpu.dot_dimension_numbers<[2], [2], [1], [1], [0, 0, 0, 1, 1, 1], [0], [0]>} : vector<2x16x8xbf16>, vector<2x16x8xbf16>, vector<2x16x16xf32> -> vector<2x16x16xf32>
    "tpu.trace_stop"() : () -> ()
    %244 = vector.broadcast %7 : vector<1x16x16xf32> to vector<2x16x16xf32>
    %245 = arith.addf %243, %244 : vector<2x16x16xf32>
    %cst_89 = arith.constant dense<0xFF800000> : vector<2x16xf32>
    %246 = vector.multi_reduction <maximumf>, %245, %cst_89 [2] : vector<2x16x16xf32> to vector<2x16xf32>
    %247 = vector.shape_cast %246 : vector<2x16xf32> to vector<2x16x1xf32>
    %248 = vector.broadcast %247 : vector<2x16x1xf32> to vector<2x16x16xf32>
    %249 = arith.subf %245, %248 : vector<2x16x16xf32>
    %250 = math.exp %249 : vector<2x16x16xf32>
    %cst_90 = arith.constant dense<0.000000e+00> : vector<2x16xf32>
    %251 = vector.multi_reduction <add>, %250, %cst_90 [2] : vector<2x16x16xf32> to vector<2x16xf32>
    %252 = vector.shape_cast %251 : vector<2x16xf32> to vector<2x16x1xf32>
    %253 = arith.truncf %250 : vector<2x16x16xf32> to vector<2x16x16xbf16>
    "tpu.trace_start"() <{level = 10 : i32, message = "bqk,bkd->bqd"}> : () -> ()
    %cst_91 = arith.constant dense<0.000000e+00> : vector<2x16x8xf32>
    %254 = tpu.matmul %253, %242, %cst_91 {dimension_numbers = #tpu.dot_dimension_numbers<[2], [1], [1], [2], [0, 0, 0, 1, 1, 2], [0], [0]>} : vector<2x16x16xbf16>, vector<2x16x8xbf16>, vector<2x16x8xf32> -> vector<2x16x8xf32>
    "tpu.trace_stop"() : () -> ()
    %255 = tpu.reciprocal %252 {approx = true} : vector<2x16x1xf32> -> vector<2x16x1xf32>
    %256 = vector.broadcast %255 : vector<2x16x1xf32> to vector<2x16x8xf32>
    %257 = arith.mulf %254, %256 : vector<2x16x8xf32>
    %258 = vector.shape_cast %257 : vector<2x16x8xf32> to vector<32x8xf32>
    %259 = arith.truncf %258 : vector<32x8xf32> to vector<32x8xbf16>
    %c1_92 = arith.constant 1 : index
    %c0_93 = arith.constant 0 : index
    %c0_94 = arith.constant 0 : index
    %260 = vector.load %arg5[%c1_92, %c0_93, %c0_94] : memref<2x32x32xbf16, #tpu.memory_space<vmem>>, vector<1x8x32xbf16>
    %261 = vector.shape_cast %260 : vector<1x8x32xbf16> to vector<8x32xbf16>
    %cst_95 = arith.constant dense<0.000000e+00> : vector<32x32xf32>
    %262 = tpu.matmul %259, %261, %cst_95 {dimension_numbers = #tpu.dot_dimension_numbers<[1], [0], [0], [1], [0, 0, 1, 1], [], []>} : vector<32x8xbf16>, vector<8x32xbf16>, vector<32x32xf32> -> vector<32x32xf32>
    %263 = arith.addf %236, %262 : vector<32x32xf32>
    %264 = vector.extract_strided_slice %235 {offsets = [0, 8], sizes = [32, 8], strides = [1, 1]} : vector<32x96xbf16> to vector<32x8xbf16>
    %265 = vector.shape_cast %264 : vector<32x8xbf16> to vector<2x16x8xbf16>
    %266 = vector.extract_strided_slice %235 {offsets = [0, 40], sizes = [32, 8], strides = [1, 1]} : vector<32x96xbf16> to vector<32x8xbf16>
    %267 = vector.shape_cast %266 : vector<32x8xbf16> to vector<2x16x8xbf16>
    %268 = vector.extract_strided_slice %235 {offsets = [0, 72], sizes = [32, 8], strides = [1, 1]} : vector<32x96xbf16> to vector<32x8xbf16>
    %269 = vector.shape_cast %268 : vector<32x8xbf16> to vector<2x16x8xbf16>
    "tpu.trace_start"() <{level = 10 : i32, message = "bqd,bkd->bqk"}> : () -> ()
    %cst_96 = arith.constant dense<0.000000e+00> : vector<2x16x16xf32>
    %270 = tpu.matmul %265, %267, %cst_96 {dimension_numbers = #tpu.dot_dimension_numbers<[2], [2], [1], [1], [0, 0, 0, 1, 1, 1], [0], [0]>} : vector<2x16x8xbf16>, vector<2x16x8xbf16>, vector<2x16x16xf32> -> vector<2x16x16xf32>
    "tpu.trace_stop"() : () -> ()
    %271 = vector.broadcast %7 : vector<1x16x16xf32> to vector<2x16x16xf32>
    %272 = arith.addf %270, %271 : vector<2x16x16xf32>
    %cst_97 = arith.constant dense<0xFF800000> : vector<2x16xf32>
    %273 = vector.multi_reduction <maximumf>, %272, %cst_97 [2] : vector<2x16x16xf32> to vector<2x16xf32>
    %274 = vector.shape_cast %273 : vector<2x16xf32> to vector<2x16x1xf32>
    %275 = vector.broadcast %274 : vector<2x16x1xf32> to vector<2x16x16xf32>
    %276 = arith.subf %272, %275 : vector<2x16x16xf32>
    %277 = math.exp %276 : vector<2x16x16xf32>
    %cst_98 = arith.constant dense<0.000000e+00> : vector<2x16xf32>
    %278 = vector.multi_reduction <add>, %277, %cst_98 [2] : vector<2x16x16xf32> to vector<2x16xf32>
    %279 = vector.shape_cast %278 : vector<2x16xf32> to vector<2x16x1xf32>
    %280 = arith.truncf %277 : vector<2x16x16xf32> to vector<2x16x16xbf16>
    "tpu.trace_start"() <{level = 10 : i32, message = "bqk,bkd->bqd"}> : () -> ()
    %cst_99 = arith.constant dense<0.000000e+00> : vector<2x16x8xf32>
    %281 = tpu.matmul %280, %269, %cst_99 {dimension_numbers = #tpu.dot_dimension_numbers<[2], [1], [1], [2], [0, 0, 0, 1, 1, 2], [0], [0]>} : vector<2x16x16xbf16>, vector<2x16x8xbf16>, vector<2x16x8xf32> -> vector<2x16x8xf32>
    "tpu.trace_stop"() : () -> ()
    %282 = tpu.reciprocal %279 {approx = true} : vector<2x16x1xf32> -> vector<2x16x1xf32>
    %283 = vector.broadcast %282 : vector<2x16x1xf32> to vector<2x16x8xf32>
    %284 = arith.mulf %281, %283 : vector<2x16x8xf32>
    %285 = vector.shape_cast %284 : vector<2x16x8xf32> to vector<32x8xf32>
    %286 = arith.truncf %285 : vector<32x8xf32> to vector<32x8xbf16>
    %c1_100 = arith.constant 1 : index
    %c8_101 = arith.constant 8 : index
    %c0_102 = arith.constant 0 : index
    %287 = vector.load %arg5[%c1_100, %c8_101, %c0_102] : memref<2x32x32xbf16, #tpu.memory_space<vmem>>, vector<1x8x32xbf16>
    %288 = vector.shape_cast %287 : vector<1x8x32xbf16> to vector<8x32xbf16>
    %cst_103 = arith.constant dense<0.000000e+00> : vector<32x32xf32>
    %289 = tpu.matmul %286, %288, %cst_103 {dimension_numbers = #tpu.dot_dimension_numbers<[1], [0], [0], [1], [0, 0, 1, 1], [], []>} : vector<32x8xbf16>, vector<8x32xbf16>, vector<32x32xf32> -> vector<32x32xf32>
    %290 = arith.addf %263, %289 : vector<32x32xf32>
    %291 = vector.extract_strided_slice %235 {offsets = [0, 16], sizes = [32, 8], strides = [1, 1]} : vector<32x96xbf16> to vector<32x8xbf16>
    %292 = vector.shape_cast %291 : vector<32x8xbf16> to vector<2x16x8xbf16>
    %293 = vector.extract_strided_slice %235 {offsets = [0, 48], sizes = [32, 8], strides = [1, 1]} : vector<32x96xbf16> to vector<32x8xbf16>
    %294 = vector.shape_cast %293 : vector<32x8xbf16> to vector<2x16x8xbf16>
    %295 = vector.extract_strided_slice %235 {offsets = [0, 80], sizes = [32, 8], strides = [1, 1]} : vector<32x96xbf16> to vector<32x8xbf16>
    %296 = vector.shape_cast %295 : vector<32x8xbf16> to vector<2x16x8xbf16>
    "tpu.trace_start"() <{level = 10 : i32, message = "bqd,bkd->bqk"}> : () -> ()
    %cst_104 = arith.constant dense<0.000000e+00> : vector<2x16x16xf32>
    %297 = tpu.matmul %292, %294, %cst_104 {dimension_numbers = #tpu.dot_dimension_numbers<[2], [2], [1], [1], [0, 0, 0, 1, 1, 1], [0], [0]>} : vector<2x16x8xbf16>, vector<2x16x8xbf16>, vector<2x16x16xf32> -> vector<2x16x16xf32>
    "tpu.trace_stop"() : () -> ()
    %298 = vector.broadcast %7 : vector<1x16x16xf32> to vector<2x16x16xf32>
    %299 = arith.addf %297, %298 : vector<2x16x16xf32>
    %cst_105 = arith.constant dense<0xFF800000> : vector<2x16xf32>
    %300 = vector.multi_reduction <maximumf>, %299, %cst_105 [2] : vector<2x16x16xf32> to vector<2x16xf32>
    %301 = vector.shape_cast %300 : vector<2x16xf32> to vector<2x16x1xf32>
    %302 = vector.broadcast %301 : vector<2x16x1xf32> to vector<2x16x16xf32>
    %303 = arith.subf %299, %302 : vector<2x16x16xf32>
    %304 = math.exp %303 : vector<2x16x16xf32>
    %cst_106 = arith.constant dense<0.000000e+00> : vector<2x16xf32>
    %305 = vector.multi_reduction <add>, %304, %cst_106 [2] : vector<2x16x16xf32> to vector<2x16xf32>
    %306 = vector.shape_cast %305 : vector<2x16xf32> to vector<2x16x1xf32>
    %307 = arith.truncf %304 : vector<2x16x16xf32> to vector<2x16x16xbf16>
    "tpu.trace_start"() <{level = 10 : i32, message = "bqk,bkd->bqd"}> : () -> ()
    %cst_107 = arith.constant dense<0.000000e+00> : vector<2x16x8xf32>
    %308 = tpu.matmul %307, %296, %cst_107 {dimension_numbers = #tpu.dot_dimension_numbers<[2], [1], [1], [2], [0, 0, 0, 1, 1, 2], [0], [0]>} : vector<2x16x16xbf16>, vector<2x16x8xbf16>, vector<2x16x8xf32> -> vector<2x16x8xf32>
    "tpu.trace_stop"() : () -> ()
    %309 = tpu.reciprocal %306 {approx = true} : vector<2x16x1xf32> -> vector<2x16x1xf32>
    %310 = vector.broadcast %309 : vector<2x16x1xf32> to vector<2x16x8xf32>
    %311 = arith.mulf %308, %310 : vector<2x16x8xf32>
    %312 = vector.shape_cast %311 : vector<2x16x8xf32> to vector<32x8xf32>
    %313 = arith.truncf %312 : vector<32x8xf32> to vector<32x8xbf16>
    %c1_108 = arith.constant 1 : index
    %c16_109 = arith.constant 16 : index
    %c0_110 = arith.constant 0 : index
    %314 = vector.load %arg5[%c1_108, %c16_109, %c0_110] : memref<2x32x32xbf16, #tpu.memory_space<vmem>>, vector<1x8x32xbf16>
    %315 = vector.shape_cast %314 : vector<1x8x32xbf16> to vector<8x32xbf16>
    %cst_111 = arith.constant dense<0.000000e+00> : vector<32x32xf32>
    %316 = tpu.matmul %313, %315, %cst_111 {dimension_numbers = #tpu.dot_dimension_numbers<[1], [0], [0], [1], [0, 0, 1, 1], [], []>} : vector<32x8xbf16>, vector<8x32xbf16>, vector<32x32xf32> -> vector<32x32xf32>
    %317 = arith.addf %290, %316 : vector<32x32xf32>
    %318 = vector.extract_strided_slice %235 {offsets = [0, 24], sizes = [32, 8], strides = [1, 1]} : vector<32x96xbf16> to vector<32x8xbf16>
    %319 = vector.shape_cast %318 : vector<32x8xbf16> to vector<2x16x8xbf16>
    %320 = vector.extract_strided_slice %235 {offsets = [0, 56], sizes = [32, 8], strides = [1, 1]} : vector<32x96xbf16> to vector<32x8xbf16>
    %321 = vector.shape_cast %320 : vector<32x8xbf16> to vector<2x16x8xbf16>
    %322 = vector.extract_strided_slice %235 {offsets = [0, 88], sizes = [32, 8], strides = [1, 1]} : vector<32x96xbf16> to vector<32x8xbf16>
    %323 = vector.shape_cast %322 : vector<32x8xbf16> to vector<2x16x8xbf16>
    "tpu.trace_start"() <{level = 10 : i32, message = "bqd,bkd->bqk"}> : () -> ()
    %cst_112 = arith.constant dense<0.000000e+00> : vector<2x16x16xf32>
    %324 = tpu.matmul %319, %321, %cst_112 {dimension_numbers = #tpu.dot_dimension_numbers<[2], [2], [1], [1], [0, 0, 0, 1, 1, 1], [0], [0]>} : vector<2x16x8xbf16>, vector<2x16x8xbf16>, vector<2x16x16xf32> -> vector<2x16x16xf32>
    "tpu.trace_stop"() : () -> ()
    %325 = vector.broadcast %7 : vector<1x16x16xf32> to vector<2x16x16xf32>
    %326 = arith.addf %324, %325 : vector<2x16x16xf32>
    %cst_113 = arith.constant dense<0xFF800000> : vector<2x16xf32>
    %327 = vector.multi_reduction <maximumf>, %326, %cst_113 [2] : vector<2x16x16xf32> to vector<2x16xf32>
    %328 = vector.shape_cast %327 : vector<2x16xf32> to vector<2x16x1xf32>
    %329 = vector.broadcast %328 : vector<2x16x1xf32> to vector<2x16x16xf32>
    %330 = arith.subf %326, %329 : vector<2x16x16xf32>
    %331 = math.exp %330 : vector<2x16x16xf32>
    %cst_114 = arith.constant dense<0.000000e+00> : vector<2x16xf32>
    %332 = vector.multi_reduction <add>, %331, %cst_114 [2] : vector<2x16x16xf32> to vector<2x16xf32>
    %333 = vector.shape_cast %332 : vector<2x16xf32> to vector<2x16x1xf32>
    %334 = arith.truncf %331 : vector<2x16x16xf32> to vector<2x16x16xbf16>
    "tpu.trace_start"() <{level = 10 : i32, message = "bqk,bkd->bqd"}> : () -> ()
    %cst_115 = arith.constant dense<0.000000e+00> : vector<2x16x8xf32>
    %335 = tpu.matmul %334, %323, %cst_115 {dimension_numbers = #tpu.dot_dimension_numbers<[2], [1], [1], [2], [0, 0, 0, 1, 1, 2], [0], [0]>} : vector<2x16x16xbf16>, vector<2x16x8xbf16>, vector<2x16x8xf32> -> vector<2x16x8xf32>
    "tpu.trace_stop"() : () -> ()
    %336 = tpu.reciprocal %333 {approx = true} : vector<2x16x1xf32> -> vector<2x16x1xf32>
    %337 = vector.broadcast %336 : vector<2x16x1xf32> to vector<2x16x8xf32>
    %338 = arith.mulf %335, %337 : vector<2x16x8xf32>
    %339 = vector.shape_cast %338 : vector<2x16x8xf32> to vector<32x8xf32>
    %340 = arith.truncf %339 : vector<32x8xf32> to vector<32x8xbf16>
    %c1_116 = arith.constant 1 : index
    %c24_117 = arith.constant 24 : index
    %c0_118 = arith.constant 0 : index
    %341 = vector.load %arg5[%c1_116, %c24_117, %c0_118] : memref<2x32x32xbf16, #tpu.memory_space<vmem>>, vector<1x8x32xbf16>
    %342 = vector.shape_cast %341 : vector<1x8x32xbf16> to vector<8x32xbf16>
    %cst_119 = arith.constant dense<0.000000e+00> : vector<32x32xf32>
    %343 = tpu.matmul %340, %342, %cst_119 {dimension_numbers = #tpu.dot_dimension_numbers<[1], [0], [0], [1], [0, 0, 1, 1], [], []>} : vector<32x8xbf16>, vector<8x32xbf16>, vector<32x32xf32> -> vector<32x32xf32>
    %344 = arith.addf %317, %343 : vector<32x32xf32>
    %345 = arith.addf %204, %344 : vector<32x32xf32>
    %c1_120 = arith.constant 1 : index
    %c2_121 = arith.constant 2 : index
    %c0_122 = arith.constant 0 : index
    %346 = vector.load %arg2[%c1_120, %c2_121, %c0_122] : memref<2x5x32xf32, #tpu.memory_space<vmem>>, vector<1x1x32xf32>
    %347 = vector.shape_cast %346 : vector<1x1x32xf32> to vector<1x32xf32>
    %c1_123 = arith.constant 1 : index
    %c3_124 = arith.constant 3 : index
    %c0_125 = arith.constant 0 : index
    %348 = vector.load %arg2[%c1_123, %c3_124, %c0_125] : memref<2x5x32xf32, #tpu.memory_space<vmem>>, vector<1x1x32xf32>
    %349 = vector.shape_cast %348 : vector<1x1x32xf32> to vector<1x32xf32>
    %cst_126 = arith.constant dense<0.000000e+00> : vector<32xf32>
    %350 = vector.multi_reduction <add>, %345, %cst_126 [1] : vector<32x32xf32> to vector<32xf32>
    %351 = vector.shape_cast %350 : vector<32xf32> to vector<32x1xf32>
    %cst_127 = arith.constant 3.200000e+01 : f32
    %352 = vector.broadcast %cst_127 : f32 to vector<32x1xf32>
    %353 = arith.divf %351, %352 : vector<32x1xf32>
    %354 = vector.broadcast %353 : vector<32x1xf32> to vector<32x32xf32>
    %355 = arith.subf %345, %354 : vector<32x32xf32>
    %356 = arith.mulf %355, %355 : vector<32x32xf32>
    %cst_128 = arith.constant dense<0.000000e+00> : vector<32xf32>
    %357 = vector.multi_reduction <add>, %356, %cst_128 [1] : vector<32x32xf32> to vector<32xf32>
    %358 = vector.shape_cast %357 : vector<32xf32> to vector<32x1xf32>
    %cst_129 = arith.constant 3.200000e+01 : f32
    %359 = vector.broadcast %cst_129 : f32 to vector<32x1xf32>
    %360 = arith.divf %358, %359 : vector<32x1xf32>
    %361 = vector.broadcast %353 : vector<32x1xf32> to vector<32x32xf32>
    %362 = arith.subf %345, %361 : vector<32x32xf32>
    %cst_130 = arith.constant 9.99999974E-6 : f32
    %363 = vector.broadcast %cst_130 : f32 to vector<32x1xf32>
    %364 = arith.addf %360, %363 : vector<32x1xf32>
    %365 = math.rsqrt %364 : vector<32x1xf32>
    %366 = vector.broadcast %365 : vector<32x1xf32> to vector<32x32xf32>
    %367 = arith.mulf %362, %366 : vector<32x32xf32>
    %368 = vector.broadcast %347 : vector<1x32xf32> to vector<32x32xf32>
    %369 = arith.mulf %367, %368 : vector<32x32xf32>
    %370 = vector.broadcast %349 : vector<1x32xf32> to vector<32x32xf32>
    %371 = arith.addf %369, %370 : vector<32x32xf32>
    %372 = arith.truncf %371 : vector<32x32xf32> to vector<32x32xbf16>
    %c1_131 = arith.constant 1 : index
    %c0_132 = arith.constant 0 : index
    %c0_133 = arith.constant 0 : index
    %373 = vector.load %arg6[%c1_131, %c0_132, %c0_133] : memref<2x32x128xbf16, #tpu.memory_space<vmem>>, vector<1x32x128xbf16>
    %374 = vector.shape_cast %373 : vector<1x32x128xbf16> to vector<32x128xbf16>
    %cst_134 = arith.constant dense<0.000000e+00> : vector<32x128xf32>
    %375 = tpu.matmul %372, %374, %cst_134 {dimension_numbers = #tpu.dot_dimension_numbers<[1], [0], [0], [1], [0, 0, 1, 1], [], []>} : vector<32x32xbf16>, vector<32x128xbf16>, vector<32x128xf32> -> vector<32x128xf32>
    %c1_135 = arith.constant 1 : index
    %c0_136 = arith.constant 0 : index
    %c0_137 = arith.constant 0 : index
    %376 = vector.load %arg3[%c1_135, %c0_136, %c0_137] : memref<2x1x128xf32, #tpu.memory_space<vmem>>, vector<1x1x128xf32>
    %377 = vector.shape_cast %376 : vector<1x1x128xf32> to vector<1x128xf32>
    %378 = vector.broadcast %377 : vector<1x128xf32> to vector<32x128xf32>
    %379 = arith.addf %375, %378 : vector<32x128xf32>
    %cst_138 = arith.constant 5.000000e-01 : f32
    %380 = vector.broadcast %cst_138 : f32 to vector<32x128xf32>
    %381 = arith.mulf %380, %379 : vector<32x128xf32>
    %cst_139 = arith.constant 4.471500e-02 : f32
    %382 = vector.broadcast %cst_139 : f32 to vector<32x128xf32>
    %383 = arith.mulf %382, %379 : vector<32x128xf32>
    %384 = arith.mulf %383, %379 : vector<32x128xf32>
    %385 = arith.mulf %384, %379 : vector<32x128xf32>
    %386 = arith.addf %379, %385 : vector<32x128xf32>
    %cst_140 = arith.constant 0.797884583 : f32
    %387 = vector.broadcast %cst_140 : f32 to vector<32x128xf32>
    %388 = arith.mulf %387, %386 : vector<32x128xf32>
    %389 = math.tanh %388 : vector<32x128xf32>
    %cst_141 = arith.constant 1.000000e+00 : f32
    %390 = vector.broadcast %cst_141 : f32 to vector<32x128xf32>
    %391 = arith.addf %390, %389 : vector<32x128xf32>
    %392 = arith.mulf %381, %391 : vector<32x128xf32>
    %393 = arith.truncf %392 : vector<32x128xf32> to vector<32x128xbf16>
    %c1_142 = arith.constant 1 : index
    %c0_143 = arith.constant 0 : index
    %c0_144 = arith.constant 0 : index
    %394 = vector.load %arg7[%c1_142, %c0_143, %c0_144] : memref<2x128x32xbf16, #tpu.memory_space<vmem>>, vector<1x128x32xbf16>
    %395 = vector.shape_cast %394 : vector<1x128x32xbf16> to vector<128x32xbf16>
    %cst_145 = arith.constant dense<0.000000e+00> : vector<32x32xf32>
    %396 = tpu.matmul %393, %395, %cst_145 {dimension_numbers = #tpu.dot_dimension_numbers<[1], [0], [0], [1], [0, 0, 1, 1], [], []>} : vector<32x128xbf16>, vector<128x32xbf16>, vector<32x32xf32> -> vector<32x32xf32>
    %c1_146 = arith.constant 1 : index
    %c4_147 = arith.constant 4 : index
    %c0_148 = arith.constant 0 : index
    %397 = vector.load %arg2[%c1_146, %c4_147, %c0_148] : memref<2x5x32xf32, #tpu.memory_space<vmem>>, vector<1x1x32xf32>
    %398 = vector.shape_cast %397 : vector<1x1x32xf32> to vector<1x32xf32>
    %399 = vector.broadcast %398 : vector<1x32xf32> to vector<32x32xf32>
    %400 = arith.addf %396, %399 : vector<32x32xf32>
    %401 = arith.addf %345, %400 : vector<32x32xf32>
    %402 = arith.truncf %401 : vector<32x32xf32> to vector<32x32xbf16>
    %c0_149 = arith.constant 0 : index
    %c0_150 = arith.constant 0 : index
    %403 = vector.load %arg8[%c0_149, %c0_150] : memref<32x128xbf16, #tpu.memory_space<vmem>>, vector<32x128xbf16>
    %cst_151 = arith.constant dense<0.000000e+00> : vector<32x128xf32>
    %404 = tpu.matmul %402, %403, %cst_151 {dimension_numbers = #tpu.dot_dimension_numbers<[1], [0], [0], [1], [0, 0, 1, 1], [], []>} : vector<32x32xbf16>, vector<32x128xbf16>, vector<32x128xf32> -> vector<32x128xf32>
    %c0_152 = arith.constant 0 : index
    %c0_153 = arith.constant 0 : index
    %405 = vector.load %arg9[%c0_152, %c0_153] : memref<1x128xf32, #tpu.memory_space<vmem>>, vector<1x128xf32>
    %406 = vector.broadcast %405 : vector<1x128xf32> to vector<32x128xf32>
    %407 = arith.addf %404, %406 : vector<32x128xf32>
    %c0_154 = arith.constant 0 : index
    %c0_155 = arith.constant 0 : index
    %408 = vector.load %arg10[%c0_154, %c0_155] : memref<32x128xf32, #tpu.memory_space<vmem>>, vector<32x128xf32>
    tpu.vector_store %arg10[%c0_154, %c0_155], %407 {strides = array<i32>} : memref<32x128xf32, #tpu.memory_space<vmem>>, vector<32x128xf32>,
    return
  }
  func.func @transform_0(%arg0: i32) -> (i32, i32) {
    %c0_i32 = arith.constant 0 : i32
    %c0_i32_0 = arith.constant 0 : i32
    %c0_i32_1 = arith.constant 0 : i32
    return %c0_i32, %c0_i32_0 : i32, i32
  }
  func.func @transform_1(%arg0: i32) -> (i32, i32, i32) {
    %c0_i32 = arith.constant 0 : i32
    %c0_i32_0 = arith.constant 0 : i32
    %c0_i32_1 = arith.constant 0 : i32
    %c0_i32_2 = arith.constant 0 : i32
    return %c0_i32, %c0_i32_0, %c0_i32_1 : i32, i32, i32
  }
  func.func @transform_2(%arg0: i32) -> (i32, i32, i32) {
    %c0_i32 = arith.constant 0 : i32
    %c0_i32_0 = arith.constant 0 : i32
    %c0_i32_1 = arith.constant 0 : i32
    %c0_i32_2 = arith.constant 0 : i32
    return %c0_i32, %c0_i32_0, %c0_i32_1 : i32, i32, i32
  }
  func.func @transform_3(%arg0: i32) -> (i32, i32, i32) {
    %c0_i32 = arith.constant 0 : i32
    %c0_i32_0 = arith.constant 0 : i32
    %c0_i32_1 = arith.constant 0 : i32
    %c0_i32_2 = arith.constant 0 : i32
    return %c0_i32, %c0_i32_0, %c0_i32_1 : i32, i32, i32
  }
  func.func @transform_4(%arg0: i32) -> (i32, i32, i32) {
    %c0_i32 = arith.constant 0 : i32
    %c0_i32_0 = arith.constant 0 : i32
    %c0_i32_1 = arith.constant 0 : i32
    %c0_i32_2 = arith.constant 0 : i32
    return %c0_i32, %c0_i32_0, %c0_i32_1 : i32, i32, i32
  }
  func.func @transform_5(%arg0: i32) -> (i32, i32, i32) {
    %c0_i32 = arith.constant 0 : i32
    %c0_i32_0 = arith.constant 0 : i32
    %c0_i32_1 = arith.constant 0 : i32
    %c0_i32_2 = arith.constant 0 : i32
    return %c0_i32, %c0_i32_0, %c0_i32_1 : i32, i32, i32
  }
  func.func @transform_6(%arg0: i32) -> (i32, i32, i32) {
    %c0_i32 = arith.constant 0 : i32
    %c0_i32_0 = arith.constant 0 : i32
    %c0_i32_1 = arith.constant 0 : i32
    %c0_i32_2 = arith.constant 0 : i32
    return %c0_i32, %c0_i32_0, %c0_i32_1 : i32, i32, i32
  }
  func.func @transform_7(%arg0: i32) -> (i32, i32) {
    %c0_i32 = arith.constant 0 : i32
    %c0_i32_0 = arith.constant 0 : i32
    %c0_i32_1 = arith.constant 0 : i32
    return %c0_i32, %c0_i32_0 : i32, i32
  }
  func.func @transform_8(%arg0: i32) -> (i32, i32) {
    %c0_i32 = arith.constant 0 : i32
    %c0_i32_0 = arith.constant 0 : i32
    %c0_i32_1 = arith.constant 0 : i32
    return %c0_i32, %c0_i32_0 : i32, i32
  }
  func.func @transform_9(%arg0: i32) -> (i32, i32) {
    %c0_i32 = arith.constant 0 : i32
    %c0_i32_0 = arith.constant 0 : i32
    %c0_i32_1 = arith.constant 0 : i32
    return %c0_i32, %c0_i32_0 : i32, i32
  }
}

</mosaic_0001>

<bundles_post_ra>
// kernel: _lambda_.1
= control target key start
LH: loop header
LB: loop body
LE: loop exit
PB: predicated region body
PF: predicated region fallthrough
CT: control target
= control target key end

     0   :  { %vm48_vm0 = vcmask 261120   ;;  %v4330_v62 = vmov 0.0   ;;  %vm4331_vm1 = vmmov 0   ;;  %s4332_s25 = smov 96   ;;  %vm196_vm2 = vcmask 64512   ;;  %s4334_s26 = smov 88   ;;  %s5107_s0 = inlined_call_operand.vmem [shape: f32[32,32], index: 0, kind: input, shape index: {}]   ;;  %s5108_s3 = inlined_call_operand.vmem [shape: bf16[2,32,96], index: 3, kind: input, shape index: {}]   ;;  %s5109_s1 = inlined_call_operand.vmem [shape: f32[2,5,32], index: 1, kind: input, shape index: {}]   ;;  %s5110_s4 = inlined_call_operand.vmem [shape: bf16[2,32,32], index: 4, kind: input, shape index: {}]   ;;  %s5111_s5 = inlined_call_operand.vmem [shape: bf16[2,32,128], index: 5, kind: input, shape index: {}]   ;;  %s5112_s6 = inlined_call_operand.vmem [shape: bf16[2,128,32], index: 6, kind: input, shape index: {}]   ;;  %s5113_s2 = inlined_call_operand.vmem [shape: f32[2,1,128], index: 2, kind: input, shape index: {}]   ;;  %s5114_s7 = inlined_call_operand.vmem [shape: bf16[32,128], index: 7, kind: input, shape index: {}]   ;;  %s5115_s8 = inlined_call_operand.vmem [shape: f32[1,128], index: 8, kind: input, shape index: {}]   ;;  %s5116_s9 = inlined_call_operand.vmem [shape: f32[32,128], index: 9, kind: output, shape index: {}]  }
   0x1   :  { %v33_v0 = vld [vmem:[%s5107_s0] sm:$0xff]  ;;  %v35_v1 = vld [vmem:[%s5107_s0 + $0x10] sm:$0xff]  ;;  %v34_v2 = vld [vmem:[%s5107_s0 + $0x8] sm:$0xff]  ;;  %3772 = vmatprep.subr.bf16.mxu0 %v4330_v62  ;;  %3774 = vmatprep.mubr.msk.bf16.mxu0 %vm4331_vm1, %v4330_v62  ;;  %vm294_vm5 = vcmask 130048   ;;  %s4335_s27 = smov 120   ;;  %s4336_s28 = smov 64  }
   0x2   :  { %v49_v3 = vsel %vm48_vm0, %v33_v0, 0.0  ;;  %v55_v4 = vsel %vm48_vm0, %v35_v1, 0.0  ;;  %v36_v5 = vld [vmem:[%s5107_s0 + $0x18] sm:$0xff]  ;;  %v52_v6 = vsel %vm48_vm0, %v34_v2, 0.0  ;;  %v4124_v28 = vld [vmem:[%s5108_s3] sm:$0xff]   ;;  %v4125_v29 = vld [vmem:[%s5108_s3 + $0x8] sm:$0xff]  }
   0x3   :  { %50 = vadd.xlane.f32.xlu0 %v49_v3  ;;  %56 = vadd.xlane.f32.xlu1 %v55_v4  ;;  %v58_v7 = vsel %vm48_vm0, %v36_v5, 0.0  ;;  %v3499_v44 = vld [vmem:[%s5109_s1] ss:$0 sm:$0xff]  ;;  %v3500_v49 = vld [vmem:[%s5109_s1 + $0x1] ss:$0 sm:$0xff]  ;;  %s4337_s29 = smov 80  }
   0x4   :  { %3758 = vmatprep.subr.bf16.mxu1 %v4124_v28  ;;  %s4338_s30 = smov 56   ;;  %s4339_s10 = smov 112   ;;  %vm689_vm6 = vcmask 1043456  }
   0x5   :  { %3759 = vmatpush3.bf16.msra.mxu1 %v4124_v28  ;;  %s4340_s11 = smov 48   ;;  %s4341_s16 = smov 72  }
   0x6   :  { %3760 = vmatprep.subr.bf16.mxu1 %v4125_v29  ;;  %s4342_s17 = smov 104   ;;  %s4343_s20 = smov 40  }
   0x7   :  { %53 = vadd.xlane.f32.xlu0 %v52_v6  ;;  %59 = vadd.xlane.f32.xlu1 %v58_v7 }
   0x9   :  { %3761 = vmatpush3.bf16.msra.mxu1 %v4125_v29 }
   0xa   :  { %3766 = vmatprep.subr.bf16.mxu1 %v4330_v62 }
  0x90   :  { %v51_v8 = vpop.xlane.xlu0 %50  ;;  %v57_v9 = vpop.xlane.xlu1 %56 }
  0x91   :  { %v62_v10 = vmul.f32 0.03125, %v51_v8  ;;  %v64_v11 = vmul.f32 0.03125, %v57_v9  ;;  %v37_v9 = vlaneseq }
  0x93   :  { %v66_v12 = vsub.f32 %v33_v0, %v62_v10  ;;  %v68_v13 = vsub.f32 %v35_v1, %v64_v11  ;;  %v38_v10 = vshrl.u32 %v37_v9, 7  ;;  %v41_v11 = vand.u32 127, %v37_v9 }
  0x94   :  { %v54_v14 = vpop.xlane.xlu0 %53  ;;  %v60_v15 = vpop.xlane.xlu1 %59 }
  0x95   :  { %v63_v16 = vmul.f32 0.03125, %v54_v14  ;;  %v65_v17 = vmul.f32 0.03125, %v60_v15  ;;  %v70_v18 = vmul.f32 %v66_v12, %v66_v12  ;;  %v72_v19 = vmul.f32 %v68_v13, %v68_v13 }
  0x96   :  { %vm42_vm3 = vcmp.ge.s32.totalorder %v38_v10, %v41_v11 }
  0x97   :  { %v67_v20 = vsub.f32 %v34_v2, %v63_v16  ;;  %v69_v21 = vsub.f32 %v36_v5, %v65_v17  ;;  %v74_v22 = vsel %vm48_vm0, %v70_v18, 0.0  ;;  %v80_v23 = vsel %vm48_vm0, %v72_v19, 0.0 }
  0x98   :  { %75 = vadd.xlane.f32.xlu0 %v74_v22 }
  0x99   :  { %v71_v24 = vmul.f32 %v67_v20, %v67_v20  ;;  %v73_v25 = vmul.f32 %v69_v21, %v69_v21 }
  0x9b   :  { %v77_v26 = vsel %vm48_vm0, %v71_v24, 0.0  ;;  %v83_v27 = vsel %vm48_vm0, %v73_v25, 0.0 }
  0x9c   :  { %81 = vadd.xlane.f32.xlu0 %v80_v23  ;;  %78 = vadd.xlane.f32.xlu1 %v77_v26 }
  0xa0   :  { %84 = vadd.xlane.f32.xlu1 %v83_v27 }
 0x125   :  { %v76_v30 = vpop.xlane.xlu0 %75 }
 0x126   :  { %v86_v31 = vmul.f32 0.03125, %v76_v30 }
 0x128   :  { %v90_v32 = vadd.f32 1e-05, %v86_v31 }
 0x129   :  { %v79_v33 = vpop.xlane.xlu1 %78  ;;  %v82_v34 = vpop.xlane.xlu0 %81 }
 0x12a   :  { %4150 = vrsqrt.f32 %v90_v32  ;;  %v87_v35 = vmul.f32 0.03125, %v79_v33  ;;  %v88_v36 = vmul.f32 0.03125, %v82_v34 }
 0x12c   :  { %v91_v37 = vadd.f32 1e-05, %v87_v35  ;;  %v92_v38 = vadd.f32 1e-05, %v88_v36 }
 0x12d   :  { %v85_v39 = vpop.xlane.xlu1 %84 }
 0x12e   :  { %4152 = vrsqrt.f32 %v91_v37  ;;  %v89_v40 = vmul.f32 0.03125, %v85_v39 }
 0x12f   :  { %4154 = vrsqrt.f32 %v92_v38 }
 0x130   :  { %v93_v41 = vadd.f32 1e-05, %v89_v40 }
 0x132   :  { %4156 = vrsqrt.f32 %v93_v41 }
 0x134   :  { %v4151_v42 = vpop.eup %4150 }
 0x135   :  { %v98_v43 = vmul.f32 %v4151_v42, %v66_v12  ;;  %v39_v12 = vadd.s32 8, %v38_v10 }
 0x137   :  { %v106_v48 = vmul.f32 %v3499_v44, %v98_v43  ;;  %vm43_vm4 = vcmp.ge.s32.totalorder %v39_v12, %v41_v11 }
 0x138   :  { %v4153_v45 = vpop.eup %4152 }
 0x139   :  { %v4155_v46 = vpop.eup %4154  ;;  %v99_v47 = vmul.f32 %v4153_v45, %v67_v20  ;;  %v114_v53 = vadd.f32 %v3500_v49, %v106_v48 }
 0x13a   :  { %v100_v50 = vmul.f32 %v4155_v46, %v68_v13  ;;  %v4333_v13 = vmov -1e+09  }
 0x13b   :  { %v107_v51 = vmul.f32 %v3499_v44, %v99_v47  ;;  %v4454_v14 = vsel %vm42_vm3, 0.0, %v4333_v13  ;;  %v4456_v16 = vsel %vm43_vm4, 0.0, %v4333_v13 }
 0x13c   :  { %v4157_v52 = vpop.eup %4156  ;;  %v108_v56 = vmul.f32 %v3499_v44, %v100_v50 }
 0x13d   :  { %v115_v54 = vadd.f32 %v3500_v49, %v107_v51  ;;  %v101_v55 = vmul.f32 %v4157_v52, %v69_v21 }
 0x13e   :  { %v116_v59 = vadd.f32 %v3500_v49, %v108_v56 }
 0x13f   :  { %v118_v57 = vpack.c.bf16 %v115_v54, %v114_v53  ;;  %v109_v58 = vmul.f32 %v3499_v44, %v101_v55 }
 0x141   :  { %3762 = vmatprep.mubr.msk.bf16.mxu1 %vm48_vm0, %v118_v57  ;;  %v117_v60 = vadd.f32 %v3500_v49, %v109_v58 }
 0x143   :  { %v119_v61 = vpack.c.bf16 %v117_v60, %v116_v59 }
 0x145   :  { %3763 = vmatmul.mubr.msk.bf16.vlgmr.msra.gmra.mrb[0].mxu1 %vm48_vm0, %v119_v61 }
 0x146   :  { %3768 = vmatprep.mubr.msk.bf16.mxu1 %vm4331_vm1, %v4330_v62 }
 0x218   :  { %v3764_v63 = vpop.f32.mrb[0].mxu1 }
 0x219   :  { %v176_v0 = vpop.f32.mrb[1].mxu1 }
 0x21a   :  { %v3765_v1 = vpop.f32.mrb[2].mxu1 }
 0x21b   :  { %v4434_v2 = vpack.c.bf16 %v3765_v1, %v3764_v63  ;;  %v179_v3 = vpop.f32.mrb[3].mxu1 }
 0x21c   :  { %v4436_v4 = vpack.c.bf16 %v179_v3, %v176_v0 }
 0x21d   :  { %245 = vrot.lane.b32.xlu0 %v4434_v2, %s4332_s25 }
 0x21e   :  { %194 = vrot.lane.b32.xlu1 %v4436_v4, %s4332_s25 }
 0x28f   :  { %v246_v5 = vpop.permute.xlu0 %245 }
 0x290   :  { %v195_v6 = vpop.permute.xlu1 %194  ;;  %v251_v7 = vsel %vm196_vm2, %v246_v5, 0 }
 0x291   :  { %v201_v8 = vsel %vm196_vm2, %v195_v6, 0  ;;  %3773 = vmatpush3.bf16.xpose.msra.mxu0 %v251_v7 }
 0x292   :  { %3767 = vmatpush3.bf16.xpose.msra.mxu1 %v201_v8  ;;  %3784 = vmatprep.subr.bf16.mxu0 %v4330_v62 }
 0x293   :  { %3778 = vmatprep.subr.bf16.mxu1 %v4330_v62 }
 0x298   :  { %3775 = vmatmul.mubr.msk.bf16.vlgmr.msra.gmra.mrb[0].mxu0 %vm196_vm2, %v4434_v2 }
 0x299   :  { %3769 = vmatmul.mubr.msk.bf16.vlgmr.msra.gmra.mrb[4].mxu1 %vm196_vm2, %v4436_v4  ;;  %3786 = vmatprep.mubr.msk.bf16.mxu0 %vm4331_vm1, %v4330_v62 }
 0x29a   :  { %3780 = vmatprep.mubr.msk.bf16.mxu1 %vm4331_vm1, %v4330_v62 }
 0x36b   :  { %v287_v15 = vpop.f32.mrb[0].mxu0 }
 0x36c   :  { %v288_v17 = vadd.f32 %v287_v15, %v4454_v14  ;;  %v237_v18 = vpop.f32.mrb[4].mxu1  ;;  %v3776_v19 = vpop.f32.mrb[1].mxu0 }
 0x36d   :  { %v3770_v20 = vpop.f32.mrb[5].mxu1  ;;  %v290_v21 = vpop.f32.mrb[2].mxu0  ;;  %v238_v29 = vadd.f32 %v237_v18, %v4454_v14 }
 0x36e   :  { %v291_v22 = vadd.f32 %v290_v21, %v4456_v16  ;;  %v240_v23 = vpop.f32.mrb[6].mxu1  ;;  %v3777_v24 = vpop.f32.mrb[3].mxu0  ;;  %v301_v25 = vsel %vm294_vm5, %v288_v17, -inf }
 0x36f   :  { %302 = vmax.xlane.f32.xlu1 %v301_v25  ;;  %v3771_v26 = vpop.f32.mrb[7].mxu1  ;;  %v241_v28 = vadd.f32 %v240_v23, %v4456_v16  ;;  %v295_v31 = vsel %vm294_vm5, %v238_v29, -inf }
 0x370   :  { %v304_v27 = vsel %vm294_vm5, %v291_v22, -inf }
 0x371   :  { %305 = vmax.xlane.f32.xlu0 %v304_v27  ;;  %v298_v30 = vsel %vm294_vm5, %v241_v28, -inf }
 0x380   :  { %491 = vrot.lane.b32.xlu1 %v4434_v2, %s4334_s26 }
 0x384   :  { %489 = vrot.lane.b32.xlu1 %v4434_v2, %s4335_s27 }
 0x387   :  { %380 = vrot.lane.b32.xlu0 %v4434_v2, %s4336_s28 }
 0x3a6   :  { %299 = vmax.xlane.f32.xlu0 %v298_v30 }
 0x3a8   :  { %296 = vmax.xlane.f32.xlu1 %v295_v31 }
 0x3b9   :  { %440 = vrot.lane.b32.xlu1 %v4436_v4, %s4334_s26 }
 0x3bc   :  { %333 = vrot.lane.b32.xlu0 %v4436_v4, %s4336_s28 }
 0x3bd   :  { %438 = vrot.lane.b32.xlu1 %v4436_v4, %s4335_s27 }
 0x3fc   :  { %v303_v32 = vpop.xlane.xlu1 %302 }
 0x3fd   :  { %v309_v33 = vsub.f32 %v288_v17, %v303_v32 }
 0x3fe   :  { %v306_v34 = vpop.xlane.xlu0 %305 }
 0x3ff   :  { %v315_v35 = vmul.f32 1.442695, %v309_v33  ;;  %v310_v36 = vsub.f32 %v291_v22, %v306_v34 }
 0x400   :  { %v492_v41 = vpop.permute.xlu1 %491 }
 0x401   :  { %v317_v37 = vmul.f32 1.442695, %v310_v36  ;;  %4158 = vpow2.f32 %v315_v35  ;;  %v497_v43 = vsel %vm196_vm2, %v492_v41, 0 }
 0x402   :  { %v381_v38 = vpop.permute.xlu0 %380 }
 0x403   :  { %4160 = vpow2.f32 %v317_v37  ;;  %3785 = vmatpush3.bf16.msra.mxu0 %v381_v38 }
 0x404   :  { %3796 = vmatprep.subr.bf16.mxu0 %v4330_v62  ;;  %v490_v44 = vpop.permute.xlu1 %489 }
 0x40b   :  { %v4479_v39 = vpop.eup %4158 }
 0x40c   :  { %v325_v24 = vsel %vm294_vm5, %v4479_v39, 0.0 }
 0x40d   :  { %v4481_v40 = vpop.eup %4160 }
 0x40e   :  { %v332_v42 = vpack.c.bf16 %v4481_v40, %v4479_v39  ;;  %v328_v25 = vsel %vm294_vm5, %v4481_v40, 0.0 }
 0x410   :  { %3787 = vmatmul.mubr.msk.bf16.vlgmr.msra.gmra.mrb[4].mxu0 %vm294_vm5, %v332_v42 }
 0x411   :  { %3797 = vmatpush3.bf16.xpose.msra.mxu0 %v497_v43  ;;  %3798 = vmatprep.mubr.msk.bf16.mxu0 %vm4331_vm1, %v4330_v62 }
 0x412   :  { %3808 = vmatprep.subr.bf16.mxu0 %v4330_v62 }
 0x418   :  { %3799 = vmatmul.mubr.msk.bf16.vlgmr.msra.gmra.mrb[8].mxu0 %vm196_vm2, %v490_v44 }
 0x419   :  { %3810 = vmatprep.mubr.msk.bf16.mxu0 %vm4331_vm1, %v4330_v62 }
 0x433   :  { %v300_v45 = vpop.xlane.xlu0 %299 }
 0x434   :  { %v308_v46 = vsub.f32 %v241_v28, %v300_v45 }
 0x435   :  { %v297_v47 = vpop.xlane.xlu1 %296 }
 0x436   :  { %v313_v48 = vmul.f32 1.442695, %v308_v46  ;;  %v307_v49 = vsub.f32 %v238_v29, %v297_v47 }
 0x437   :  { %v334_v50 = vpop.permute.xlu0 %333 }
 0x438   :  { %v311_v51 = vmul.f32 1.442695, %v307_v49  ;;  %3779 = vmatpush3.bf16.msra.mxu1 %v334_v50  ;;  %4162 = vpow2.f32 %v313_v48 }
 0x439   :  { %3790 = vmatprep.subr.bf16.mxu1 %v4330_v62  ;;  %v441_v54 = vpop.permute.xlu1 %440 }
 0x43a   :  { %4164 = vpow2.f32 %v311_v51  ;;  %v446_v56 = vsel %vm196_vm2, %v441_v54, 0 }
 0x43d   :  { %v439_v57 = vpop.permute.xlu1 %438 }
 0x442   :  { %v4163_v52 = vpop.eup %4162 }
 0x443   :  { %v322_v26 = vsel %vm294_vm5, %v4163_v52, 0.0 }
 0x444   :  { %v4165_v53 = vpop.eup %4164 }
 0x445   :  { %v331_v55 = vpack.c.bf16 %v4163_v52, %v4165_v53  ;;  %v319_v23 = vsel %vm294_vm5, %v4165_v53, 0.0 }
 0x447   :  { %3781 = vmatmul.mubr.msk.bf16.vlgmr.msra.gmra.mrb[8].mxu1 %vm294_vm5, %v331_v55 }
 0x448   :  { %3791 = vmatpush3.bf16.xpose.msra.mxu1 %v446_v56  ;;  %3792 = vmatprep.mubr.msk.bf16.mxu1 %vm4331_vm1, %v4330_v62 }
 0x449   :  { %3802 = vmatprep.subr.bf16.mxu1 %v4330_v62 }
 0x44f   :  { %3793 = vmatmul.mubr.msk.bf16.vlgmr.msra.gmra.mrb[12].mxu1 %vm196_vm2, %v439_v57 }
 0x450   :  { %3804 = vmatprep.mubr.msk.bf16.mxu1 %vm4331_vm1, %v4330_v62 }
 0x4e3   :  { %v4502_v58 = vpop.f32.mrb[4].mxu0 }
 0x4e4   :  { %v3788_v59 = vpop.f32.mrb[5].mxu0 }
 0x4e5   :  { %v4504_v60 = vpop.f32.mrb[6].mxu0 }
 0x4e6   :  { %v3789_v61 = vpop.f32.mrb[7].mxu0 }
 0x4eb   :  { %v533_v63 = vpop.f32.mrb[8].mxu0 }
 0x4ec   :  { %v534_v0 = vadd.f32 %v533_v63, %v4454_v14  ;;  %v3800_v1 = vpop.f32.mrb[9].mxu0 }
 0x4ed   :  { %v536_v3 = vpop.f32.mrb[10].mxu0 }
 0x4ee   :  { %v537_v5 = vadd.f32 %v536_v3, %v4456_v16  ;;  %v3801_v6 = vpop.f32.mrb[11].mxu0  ;;  %v546_v7 = vsel %vm294_vm5, %v534_v0, -inf }
 0x4ef   :  { %547 = vmax.xlane.f32.xlu0 %v546_v7 }
 0x4f0   :  { %v549_v8 = vsel %vm294_vm5, %v537_v5, -inf }
 0x4f1   :  { %550 = vmax.xlane.f32.xlu1 %v549_v8 }
 0x502   :  { %802 = vrot.lane.b32.xlu1 %v4436_v4, %s4337_s29 }
 0x505   :  { %625 = vrot.lane.b32.xlu0 %v4434_v2, %s4338_s30 }
 0x506   :  { %853 = vrot.lane.b32.xlu1 %v4434_v2, %s4337_s29 }
 0x509   :  { %800 = vrot.lane.b32.xlu0 %v4436_v4, %s4339_s10 }
 0x50d   :  { %851 = vrot.lane.b32.xlu0 %v4434_v2, %s4339_s10 }
 0x51a   :  { %v4520_v9 = vpop.f32.mrb[8].mxu1 }
 0x51b   :  { %v3782_v10 = vpop.f32.mrb[9].mxu1 }
 0x51c   :  { %v4522_v11 = vpop.f32.mrb[10].mxu1 }
 0x51d   :  { %v3783_v12 = vpop.f32.mrb[11].mxu1 }
 0x522   :  { %v482_v13 = vpop.f32.mrb[12].mxu1 }
 0x523   :  { %v3794_v15 = vpop.f32.mrb[13].mxu1  ;;  %v483_v18 = vadd.f32 %v482_v13, %v4454_v14  ;;  %v682_v13 = vld [vmem:[%s5110_s4 + $0x4] sm:$0xf] }
 0x524   :  { %v485_v17 = vpop.f32.mrb[14].mxu1  ;;  %v691_v15 = vsel %vm689_vm6, %v682_v13, 0 }
 0x525   :  { %v3795_v19 = vpop.f32.mrb[15].mxu1  ;;  %v486_v20 = vadd.f32 %v485_v17, %v4456_v16  ;;  %v540_v21 = vsel %vm294_vm5, %v483_v18, -inf  ;;  %v437_v17 = vld [vmem:[%s5110_s4] sm:$0xf] }
 0x527   :  { %v543_v22 = vsel %vm294_vm5, %v486_v20, -inf }
 0x52a   :  { %541 = vmax.xlane.f32.xlu1 %v540_v21 }
 0x52c   :  { %544 = vmax.xlane.f32.xlu0 %v543_v22 }
 0x52e   :  { %320 = vadd.xlane.f32.xlu1 %v319_v23 }
 0x532   :  { %326 = vadd.xlane.f32.xlu1 %v325_v24 }
 0x536   :  { %329 = vadd.xlane.f32.xlu1 %v328_v25 }
 0x542   :  { %578 = vrot.lane.b32.xlu0 %v4436_v4, %s4338_s30 }
 0x561   :  { %323 = vadd.xlane.f32.xlu0 %v322_v26 }
 0x577   :  { %987 = vrot.lane.b32.xlu0 %v4434_v2, %s4340_s11 }
 0x57c   :  { %v548_v27 = vpop.xlane.xlu0 %547 }
 0x57d   :  { %v554_v28 = vsub.f32 %v534_v0, %v548_v27 }
 0x57e   :  { %v551_v29 = vpop.xlane.xlu1 %550 }
 0x57f   :  { %v560_v30 = vmul.f32 1.442695, %v554_v28  ;;  %v555_v31 = vsub.f32 %v537_v5, %v551_v29 }
 0x580   :  { %v626_v32 = vpop.permute.xlu0 %625 }
 0x581   :  { %4166 = vpow2.f32 %v560_v30  ;;  %v562_v33 = vmul.f32 1.442695, %v555_v31  ;;  %3809 = vmatpush3.bf16.msra.mxu0 %v626_v32 }
 0x582   :  { %3826 = vmatprep.subr.bf16.mxu0 %v4330_v62  ;;  %v803_v37 = vpop.permute.xlu1 %802 }
 0x583   :  { %4168 = vpow2.f32 %v562_v33  ;;  %v808_v39 = vsel %vm196_vm2, %v803_v37, 0 }
 0x584   :  { %v801_v41 = vpop.permute.xlu0 %800 }
 0x586   :  { %v854_v40 = vpop.permute.xlu1 %853 }
 0x587   :  { %v859_v42 = vsel %vm196_vm2, %v854_v40, 0 }
 0x588   :  { %v852_v43 = vpop.permute.xlu0 %851 }
 0x58b   :  { %v4167_v34 = vpop.eup %4166 }
 0x58c   :  { %v570_v35 = vsel %vm294_vm5, %v4167_v34, 0.0 }
 0x58d   :  { %v4169_v36 = vpop.eup %4168  ;;  %571 = vadd.xlane.f32.xlu1 %v570_v35 }
 0x58e   :  { %v577_v38 = vpack.c.bf16 %v4169_v36, %v4167_v34  ;;  %v573_v59 = vsel %vm294_vm5, %v4169_v36, 0.0 }
 0x590   :  { %3811 = vmatmul.mubr.msk.bf16.vlgmr.msra.gmra.mrb[12].mxu0 %vm294_vm5, %v577_v38 }
 0x591   :  { %3827 = vmatpush3.bf16.xpose.msra.mxu0 %v808_v39  ;;  %3828 = vmatprep.mubr.msk.bf16.mxu0 %vm4331_vm1, %v4330_v62 }
 0x592   :  { %3832 = vmatprep.subr.bf16.mxu0 %v4330_v62 }
 0x598   :  { %3829 = vmatmul.mubr.msk.bf16.vlgmr.msra.gmra.mrb[16].mxu0 %vm196_vm2, %v801_v41 }
 0x599   :  { %3833 = vmatpush3.bf16.xpose.msra.mxu0 %v859_v42  ;;  %3834 = vmatprep.mubr.msk.bf16.mxu0 %vm4331_vm1, %v4330_v62 }
 0x59a   :  { %3844 = vmatprep.subr.bf16.mxu0 %v4330_v62 }
 0x5a0   :  { %3835 = vmatmul.mubr.msk.bf16.vlgmr.msra.gmra.mrb[20].mxu0 %vm196_vm2, %v852_v43 }
 0x5a1   :  { %3846 = vmatprep.mubr.msk.bf16.mxu0 %vm4331_vm1, %v4330_v62 }
 0x5b7   :  { %v542_v44 = vpop.xlane.xlu1 %541 }
 0x5b8   :  { %v552_v45 = vsub.f32 %v483_v18, %v542_v44 }
 0x5b9   :  { %v545_v46 = vpop.xlane.xlu0 %544 }
 0x5ba   :  { %v556_v47 = vmul.f32 1.442695, %v552_v45  ;;  %v553_v48 = vsub.f32 %v486_v20, %v545_v46 }
 0x5bb   :  { %v321_v49 = vpop.xlane.xlu1 %320 }
 0x5bc   :  { %4170 = vpow2.f32 %v556_v47  ;;  %v558_v50 = vmul.f32 1.442695, %v553_v48 }
 0x5bd   :  { %v579_v51 = vpop.permute.xlu0 %578 }
 0x5be   :  { %4172 = vpow2.f32 %v558_v50  ;;  %3803 = vmatpush3.bf16.msra.mxu1 %v579_v51 }
 0x5bf   :  { %v327_v52 = vpop.xlane.xlu1 %326  ;;  %4102 = vmatprep.subr.msk.bf16.mxu1 %vm689_vm6, %v682_v13 }
 0x5c0   :  { %4174 = vrcp.f32 %v327_v52 }
 0x5c3   :  { %v330_v53 = vpop.xlane.xlu1 %329 }
 0x5c4   :  { %4176 = vrcp.f32 %v330_v53 }
 0x5c5   :  { %4178 = vrcp.f32 %v321_v49 }
 0x5c6   :  { %v4171_v54 = vpop.eup %4170 }
 0x5c7   :  { %v564_v55 = vsel %vm294_vm5, %v4171_v54, 0.0 }
 0x5c8   :  { %v4173_v56 = vpop.eup %4172  ;;  %565 = vadd.xlane.f32.xlu1 %v564_v55 }
 0x5c9   :  { %v576_v57 = vpack.c.bf16 %v4173_v56, %v4171_v54  ;;  %v567_v3 = vsel %vm294_vm5, %v4173_v56, 0.0  ;;  %v749_v54 = vsel %vm689_vm6, %v437_v17, 0 }
 0x5ca   :  { %v4175_v61 = vpop.eup %4174 }
 0x5cb   :  { %3805 = vmatmul.mubr.msk.bf16.vlgmr.msra.gmra.mrb[16].mxu1 %vm294_vm5, %v576_v57  ;;  %v4557_v0 = vmul.f32 %v4175_v61, %v4502_v58 }
 0x5cc   :  { %574 = vadd.xlane.f32.xlu1 %v573_v59  ;;  %3815 = vmatpush3.bf16.msra.mxu1 %v691_v15 }
 0x5cd   :  { %4103 = vmatprep.subr.msk.bf16.mxu1 %vm689_vm6, %v437_v17 }
 0x5ce   :  { %v4177_v63 = vpop.eup %4176 }
 0x5cf   :  { %v4560_v1 = vmul.f32 %v4177_v63, %v4504_v60  ;;  %v4179_v8 = vpop.eup %4178 }
 0x5d0   :  { %568 = vadd.xlane.f32.xlu1 %v567_v3  ;;  %v431_v58 = vmul.f32 %v4179_v8, %v4520_v9 }
 0x5d1   :  { %v436_v5 = vpack.c.bf16 %v4560_v1, %v4557_v0 }
 0x5ee   :  { %v324_v6 = vpop.xlane.xlu0 %323 }
 0x5ef   :  { %4180 = vrcp.f32 %v324_v6 }
 0x5f2   :  { %v988_v7 = vpop.permute.xlu0 %987 }
 0x5f3   :  { %3845 = vmatpush3.bf16.msra.mxu0 %v988_v7 }
 0x5f4   :  { %3856 = vmatprep.subr.bf16.mxu0 %v4330_v62 }
 0x5f9   :  { %v4181_v10 = vpop.eup %4180 }
 0x5fa   :  { %v432_v60 = vmul.f32 %v4181_v10, %v4522_v11 }
 0x5fc   :  { %v435_v12 = vpack.c.bf16 %v432_v60, %v431_v58 }
 0x61a   :  { %v572_v9 = vpop.xlane.xlu1 %571 }
 0x655   :  { %v566_v18 = vpop.xlane.xlu1 %565 }
 0x659   :  { %v575_v11 = vpop.xlane.xlu1 %574 }
 0x65a   :  { %4182 = vrcp.f32 %v575_v11 }
 0x65b   :  { %4184 = vrcp.f32 %v572_v9 }
 0x65c   :  { %4186 = vrcp.f32 %v566_v18 }
 0x65d   :  { %v569_v44 = vpop.xlane.xlu1 %568 }
 0x65e   :  { %4188 = vrcp.f32 %v569_v44 }
 0x663   :  { %v665_v19 = vpop.f32.mrb[12].mxu0 }
 0x664   :  { %v4183_v20 = vpop.eup %4182  ;;  %v3812_v21 = vpop.f32.mrb[13].mxu0 }
 0x665   :  { %v4185_v22 = vpop.eup %4184  ;;  %v668_v23 = vpop.f32.mrb[14].mxu0 }
 0x666   :  { %v678_v24 = vmul.f32 %v4185_v22, %v665_v19  ;;  %v679_v25 = vmul.f32 %v4183_v20, %v668_v23  ;;  %v3813_v26 = vpop.f32.mrb[15].mxu0  ;;  %v4187_v46 = vpop.eup %4186  ;;  %v1044_v19 = vld [vmem:[%s5110_s4 + $0x8] sm:$0xf] }
 0x667   :  { %v1052_v20 = vsel %vm689_vm6, %v1044_v19, 0 }
 0x668   :  { %v681_v27 = vpack.c.bf16 %v679_v25, %v678_v24  ;;  %v4189_v48 = vpop.eup %4188 }
 0x66b   :  { %v844_v28 = vpop.f32.mrb[16].mxu0 }
 0x66c   :  { %v845_v29 = vadd.f32 %v844_v28, %v4454_v14  ;;  %v3830_v30 = vpop.f32.mrb[17].mxu0 }
 0x66d   :  { %v847_v31 = vpop.f32.mrb[18].mxu0 }
 0x66e   :  { %v848_v32 = vadd.f32 %v847_v31, %v4456_v16  ;;  %v3831_v33 = vpop.f32.mrb[19].mxu0  ;;  %v902_v34 = vsel %vm294_vm5, %v845_v29, -inf }
 0x66f   :  { %903 = vmax.xlane.f32.xlu1 %v902_v34 }
 0x670   :  { %v905_v35 = vsel %vm294_vm5, %v848_v32, -inf }
 0x673   :  { %v895_v36 = vpop.f32.mrb[20].mxu0  ;;  %906 = vmax.xlane.f32.xlu1 %v905_v35 }
 0x674   :  { %v896_v37 = vadd.f32 %v895_v36, %v4454_v14  ;;  %v3836_v38 = vpop.f32.mrb[21].mxu0 }
 0x675   :  { %v898_v39 = vpop.f32.mrb[22].mxu0 }
 0x676   :  { %v899_v40 = vadd.f32 %v898_v39, %v4456_v16  ;;  %v3837_v41 = vpop.f32.mrb[23].mxu0  ;;  %v908_v42 = vsel %vm294_vm5, %v896_v37, -inf }
 0x677   :  { %909 = vmax.xlane.f32.xlu1 %v908_v42 }
 0x678   :  { %v911_v43 = vsel %vm294_vm5, %v899_v40, -inf }
 0x67b   :  { %912 = vmax.xlane.f32.xlu1 %v911_v43 }
 0x68c   :  { %940 = vrot.lane.b32.xlu1 %v4436_v4, %s4340_s11 }
 0x69e   :  { %v618_v45 = vpop.f32.mrb[16].mxu1 }
 0x69f   :  { %v3806_v47 = vpop.f32.mrb[17].mxu1  ;;  %v676_v50 = vmul.f32 %v4187_v46, %v618_v45 }
 0x6a0   :  { %v621_v49 = vpop.f32.mrb[18].mxu1 }
 0x6a1   :  { %v677_v51 = vmul.f32 %v4189_v48, %v621_v49  ;;  %v3807_v52 = vpop.f32.mrb[19].mxu1 }
 0x6a3   :  { %v680_v53 = vpack.c.bf16 %v677_v51, %v676_v50 }
 0x6a5   :  { %3816 = vmatprep.mubr.msk.bf16.mxu1 %vm196_vm2, %v680_v53 }
 0x6a6   :  { %3817 = vmatmul.mubr.msk.bf16.vlgmr.msra.gmra.mrb[20].mxu1 %vm196_vm2, %v681_v27 }
 0x6a7   :  { %3822 = vmatprep.mubr.msk.bf16.mxu1 %vm196_vm2, %v435_v12  ;;  %3821 = vmatpush3.bf16.msra.mxu1 %v749_v54 }
 0x6a8   :  { %3838 = vmatprep.subr.bf16.mxu1 %v4330_v62 }
 0x6b2   :  { %3823 = vmatmul.mubr.msk.bf16.vlgmr.msra.gmra.mrb[20].mxu1 %vm196_vm2, %v436_v5 }
 0x6b3   :  { %3840 = vmatprep.mubr.msk.bf16.mxu1 %vm4331_vm1, %v4330_v62 }
 0x6fc   :  { %v904_v55 = vpop.xlane.xlu1 %903 }
 0x6fd   :  { %v914_v56 = vsub.f32 %v845_v29, %v904_v55 }
 0x6ff   :  { %v918_v57 = vmul.f32 1.442695, %v914_v56 }
 0x700   :  { %v907_v59 = vpop.xlane.xlu1 %906 }
 0x701   :  { %4190 = vpow2.f32 %v918_v57  ;;  %v915_v61 = vsub.f32 %v848_v32, %v907_v59 }
 0x703   :  { %v920_v63 = vmul.f32 1.442695, %v915_v61 }
 0x704   :  { %v910_v3 = vpop.xlane.xlu1 %909 }
 0x705   :  { %4192 = vpow2.f32 %v920_v63  ;;  %v916_v6 = vsub.f32 %v896_v37, %v910_v3 }
 0x707   :  { %v922_v7 = vmul.f32 1.442695, %v916_v6 }
 0x708   :  { %v913_v8 = vpop.xlane.xlu1 %912 }
 0x709   :  { %v917_v10 = vsub.f32 %v899_v40, %v913_v8  ;;  %4194 = vpow2.f32 %v922_v7 }
 0x70b   :  { %v4191_v58 = vpop.eup %4190  ;;  %v924_v0 = vmul.f32 1.442695, %v917_v10 }
 0x70c   :  { %v941_v1 = vpop.permute.xlu1 %940  ;;  %v926_v5 = vsel %vm294_vm5, %v4191_v58, 0.0 }
 0x70d   :  { %4196 = vpow2.f32 %v924_v0  ;;  %927 = vadd.xlane.f32.xlu1 %v926_v5  ;;  %3839 = vmatpush3.bf16.msra.mxu1 %v941_v1 }
 0x70e   :  { %4104 = vmatprep.subr.msk.bf16.mxu1 %vm689_vm6, %v1044_v19 }
 0x70f   :  { %v4193_v60 = vpop.eup %4192 }
 0x710   :  { %v929_v12 = vsel %vm294_vm5, %v4193_v60, 0.0  ;;  %v938_v13 = vpack.c.bf16 %v4193_v60, %v4191_v58 }
 0x711   :  { %930 = vadd.xlane.f32.xlu0 %v929_v12 }
 0x712   :  { %3841 = vmatmul.mubr.msk.bf16.vlgmr.msra.gmra.mrb[24].mxu1 %vm294_vm5, %v938_v13 }
 0x713   :  { %v4195_v15 = vpop.eup %4194  ;;  %3851 = vmatpush3.bf16.msra.mxu1 %v1052_v20 }
 0x714   :  { %v932_v18 = vsel %vm294_vm5, %v4195_v15, 0.0  ;;  %3862 = vmatprep.subr.bf16.mxu1 %v4330_v62 }
 0x717   :  { %v4197_v17 = vpop.eup %4196 }
 0x718   :  { %v939_v9 = vpack.c.bf16 %v4197_v17, %v4195_v15  ;;  %v935_v11 = vsel %vm294_vm5, %v4197_v17, 0.0 }
 0x71a   :  { %3847 = vmatmul.mubr.msk.bf16.vlgmr.msra.gmra.mrb[24].mxu0 %vm294_vm5, %v939_v9 }
 0x71b   :  { %3858 = vmatprep.mubr.msk.bf16.mxu0 %vm4331_vm1, %v4330_v62 }
 0x71e   :  { %1160 = vrot.lane.b32.xlu1 %v4434_v2, %s4341_s16 }
 0x727   :  { %1109 = vrot.lane.b32.xlu0 %v4436_v4, %s4341_s16 }
 0x72b   :  { %1158 = vrot.lane.b32.xlu0 %v4434_v2, %s4342_s17 }
 0x742   :  { %933 = vadd.xlane.f32.xlu1 %v932_v18 }
 0x746   :  { %936 = vadd.xlane.f32.xlu1 %v935_v11 }
 0x757   :  { %1107 = vrot.lane.b32.xlu1 %v4436_v4, %s4342_s17 }
 0x79a   :  { %v928_v24 = vpop.xlane.xlu1 %927 }
 0x79b   :  { %4198 = vrcp.f32 %v928_v24 }
 0x79e   :  { %v931_v21 = vpop.xlane.xlu0 %930  ;;  %v1161_v25 = vpop.permute.xlu1 %1160 }
 0x79f   :  { %4200 = vrcp.f32 %v931_v21  ;;  %v1166_v47 = vsel %vm196_vm2, %v1161_v25, 0 }
 0x7a2   :  { %v1110_v22 = vpop.permute.xlu0 %1109 }
 0x7a3   :  { %v1115_v23 = vsel %vm196_vm2, %v1110_v22, 0 }
 0x7a4   :  { %3857 = vmatpush3.bf16.xpose.msra.mxu0 %v1115_v23 }
 0x7a5   :  { %3868 = vmatprep.subr.bf16.mxu0 %v4330_v62  ;;  %v4199_v30 = vpop.eup %4198 }
 0x7a6   :  { %v1159_v48 = vpop.permute.xlu0 %1158 }
 0x7a9   :  { %v4201_v32 = vpop.eup %4200 }
 0x7cf   :  { %v934_v26 = vpop.xlane.xlu1 %933 }
 0x7d0   :  { %4202 = vrcp.f32 %v934_v26 }
 0x7d3   :  { %v937_v27 = vpop.xlane.xlu1 %936 }
 0x7d4   :  { %4204 = vrcp.f32 %v937_v27 }
 0x7d7   :  { %v1108_v28 = vpop.permute.xlu1 %1107 }
 0x7d8   :  { %3859 = vmatmul.mubr.msk.bf16.vlgmr.msra.gmra.mrb[28].mxu0 %vm196_vm2, %v1108_v28  ;;  %v1351_v28 = vld [vmem:[%s5110_s4 + $0xc] sm:$0xf] }
 0x7d9   :  { %3870 = vmatprep.mubr.msk.bf16.mxu0 %vm4331_vm1, %v4330_v62 }
 0x7da   :  { %v4203_v39 = vpop.eup %4202 }
 0x7de   :  { %v4205_v41 = vpop.eup %4204 }
 0x7e5   :  { %v980_v29 = vpop.f32.mrb[24].mxu1 }
 0x7e6   :  { %v3842_v31 = vpop.f32.mrb[25].mxu1  ;;  %v1038_v34 = vmul.f32 %v4199_v30, %v980_v29  ;;  %v1359_v29 = vsel %vm689_vm6, %v1351_v28, 0 }
 0x7e7   :  { %v983_v33 = vpop.f32.mrb[26].mxu1 }
 0x7e8   :  { %v1039_v35 = vmul.f32 %v4201_v32, %v983_v33  ;;  %v3843_v36 = vpop.f32.mrb[27].mxu1 }
 0x7ea   :  { %v1042_v37 = vpack.c.bf16 %v1039_v35, %v1038_v34 }
 0x7ec   :  { %3852 = vmatprep.mubr.msk.bf16.mxu1 %vm196_vm2, %v1042_v37 }
 0x7ed   :  { %v1027_v38 = vpop.f32.mrb[24].mxu0 }
 0x7ee   :  { %v3848_v40 = vpop.f32.mrb[25].mxu0  ;;  %v1040_v43 = vmul.f32 %v4203_v39, %v1027_v38 }
 0x7ef   :  { %v1030_v42 = vpop.f32.mrb[26].mxu0 }
 0x7f0   :  { %v1041_v44 = vmul.f32 %v4205_v41, %v1030_v42  ;;  %v3849_v45 = vpop.f32.mrb[27].mxu0 }
 0x7f2   :  { %v1043_v46 = vpack.c.bf16 %v1041_v44, %v1040_v43 }
 0x7f4   :  { %3853 = vmatmul.mubr.msk.bf16.vlgmr.msra.gmra.mrb[20].mxu1 %vm196_vm2, %v1043_v46 }
 0x7f5   :  { %3863 = vmatpush3.bf16.xpose.msra.mxu1 %v1166_v47  ;;  %3864 = vmatprep.mubr.msk.bf16.mxu1 %vm4331_vm1, %v4330_v62 }
 0x7f6   :  { %3874 = vmatprep.subr.bf16.mxu1 %v4330_v62 }
 0x7fc   :  { %3865 = vmatmul.mubr.msk.bf16.vlgmr.msra.gmra.mrb[28].mxu1 %vm196_vm2, %v1159_v48 }
 0x7fd   :  { %3876 = vmatprep.mubr.msk.bf16.mxu1 %vm4331_vm1, %v4330_v62 }
 0x8ab   :  { %v1151_v49 = vpop.f32.mrb[28].mxu0 }
 0x8ac   :  { %v1152_v50 = vadd.f32 %v1151_v49, %v4454_v14  ;;  %v3860_v51 = vpop.f32.mrb[29].mxu0 }
 0x8ad   :  { %v1154_v52 = vpop.f32.mrb[30].mxu0 }
 0x8ae   :  { %v1155_v53 = vadd.f32 %v1154_v52, %v4456_v16  ;;  %v3861_v54 = vpop.f32.mrb[31].mxu0  ;;  %v1209_v55 = vsel %vm294_vm5, %v1152_v50, -inf }
 0x8af   :  { %1210 = vmax.xlane.f32.xlu1 %v1209_v55  ;;  %v4326_v54 = vld [vmem:[%s5107_s0] sm:$0xff] }
 0x8b0   :  { %v1212_v56 = vsel %vm294_vm5, %v1155_v53, -inf }
 0x8b1   :  { %1213 = vmax.xlane.f32.xlu0 %v1212_v56 }
 0x8cf   :  { %v1202_v57 = vpop.f32.mrb[28].mxu1 }
 0x8d0   :  { %v1203_v59 = vadd.f32 %v1202_v57, %v4454_v14  ;;  %v3866_v61 = vpop.f32.mrb[29].mxu1 }
 0x8d1   :  { %v1205_v63 = vpop.f32.mrb[30].mxu1 }
 0x8d2   :  { %v1206_v3 = vadd.f32 %v1205_v63, %v4456_v16  ;;  %v3867_v6 = vpop.f32.mrb[31].mxu1  ;;  %v1215_v7 = vsel %vm294_vm5, %v1203_v59, -inf  ;;  %v4328_v63 = vld [vmem:[%s5107_s0 + $0x8] sm:$0xff] }
 0x8d3   :  { %1216 = vmax.xlane.f32.xlu0 %v1215_v7  ;;  %v4329_v7 = vld [vmem:[%s5107_s0 + $0x18] sm:$0xff] }
 0x8d4   :  { %v1218_v8 = vsel %vm294_vm5, %v1206_v3, -inf }
 0x8d5   :  { %1219 = vmax.xlane.f32.xlu1 %v1218_v8 }
 0x8e6   :  { %1294 = vrot.lane.b32.xlu1 %v4434_v2, %s4343_s20 }
 0x8e9   :  { %1247 = vrot.lane.b32.xlu0 %v4436_v4, %s4343_s20 }
 0x93c   :  { %v1211_v10 = vpop.xlane.xlu1 %1210 }
 0x93d   :  { %v1221_v58 = vsub.f32 %v1152_v50, %v1211_v10 }
 0x93e   :  { %v1214_v0 = vpop.xlane.xlu0 %1213 }
 0x93f   :  { %v1225_v1 = vmul.f32 1.442695, %v1221_v58  ;;  %v1222_v5 = vsub.f32 %v1155_v53, %v1214_v0 }
 0x941   :  { %4206 = vpow2.f32 %v1225_v1  ;;  %v1227_v60 = vmul.f32 1.442695, %v1222_v5 }
 0x943   :  { %4208 = vpow2.f32 %v1227_v60 }
 0x94b   :  { %v4207_v12 = vpop.eup %4206 }
 0x94c   :  { %v1233_v13 = vsel %vm294_vm5, %v4207_v12, 0.0 }
 0x94d   :  { %v4209_v15 = vpop.eup %4208  ;;  %1234 = vadd.xlane.f32.xlu1 %v1233_v13 }
 0x94e   :  { %v1236_v17 = vsel %vm294_vm5, %v4209_v15, 0.0  ;;  %v1245_v22 = vpack.c.bf16 %v4209_v15, %v4207_v12 }
 0x94f   :  { %1237 = vadd.xlane.f32.xlu0 %v1236_v17 }
 0x960   :  { %v1217_v2 = vpop.xlane.xlu0 %1216 }
 0x961   :  { %v1223_v9 = vsub.f32 %v1203_v59, %v1217_v2  ;;  %v4327_v59 = vld [vmem:[%s5107_s0 + $0x10] sm:$0xff] }
 0x962   :  { %v1220_v18 = vpop.xlane.xlu1 %1219 }
 0x963   :  { %v1229_v4 = vmul.f32 1.442695, %v1223_v9  ;;  %v1224_v11 = vsub.f32 %v1206_v3, %v1220_v18 }
 0x964   :  { %v1248_v19 = vpop.permute.xlu0 %1247 }
 0x965   :  { %4210 = vpow2.f32 %v1229_v4  ;;  %v1231_v20 = vmul.f32 1.442695, %v1224_v11  ;;  %3869 = vmatpush3.bf16.msra.mxu0 %v1248_v19 }
 0x966   :  { %v1295_v21 = vpop.permute.xlu1 %1294 }
 0x967   :  { %4212 = vpow2.f32 %v1231_v20  ;;  %3875 = vmatpush3.bf16.msra.mxu1 %v1295_v21 }
 0x968   :  { %3871 = vmatmul.mubr.msk.bf16.vlgmr.msra.gmra.mrb[32].mxu0 %vm294_vm5, %v1245_v22  ;;  %4105 = vmatprep.subr.msk.bf16.mxu1 %vm689_vm6, %v1351_v28  ;;  %v4127_v28 = vld [vmem:[%s5111_s5 + $0x8] sm:$0xff]  }
 0x96f   :  { %v4211_v23 = vpop.eup %4210 }
 0x970   :  { %v1239_v24 = vsel %vm294_vm5, %v4211_v23, 0.0 }
 0x971   :  { %v4213_v25 = vpop.eup %4212  ;;  %1240 = vadd.xlane.f32.xlu0 %v1239_v24 }
 0x972   :  { %v1242_v26 = vsel %vm294_vm5, %v4213_v25, 0.0  ;;  %v1246_v27 = vpack.c.bf16 %v4213_v25, %v4211_v23 }
 0x973   :  { %1243 = vadd.xlane.f32.xlu1 %v1242_v26 }
 0x974   :  { %3877 = vmatmul.mubr.msk.bf16.vlgmr.msra.gmra.mrb[32].mxu1 %vm294_vm5, %v1246_v27  ;;  %v4126_v27 = vld [vmem:[%s5111_s5] sm:$0xff]  }
 0x975   :  { %3881 = vmatpush3.bf16.msra.mxu1 %v1359_v29  ;;  %3886 = vmatprep.subr.bf16.mxu0 %v4126_v27 }
 0x976   :  { %3887 = vmatpush3.bf16.msra.mxu0 %v4126_v27 }
 0x977   :  { %3888 = vmatprep.subr.bf16.mxu0 %v4127_v28 }
 0x97a   :  { %3889 = vmatpush3.bf16.msra.mxu0 %v4127_v28 }
 0x9da   :  { %v1235_v30 = vpop.xlane.xlu1 %1234 }
 0x9db   :  { %4214 = vrcp.f32 %v1235_v30 }
 0x9dc   :  { %v1238_v31 = vpop.xlane.xlu0 %1237 }
 0x9dd   :  { %4216 = vrcp.f32 %v1238_v31 }
 0x9e5   :  { %v4215_v34 = vpop.eup %4214 }
 0x9e7   :  { %v4217_v37 = vpop.eup %4216 }
 0x9fe   :  { %v1241_v32 = vpop.xlane.xlu0 %1240 }
 0x9ff   :  { %4218 = vrcp.f32 %v1241_v32 }
 0xa00   :  { %v1244_v35 = vpop.xlane.xlu1 %1243 }
 0xa01   :  { %4220 = vrcp.f32 %v1244_v35 }
 0xa09   :  { %v4219_v44 = vpop.eup %4218 }
 0xa0b   :  { %v4221_v46 = vpop.eup %4220 }
 0xa3b   :  { %v1287_v33 = vpop.f32.mrb[32].mxu0 }
 0xa3c   :  { %v3872_v36 = vpop.f32.mrb[33].mxu0  ;;  %v1345_v39 = vmul.f32 %v4215_v34, %v1287_v33 }
 0xa3d   :  { %v1290_v38 = vpop.f32.mrb[34].mxu0 }
 0xa3e   :  { %v1346_v40 = vmul.f32 %v4217_v37, %v1290_v38  ;;  %v3873_v41 = vpop.f32.mrb[35].mxu0 }
 0xa40   :  { %v1349_v42 = vpack.c.bf16 %v1346_v40, %v1345_v39 }
 0xa42   :  { %3882 = vmatprep.mubr.msk.bf16.mxu1 %vm196_vm2, %v1349_v42  ;;  %v3529_v42 = vld [vmem:[%s5109_s1 + $0x2] ss:$0 sm:$0xff] }
 0xa47   :  { %v1334_v43 = vpop.f32.mrb[32].mxu1 }
 0xa48   :  { %v3878_v45 = vpop.f32.mrb[33].mxu1  ;;  %v1347_v48 = vmul.f32 %v4219_v44, %v1334_v43 }
 0xa49   :  { %v1337_v47 = vpop.f32.mrb[34].mxu1 }
 0xa4a   :  { %v1348_v49 = vmul.f32 %v4221_v46, %v1337_v47  ;;  %v3879_v50 = vpop.f32.mrb[35].mxu1 }
 0xa4c   :  { %v1350_v51 = vpack.c.bf16 %v1348_v49, %v1347_v48  ;;  %v3530_v48 = vld [vmem:[%s5109_s1 + $0x3] ss:$0 sm:$0xff] }
 0xa4e   :  { %3883 = vmatmul.mubr.msk.bf16.vlgmr.msra.gmra.mrb[20].mxu1 %vm196_vm2, %v1350_v51 }
 0xb21   :  { %v3884_v52 = vpop.f32.mrb[20].mxu1 }
 0xb22   :  { %v1395_v53 = vpop.f32.mrb[21].mxu1  ;;  %v4667_v61 = vadd.f32 %v4327_v59, %v3884_v52 }
 0xb23   :  { %v4662_v55 = vadd.f32 %v4326_v54, %v1395_v53  ;;  %v3885_v56 = vpop.f32.mrb[22].mxu1 }
 0xb24   :  { %v1398_v57 = vpop.f32.mrb[23].mxu1  ;;  %v4679_v8 = vadd.f32 %v4329_v7, %v3885_v56  ;;  %v1426_v58 = vsel %vm48_vm0, %v4667_v61, 0.0 }
 0xb25   :  { %v4672_v3 = vadd.f32 %v4328_v63, %v1398_v57  ;;  %v1420_v6 = vsel %vm48_vm0, %v4662_v55, 0.0 }
 0xb26   :  { %1421 = vadd.xlane.f32.xlu0 %v1420_v6  ;;  %v1429_v0 = vsel %vm48_vm0, %v4679_v8, 0.0 }
 0xb27   :  { %v1423_v10 = vsel %vm48_vm0, %v4672_v3, 0.0 }
 0xb28   :  { %1424 = vadd.xlane.f32.xlu1 %v1423_v10  ;;  %v4128_v10 = vld [vmem:[%s5112_s6] sm:$0xff]  }
 0xb29   :  { %3894 = vmatprep.subr.bf16.mxu0 %v4128_v10 }
 0xb2a   :  { %1427 = vadd.xlane.f32.xlu0 %v1426_v58  ;;  %v4129_v58 = vld [vmem:[%s5112_s6 + $0x8] sm:$0xff]  }
 0xb2c   :  { %1430 = vadd.xlane.f32.xlu1 %v1429_v0  ;;  %v4130_v0 = vld [vmem:[%s5112_s6 + $0x10] sm:$0xff]  }
 0xbb3   :  { %v1422_v1 = vpop.xlane.xlu0 %1421 }
 0xbb4   :  { %v1432_v5 = vmul.f32 0.03125, %v1422_v1  ;;  %v4131_v1 = vld [vmem:[%s5112_s6 + $0x18] sm:$0xff]  }
 0xbb5   :  { %v1425_v60 = vpop.xlane.xlu1 %1424 }
 0xbb6   :  { %v1436_v12 = vsub.f32 %v4662_v55, %v1432_v5  ;;  %v1433_v13 = vmul.f32 0.03125, %v1425_v60  ;;  %v4132_v5 = vld [vmem:[%s5112_s6 + $0x20] sm:$0xff]   ;;  %v4133_v60 = vld [vmem:[%s5112_s6 + $0x28] sm:$0xff]  }
 0xbb7   :  { %v1428_v15 = vpop.xlane.xlu0 %1427 }
 0xbb8   :  { %v1437_v17 = vsub.f32 %v4672_v3, %v1433_v13  ;;  %v1434_v2 = vmul.f32 0.03125, %v1428_v15  ;;  %v1440_v9 = vmul.f32 %v1436_v12, %v1436_v12  ;;  %v4135_v13 = vld [vmem:[%s5112_s6 + $0x38] sm:$0xff]   ;;  %v3531_v15 = vld [vmem:[%s5113_s2] ss:$0 sm:$0xff] }
 0xbb9   :  { %v1431_v18 = vpop.xlane.xlu1 %1430 }
 0xbba   :  { %v1438_v4 = vsub.f32 %v4667_v61, %v1434_v2  ;;  %v1435_v11 = vmul.f32 0.03125, %v1431_v18  ;;  %v1444_v19 = vsel %vm48_vm0, %v1440_v9, 0.0  ;;  %v1441_v20 = vmul.f32 %v1437_v17, %v1437_v17 }
 0xbbb   :  { %1445 = vadd.xlane.f32.xlu0 %v1444_v19 }
 0xbbc   :  { %v1439_v21 = vsub.f32 %v4679_v8, %v1435_v11  ;;  %v1447_v22 = vsel %vm48_vm0, %v1441_v20, 0.0  ;;  %v1442_v23 = vmul.f32 %v1438_v4, %v1438_v4 }
 0xbbd   :  { %1448 = vadd.xlane.f32.xlu1 %v1447_v22 }
 0xbbe   :  { %v1450_v24 = vsel %vm48_vm0, %v1442_v23, 0.0  ;;  %v1443_v25 = vmul.f32 %v1439_v21, %v1439_v21 }
 0xbbf   :  { %1451 = vadd.xlane.f32.xlu0 %v1450_v24 }
 0xbc0   :  { %v1453_v26 = vsel %vm48_vm0, %v1443_v25, 0.0 }
 0xbc1   :  { %1454 = vadd.xlane.f32.xlu1 %v1453_v26 }
 0xc48   :  { %v1446_v29 = vpop.xlane.xlu0 %1445 }
 0xc49   :  { %v1456_v30 = vmul.f32 0.03125, %v1446_v29 }
 0xc4a   :  { %v1449_v31 = vpop.xlane.xlu1 %1448 }
 0xc4b   :  { %v1460_v32 = vadd.f32 1e-05, %v1456_v30  ;;  %v1457_v33 = vmul.f32 0.03125, %v1449_v31 }
 0xc4c   :  { %v1452_v34 = vpop.xlane.xlu0 %1451 }
 0xc4d   :  { %4222 = vrsqrt.f32 %v1460_v32  ;;  %v1461_v35 = vadd.f32 1e-05, %v1457_v33  ;;  %v1458_v36 = vmul.f32 0.03125, %v1452_v34 }
 0xc4e   :  { %v1455_v37 = vpop.xlane.xlu1 %1454 }
 0xc4f   :  { %4224 = vrsqrt.f32 %v1461_v35  ;;  %v1462_v38 = vadd.f32 1e-05, %v1458_v36  ;;  %v1459_v39 = vmul.f32 0.03125, %v1455_v37 }
 0xc51   :  { %4226 = vrsqrt.f32 %v1462_v38  ;;  %v1463_v40 = vadd.f32 1e-05, %v1459_v39 }
 0xc53   :  { %4228 = vrsqrt.f32 %v1463_v40 }
 0xc57   :  { %v4223_v41 = vpop.eup %4222 }
 0xc58   :  { %v1468_v43 = vmul.f32 %v4223_v41, %v1436_v12  ;;  %v4134_v12 = vld [vmem:[%s5112_s6 + $0x30] sm:$0xff]  }
 0xc59   :  { %v4225_v44 = vpop.eup %4224 }
 0xc5a   :  { %v1469_v45 = vmul.f32 %v4225_v44, %v1437_v17  ;;  %v1476_v46 = vmul.f32 %v3529_v42, %v1468_v43 }
 0xc5b   :  { %v4227_v47 = vpop.eup %4226 }
 0xc5c   :  { %v1470_v49 = vmul.f32 %v4227_v47, %v1438_v4  ;;  %v1477_v50 = vmul.f32 %v3529_v42, %v1469_v45  ;;  %v1484_v54 = vadd.f32 %v3530_v48, %v1476_v46 }
 0xc5d   :  { %v4229_v51 = vpop.eup %4228 }
 0xc5e   :  { %v1478_v52 = vmul.f32 %v3529_v42, %v1470_v49  ;;  %v1471_v53 = vmul.f32 %v4229_v51, %v1439_v21  ;;  %v1485_v56 = vadd.f32 %v3530_v48, %v1477_v50 }
 0xc60   :  { %v1479_v57 = vmul.f32 %v3529_v42, %v1471_v53  ;;  %v1488_v59 = vpack.c.bf16 %v1485_v56, %v1484_v54  ;;  %v1486_v63 = vadd.f32 %v3530_v48, %v1478_v52 }
 0xc62   :  { %3890 = vmatprep.mubr.msk.bf16.mxu0 %vm48_vm0, %v1488_v59  ;;  %v1487_v6 = vadd.f32 %v3530_v48, %v1479_v57 }
 0xc64   :  { %v1489_v7 = vpack.c.bf16 %v1487_v6, %v1486_v63  ;;  %v3536_v6 = vld [vmem:[%s5109_s1 + $0x4] ss:$0 sm:$0xff] }
 0xc66   :  { %3891 = vmatmul.mubr.msk.bf16.vlgmr.msra.gmra.mrb[36].mxu0 %vm48_vm0, %v1489_v7 }
 0xc67   :  { %3895 = vmatpush3.bf16.msra.mxu0 %v4128_v10 }
 0xc68   :  { %3896 = vmatprep.subr.bf16.mxu0 %v4129_v58 }
 0xc6b   :  { %3897 = vmatpush3.bf16.msra.mxu0 %v4129_v58 }
 0xc6c   :  { %3898 = vmatprep.subr.bf16.mxu0 %v4130_v0 }
 0xc6f   :  { %3899 = vmatpush3.bf16.msra.mxu0 %v4130_v0 }
 0xc70   :  { %3900 = vmatprep.subr.bf16.mxu0 %v4131_v1 }
 0xc73   :  { %3901 = vmatpush3.bf16.msra.mxu0 %v4131_v1 }
 0xc74   :  { %3902 = vmatprep.subr.bf16.mxu0 %v4132_v5 }
 0xc77   :  { %3903 = vmatpush3.bf16.msra.mxu0 %v4132_v5 }
 0xc78   :  { %3904 = vmatprep.subr.bf16.mxu0 %v4133_v60 }
 0xc7b   :  { %3905 = vmatpush3.bf16.msra.mxu0 %v4133_v60 }
 0xc7c   :  { %3906 = vmatprep.subr.bf16.mxu0 %v4134_v12 }
 0xc7f   :  { %3907 = vmatpush3.bf16.msra.mxu0 %v4134_v12 }
 0xc80   :  { %3908 = vmatprep.subr.bf16.mxu0 %v4135_v13 }
 0xc83   :  { %3909 = vmatpush3.bf16.msra.mxu0 %v4135_v13 }
 0xc84   :  { %3940 = vmatprep.subr.bf16.mxu0 %v4330_v62 }
 0xd39   :  { %v3892_v17 = vpop.f32.mrb[36].mxu0 }
 0xd3a   :  { %v1562_v2 = vadd.f32 %v3892_v17, %v3531_v15  ;;  %v1553_v9 = vpop.f32.mrb[37].mxu0 }
 0xd3b   :  { %v1554_v18 = vadd.f32 %v3531_v15, %v1553_v9  ;;  %v3893_v4 = vpop.f32.mrb[38].mxu0 }
 0xd3c   :  { %v1574_v11 = vmul.f32 0.044715, %v1562_v2  ;;  %v1565_v19 = vadd.f32 %v3893_v4, %v3531_v15  ;;  %v1556_v20 = vpop.f32.mrb[39].mxu0  ;;  %v1570_v47 = vmul.f32 0.5, %v1562_v2 }
 0xd3d   :  { %v1572_v21 = vmul.f32 0.044715, %v1554_v18  ;;  %v1557_v22 = vadd.f32 %v3531_v15, %v1556_v20  ;;  %v1568_v50 = vmul.f32 0.5, %v1554_v18 }
 0xd3e   :  { %v1578_v23 = vmul.f32 %v1574_v11, %v1562_v2  ;;  %v1575_v24 = vmul.f32 0.044715, %v1565_v19  ;;  %v1571_v48 = vmul.f32 0.5, %v1565_v19 }
 0xd3f   :  { %v1576_v25 = vmul.f32 %v1572_v21, %v1554_v18  ;;  %v1573_v26 = vmul.f32 0.044715, %v1557_v22  ;;  %v1569_v51 = vmul.f32 0.5, %v1557_v22 }
 0xd40   :  { %v1582_v27 = vmul.f32 %v1578_v23, %v1562_v2  ;;  %v1579_v28 = vmul.f32 %v1575_v24, %v1565_v19 }
 0xd41   :  { %v1580_v29 = vmul.f32 %v1576_v25, %v1554_v18  ;;  %v1577_v30 = vmul.f32 %v1573_v26, %v1557_v22 }
 0xd42   :  { %v1586_v31 = vadd.f32 %v1582_v27, %v1562_v2  ;;  %v1583_v32 = vmul.f32 %v1579_v28, %v1565_v19 }
 0xd43   :  { %v1581_v33 = vmul.f32 %v1577_v30, %v1557_v22  ;;  %v1584_v34 = vadd.f32 %v1580_v29, %v1554_v18 }
 0xd44   :  { %v1590_v35 = vmul.f32 0.7978846, %v1586_v31  ;;  %v1587_v36 = vadd.f32 %v1583_v32, %v1565_v19 }
 0xd45   :  { %v1585_v37 = vadd.f32 %v1581_v33, %v1557_v22  ;;  %v1588_v38 = vmul.f32 0.7978846, %v1584_v34 }
 0xd46   :  { %4230 = vtanh.f32 %v1590_v35  ;;  %v1591_v39 = vmul.f32 0.7978846, %v1587_v36  ;;  %v4136_v35 = vld [vmem:[%s5108_s3 + $0x10] sm:$0xff]   ;;  %v4137_v36 = vld [vmem:[%s5108_s3 + $0x18] sm:$0xff]  }
 0xd47   :  { %v1589_v40 = vmul.f32 0.7978846, %v1585_v37  ;;  %4232 = vtanh.f32 %v1588_v38  ;;  %3914 = vmatprep.subr.bf16.mxu1 %v4136_v35 }
 0xd48   :  { %4234 = vtanh.f32 %v1591_v39  ;;  %3915 = vmatpush3.bf16.msra.mxu1 %v4136_v35 }
 0xd49   :  { %4236 = vtanh.f32 %v1589_v40  ;;  %3916 = vmatprep.subr.bf16.mxu1 %v4137_v36 }
 0xd4c   :  { %3917 = vmatpush3.bf16.msra.mxu1 %v4137_v36 }
 0xd4d   :  { %3922 = vmatprep.subr.bf16.mxu1 %v4330_v62 }
 0xd50   :  { %v4231_v41 = vpop.eup %4230 }
 0xd51   :  { %v4233_v42 = vpop.eup %4232  ;;  %v1598_v43 = vadd.f32 1.0, %v4231_v41 }
 0xd52   :  { %v4235_v44 = vpop.eup %4234  ;;  %v1596_v45 = vadd.f32 1.0, %v4233_v42 }
 0xd53   :  { %v4237_v46 = vpop.eup %4236  ;;  %v1599_v49 = vadd.f32 1.0, %v4235_v44  ;;  %v1602_v53 = vmul.f32 %v1598_v43, %v1570_v47 }
 0xd54   :  { %v1597_v52 = vadd.f32 1.0, %v4237_v46  ;;  %v1600_v56 = vmul.f32 %v1596_v45, %v1568_v50  ;;  %v3547_v50 = vld [vmem:[%s5109_s1 + $0x8] ss:$0 sm:$0xff] }
 0xd55   :  { %v1603_v54 = vmul.f32 %v1599_v49, %v1571_v48 }
 0xd56   :  { %v1601_v57 = vmul.f32 %v1597_v52, %v1569_v51 }
 0xd57   :  { %v1605_v59 = vpack.c.bf16 %v1603_v54, %v1602_v53 }
 0xd58   :  { %v1604_v63 = vpack.c.bf16 %v1601_v57, %v1600_v56  ;;  %v3548_v57 = vld [vmem:[%s5109_s1 + $0x9] ss:$0 sm:$0xff] }
 0xd5a   :  { %3910 = vmatprep.mubr.bf16.mxu0 %v1604_v63 }
 0xd5b   :  { %3911 = vmatmul.mubr.bf16.vlgmr.msra.gmra.mrb[40].mxu0 %v1605_v59 }
 0xd5c   :  { %3942 = vmatprep.mubr.msk.bf16.mxu0 %vm4331_vm1, %v4330_v62 }
 0xe2e   :  { %v3912_v7 = vpop.f32.mrb[40].mxu0 }
 0xe2f   :  { %v1709_v10 = vpop.f32.mrb[41].mxu0  ;;  %v1718_v58 = vadd.f32 %v3912_v7, %v3536_v6 }
 0xe30   :  { %v1710_v0 = vadd.f32 %v3536_v6, %v1709_v10  ;;  %v3913_v1 = vpop.f32.mrb[42].mxu0 }
 0xe31   :  { %v1712_v5 = vpop.f32.mrb[43].mxu0  ;;  %v1721_v12 = vadd.f32 %v3913_v1, %v3536_v6  ;;  %v4746_v15 = vadd.f32 %v1718_v58, %v4667_v61 }
 0xe32   :  { %v4743_v60 = vadd.f32 %v1710_v0, %v4662_v55  ;;  %v1713_v13 = vadd.f32 %v3536_v6, %v1712_v5 }
 0xe33   :  { %v4754_v9 = vadd.f32 %v1721_v12, %v4679_v8  ;;  %v1737_v55 = vsel %vm48_vm0, %v4746_v15, 0.0 }
 0xe34   :  { %v4749_v17 = vadd.f32 %v1713_v13, %v4672_v3  ;;  %v1731_v2 = vsel %vm48_vm0, %v4743_v60, 0.0 }
 0xe35   :  { %1732 = vadd.xlane.f32.xlu0 %v1731_v2  ;;  %v1740_v61 = vsel %vm48_vm0, %v4754_v9, 0.0 }
 0xe36   :  { %v1734_v18 = vsel %vm48_vm0, %v4749_v17, 0.0 }
 0xe37   :  { %1735 = vadd.xlane.f32.xlu1 %v1734_v18 }
 0xe39   :  { %1738 = vadd.xlane.f32.xlu0 %v1737_v55 }
 0xe3b   :  { %1741 = vadd.xlane.f32.xlu1 %v1740_v61 }
 0xec2   :  { %v1733_v3 = vpop.xlane.xlu0 %1732 }
 0xec3   :  { %v1743_v4 = vmul.f32 0.03125, %v1733_v3 }
 0xec4   :  { %v1736_v11 = vpop.xlane.xlu1 %1735 }
 0xec5   :  { %v1747_v19 = vsub.f32 %v4743_v60, %v1743_v4  ;;  %v1744_v20 = vmul.f32 0.03125, %v1736_v11 }
 0xec6   :  { %v1739_v8 = vpop.xlane.xlu0 %1738 }
 0xec7   :  { %v1748_v21 = vsub.f32 %v4749_v17, %v1744_v20  ;;  %v1745_v22 = vmul.f32 0.03125, %v1739_v8  ;;  %v1751_v23 = vmul.f32 %v1747_v19, %v1747_v19 }
 0xec8   :  { %v1742_v24 = vpop.xlane.xlu1 %1741 }
 0xec9   :  { %v1749_v25 = vsub.f32 %v4746_v15, %v1745_v22  ;;  %v1746_v26 = vmul.f32 0.03125, %v1742_v24  ;;  %v1755_v27 = vsel %vm48_vm0, %v1751_v23, 0.0  ;;  %v1752_v28 = vmul.f32 %v1748_v21, %v1748_v21 }
 0xeca   :  { %1756 = vadd.xlane.f32.xlu0 %v1755_v27 }
 0xecb   :  { %v1750_v29 = vsub.f32 %v4754_v9, %v1746_v26  ;;  %v1758_v30 = vsel %vm48_vm0, %v1752_v28, 0.0  ;;  %v1753_v31 = vmul.f32 %v1749_v25, %v1749_v25 }
 0xecc   :  { %1759 = vadd.xlane.f32.xlu1 %v1758_v30 }
 0xecd   :  { %v1761_v32 = vsel %vm48_vm0, %v1753_v31, 0.0  ;;  %v1754_v33 = vmul.f32 %v1750_v29, %v1750_v29 }
 0xece   :  { %1762 = vadd.xlane.f32.xlu0 %v1761_v32 }
 0xecf   :  { %v1764_v34 = vsel %vm48_vm0, %v1754_v33, 0.0 }
 0xed0   :  { %1765 = vadd.xlane.f32.xlu1 %v1764_v34 }
 0xf57   :  { %v1757_v37 = vpop.xlane.xlu0 %1756 }
 0xf58   :  { %v1767_v38 = vmul.f32 0.03125, %v1757_v37 }
 0xf59   :  { %v1760_v39 = vpop.xlane.xlu1 %1759 }
 0xf5a   :  { %v1771_v40 = vadd.f32 1e-05, %v1767_v38  ;;  %v1768_v41 = vmul.f32 0.03125, %v1760_v39 }
 0xf5b   :  { %v1763_v42 = vpop.xlane.xlu0 %1762 }
 0xf5c   :  { %4238 = vrsqrt.f32 %v1771_v40  ;;  %v1772_v43 = vadd.f32 1e-05, %v1768_v41  ;;  %v1769_v44 = vmul.f32 0.03125, %v1763_v42 }
 0xf5d   :  { %v1766_v45 = vpop.xlane.xlu1 %1765 }
 0xf5e   :  { %4240 = vrsqrt.f32 %v1772_v43  ;;  %v1773_v46 = vadd.f32 1e-05, %v1769_v44  ;;  %v1770_v47 = vmul.f32 0.03125, %v1766_v45 }
 0xf60   :  { %4242 = vrsqrt.f32 %v1773_v46  ;;  %v1774_v48 = vadd.f32 1e-05, %v1770_v47 }
 0xf62   :  { %4244 = vrsqrt.f32 %v1774_v48 }
 0xf66   :  { %v4239_v49 = vpop.eup %4238 }
 0xf67   :  { %v1779_v51 = vmul.f32 %v4239_v49, %v1747_v19 }
 0xf68   :  { %v4241_v52 = vpop.eup %4240 }
 0xf69   :  { %v1780_v53 = vmul.f32 %v4241_v52, %v1748_v21  ;;  %v1787_v54 = vmul.f32 %v3547_v50, %v1779_v51 }
 0xf6a   :  { %v4243_v56 = vpop.eup %4242 }
 0xf6b   :  { %v1781_v59 = vmul.f32 %v4243_v56, %v1749_v25  ;;  %v1788_v63 = vmul.f32 %v3547_v50, %v1780_v53  ;;  %v1795_v58 = vadd.f32 %v3548_v57, %v1787_v54 }
 0xf6c   :  { %v4245_v6 = vpop.eup %4244 }
 0xf6d   :  { %v1789_v7 = vmul.f32 %v3547_v50, %v1781_v59  ;;  %v1782_v10 = vmul.f32 %v4245_v6, %v1750_v29  ;;  %v1796_v0 = vadd.f32 %v3548_v57, %v1788_v63 }
 0xf6f   :  { %v1790_v1 = vmul.f32 %v3547_v50, %v1782_v10  ;;  %v1799_v5 = vpack.c.bf16 %v1796_v0, %v1795_v58  ;;  %v1797_v12 = vadd.f32 %v3548_v57, %v1789_v7 }
 0xf71   :  { %3918 = vmatprep.mubr.msk.bf16.mxu1 %vm48_vm0, %v1799_v5  ;;  %v1798_v13 = vadd.f32 %v3548_v57, %v1790_v1 }
 0xf73   :  { %v1800_v2 = vpack.c.bf16 %v1798_v13, %v1797_v12 }
 0xf75   :  { %3919 = vmatmul.mubr.msk.bf16.vlgmr.msra.gmra.mrb[36].mxu1 %vm48_vm0, %v1800_v2 }
 0xf76   :  { %3924 = vmatprep.mubr.msk.bf16.mxu1 %vm4331_vm1, %v4330_v62 }
0x1048   :  { %v3920_v18 = vpop.f32.mrb[36].mxu1 }
0x1049   :  { %v1858_v55 = vpop.f32.mrb[37].mxu1 }
0x104a   :  { %v3921_v61 = vpop.f32.mrb[38].mxu1 }
0x104b   :  { %v4787_v3 = vpack.c.bf16 %v3921_v61, %v3920_v18  ;;  %v1861_v4 = vpop.f32.mrb[39].mxu1 }
0x104c   :  { %v4789_v11 = vpack.c.bf16 %v1861_v4, %v1858_v55 }
0x104d   :  { %1926 = vrot.lane.b32.xlu1 %v4787_v3, %s4332_s25 }
0x104e   :  { %1876 = vrot.lane.b32.xlu0 %v4789_v11, %s4332_s25 }
0x10bf   :  { %v1927_v8 = vpop.permute.xlu1 %1926 }
0x10c0   :  { %v1877_v19 = vpop.permute.xlu0 %1876  ;;  %v1932_v21 = vsel %vm196_vm2, %v1927_v8, 0 }
0x10c1   :  { %v1882_v20 = vsel %vm196_vm2, %v1877_v19, 0 }
0x10c2   :  { %3923 = vmatpush3.bf16.xpose.msra.mxu1 %v1882_v20 }
0x10c3   :  { %3928 = vmatprep.subr.bf16.mxu1 %v4330_v62 }
0x10c9   :  { %3925 = vmatmul.mubr.msk.bf16.vlgmr.msra.gmra.mrb[40].mxu1 %vm196_vm2, %v4789_v11 }
0x10ca   :  { %3929 = vmatpush3.bf16.xpose.msra.mxu1 %v1932_v21  ;;  %3930 = vmatprep.mubr.msk.bf16.mxu1 %vm4331_vm1, %v4330_v62 }
0x10cb   :  { %3934 = vmatprep.subr.bf16.mxu1 %v4330_v62 }
0x10d1   :  { %3931 = vmatmul.mubr.msk.bf16.vlgmr.msra.gmra.mrb[44].mxu1 %vm196_vm2, %v4787_v3 }
0x10d2   :  { %3936 = vmatprep.mubr.msk.bf16.mxu1 %vm4331_vm1, %v4330_v62 }
0x119c   :  { %v1918_v22 = vpop.f32.mrb[40].mxu1 }
0x119d   :  { %v3926_v23 = vpop.f32.mrb[41].mxu1  ;;  %v1919_v34 = vadd.f32 %v1918_v22, %v4454_v14 }
0x119e   :  { %v1921_v24 = vpop.f32.mrb[42].mxu1 }
0x119f   :  { %v3927_v25 = vpop.f32.mrb[43].mxu1  ;;  %v1922_v35 = vadd.f32 %v1921_v24, %v4456_v16  ;;  %v1975_v36 = vsel %vm294_vm5, %v1919_v34, -inf }
0x11a1   :  { %v1978_v37 = vsel %vm294_vm5, %v1922_v35, -inf }
0x11a4   :  { %v1968_v26 = vpop.f32.mrb[44].mxu1 }
0x11a5   :  { %v1969_v27 = vadd.f32 %v1968_v26, %v4454_v14  ;;  %v3932_v28 = vpop.f32.mrb[45].mxu1 }
0x11a6   :  { %v1971_v29 = vpop.f32.mrb[46].mxu1 }
0x11a7   :  { %v1972_v30 = vadd.f32 %v1971_v29, %v4456_v16  ;;  %v3933_v31 = vpop.f32.mrb[47].mxu1  ;;  %v1981_v32 = vsel %vm294_vm5, %v1969_v27, -inf }
0x11a8   :  { %1982 = vmax.xlane.f32.xlu1 %v1981_v32 }
0x11a9   :  { %v1984_v33 = vsel %vm294_vm5, %v1972_v30, -inf }
0x11aa   :  { %1985 = vmax.xlane.f32.xlu0 %v1984_v33 }
0x11b9   :  { %2172 = vrot.lane.b32.xlu1 %v4787_v3, %s4334_s26 }
0x11bd   :  { %2170 = vrot.lane.b32.xlu1 %v4787_v3, %s4335_s27 }
0x11c0   :  { %2060 = vrot.lane.b32.xlu0 %v4787_v3, %s4336_s28 }
0x11df   :  { %1976 = vmax.xlane.f32.xlu0 %v1975_v36 }
0x11e1   :  { %1979 = vmax.xlane.f32.xlu1 %v1978_v37 }
0x11f2   :  { %2121 = vrot.lane.b32.xlu1 %v4789_v11, %s4334_s26 }
0x11f5   :  { %2013 = vrot.lane.b32.xlu0 %v4789_v11, %s4336_s28 }
0x11f9   :  { %2119 = vrot.lane.b32.xlu0 %v4789_v11, %s4335_s27 }
0x1235   :  { %v1983_v38 = vpop.xlane.xlu1 %1982 }
0x1236   :  { %v1989_v39 = vsub.f32 %v1969_v27, %v1983_v38 }
0x1237   :  { %v1986_v40 = vpop.xlane.xlu0 %1985 }
0x1238   :  { %v1995_v41 = vmul.f32 1.442695, %v1989_v39  ;;  %v1990_v42 = vsub.f32 %v1972_v30, %v1986_v40 }
0x1239   :  { %v2173_v47 = vpop.permute.xlu1 %2172 }
0x123a   :  { %v1997_v43 = vmul.f32 1.442695, %v1990_v42  ;;  %4246 = vpow2.f32 %v1995_v41  ;;  %v2178_v49 = vsel %vm196_vm2, %v2173_v47, 0 }
0x123b   :  { %v2061_v44 = vpop.permute.xlu0 %2060 }
0x123c   :  { %4248 = vpow2.f32 %v1997_v43  ;;  %3941 = vmatpush3.bf16.msra.mxu0 %v2061_v44 }
0x123d   :  { %3952 = vmatprep.subr.bf16.mxu0 %v4330_v62  ;;  %v2171_v50 = vpop.permute.xlu1 %2170 }
0x1244   :  { %v4828_v45 = vpop.eup %4246 }
0x1246   :  { %v4830_v46 = vpop.eup %4248 }
0x1247   :  { %v2012_v48 = vpack.c.bf16 %v4830_v46, %v4828_v45 }
0x1249   :  { %3943 = vmatmul.mubr.msk.bf16.vlgmr.msra.gmra.mrb[44].mxu0 %vm294_vm5, %v2012_v48 }
0x124a   :  { %3953 = vmatpush3.bf16.xpose.msra.mxu0 %v2178_v49  ;;  %3954 = vmatprep.mubr.msk.bf16.mxu0 %vm4331_vm1, %v4330_v62 }
0x124b   :  { %3964 = vmatprep.subr.bf16.mxu0 %v4330_v62 }
0x1251   :  { %3955 = vmatmul.mubr.msk.bf16.vlgmr.msra.gmra.mrb[48].mxu0 %vm196_vm2, %v2171_v50 }
0x1252   :  { %3966 = vmatprep.mubr.msk.bf16.mxu0 %vm4331_vm1, %v4330_v62 }
0x126c   :  { %v1977_v51 = vpop.xlane.xlu0 %1976 }
0x126d   :  { %v1987_v52 = vsub.f32 %v1919_v34, %v1977_v51  ;;  %v2005_v34 = vsel %vm294_vm5, %v4828_v45, 0.0 }
0x126e   :  { %v1980_v53 = vpop.xlane.xlu1 %1979 }
0x126f   :  { %v1991_v54 = vmul.f32 1.442695, %v1987_v52  ;;  %v1988_v56 = vsub.f32 %v1922_v35, %v1980_v53  ;;  %v2008_v35 = vsel %vm294_vm5, %v4830_v46, 0.0 }
0x1270   :  { %v2014_v57 = vpop.permute.xlu0 %2013 }
0x1271   :  { %v1993_v59 = vmul.f32 1.442695, %v1988_v56  ;;  %3935 = vmatpush3.bf16.msra.mxu1 %v2014_v57  ;;  %4250 = vpow2.f32 %v1991_v54 }
0x1272   :  { %3946 = vmatprep.subr.bf16.mxu1 %v4330_v62  ;;  %v2122_v7 = vpop.permute.xlu1 %2121 }
0x1273   :  { %4252 = vpow2.f32 %v1993_v59  ;;  %v2127_v58 = vsel %vm196_vm2, %v2122_v7, 0 }
0x1274   :  { %v2120_v0 = vpop.permute.xlu0 %2119 }
0x127b   :  { %v4251_v63 = vpop.eup %4250 }
0x127c   :  { %v1999_v36 = vsel %vm294_vm5, %v4251_v63, 0.0 }
0x127d   :  { %v4253_v6 = vpop.eup %4252 }
0x127e   :  { %v2011_v10 = vpack.c.bf16 %v4253_v6, %v4251_v63  ;;  %v2002_v33 = vsel %vm294_vm5, %v4253_v6, 0.0 }
0x1280   :  { %3937 = vmatmul.mubr.msk.bf16.vlgmr.msra.gmra.mrb[48].mxu1 %vm294_vm5, %v2011_v10 }
0x1281   :  { %3947 = vmatpush3.bf16.xpose.msra.mxu1 %v2127_v58  ;;  %3948 = vmatprep.mubr.msk.bf16.mxu1 %vm4331_vm1, %v4330_v62 }
0x1282   :  { %3958 = vmatprep.subr.bf16.mxu1 %v4330_v62 }
0x1288   :  { %3949 = vmatmul.mubr.msk.bf16.vlgmr.msra.gmra.mrb[52].mxu1 %vm196_vm2, %v2120_v0 }
0x1289   :  { %3960 = vmatprep.mubr.msk.bf16.mxu1 %vm4331_vm1, %v4330_v62 }
0x131c   :  { %v4851_v1 = vpop.f32.mrb[44].mxu0 }
0x131d   :  { %v3944_v5 = vpop.f32.mrb[45].mxu0 }
0x131e   :  { %v4853_v12 = vpop.f32.mrb[46].mxu0 }
0x131f   :  { %v3945_v13 = vpop.f32.mrb[47].mxu0 }
0x1324   :  { %v2214_v2 = vpop.f32.mrb[48].mxu0 }
0x1325   :  { %v2215_v18 = vadd.f32 %v2214_v2, %v4454_v14  ;;  %v3956_v55 = vpop.f32.mrb[49].mxu0 }
0x1326   :  { %v2217_v61 = vpop.f32.mrb[50].mxu0 }
0x1327   :  { %v2218_v4 = vadd.f32 %v2217_v61, %v4456_v16  ;;  %v3957_v19 = vpop.f32.mrb[51].mxu0  ;;  %v2227_v20 = vsel %vm294_vm5, %v2215_v18, -inf }
0x1328   :  { %2228 = vmax.xlane.f32.xlu1 %v2227_v20 }
0x1329   :  { %v2230_v8 = vsel %vm294_vm5, %v2218_v4, -inf }
0x132a   :  { %2231 = vmax.xlane.f32.xlu0 %v2230_v8 }
0x1339   :  { %2482 = vrot.lane.b32.xlu1 %v4789_v11, %s4337_s29 }
0x133d   :  { %2480 = vrot.lane.b32.xlu1 %v4789_v11, %s4339_s10 }
0x1340   :  { %2306 = vrot.lane.b32.xlu0 %v4787_v3, %s4338_s30 }
0x1341   :  { %2531 = vrot.lane.b32.xlu1 %v4787_v3, %s4339_s10 }
0x1344   :  { %2533 = vrot.lane.b32.xlu0 %v4787_v3, %s4337_s29 }
0x1353   :  { %v4869_v21 = vpop.f32.mrb[48].mxu1 }
0x1354   :  { %v3938_v22 = vpop.f32.mrb[49].mxu1 }
0x1355   :  { %v4871_v23 = vpop.f32.mrb[50].mxu1 }
0x1356   :  { %v3939_v24 = vpop.f32.mrb[51].mxu1 }
0x135b   :  { %v2163_v25 = vpop.f32.mrb[52].mxu1 }
0x135c   :  { %v3950_v26 = vpop.f32.mrb[53].mxu1  ;;  %v2164_v28 = vadd.f32 %v2163_v25, %v4454_v14 }
0x135d   :  { %v2166_v27 = vpop.f32.mrb[54].mxu1 }
0x135e   :  { %v3951_v29 = vpop.f32.mrb[55].mxu1  ;;  %v2167_v30 = vadd.f32 %v2166_v27, %v4456_v16  ;;  %v2221_v31 = vsel %vm294_vm5, %v2164_v28, -inf }
0x135f   :  { %v3566_v29 = vld [vmem:[%s5110_s4 + $0x14] sm:$0xf] }
0x1360   :  { %v2224_v32 = vsel %vm294_vm5, %v2167_v30, -inf }
0x1363   :  { %2222 = vmax.xlane.f32.xlu0 %v2221_v31  ;;  %v3561_v31 = vld [vmem:[%s5110_s4 + $0x10] sm:$0xf] }
0x1365   :  { %2225 = vmax.xlane.f32.xlu1 %v2224_v32 }
0x1369   :  { %2003 = vadd.xlane.f32.xlu1 %v2002_v33 }
0x136d   :  { %2006 = vadd.xlane.f32.xlu1 %v2005_v34 }
0x1371   :  { %2009 = vadd.xlane.f32.xlu1 %v2008_v35 }
0x1379   :  { %2259 = vrot.lane.b32.xlu0 %v4789_v11, %s4338_s30 }
0x1398   :  { %2000 = vadd.xlane.f32.xlu0 %v1999_v36 }
0x13ae   :  { %2667 = vrot.lane.b32.xlu0 %v4787_v3, %s4340_s11 }
0x13b5   :  { %v2229_v37 = vpop.xlane.xlu1 %2228 }
0x13b6   :  { %v2235_v38 = vsub.f32 %v2215_v18, %v2229_v37 }
0x13b7   :  { %v2232_v39 = vpop.xlane.xlu0 %2231 }
0x13b8   :  { %v2241_v40 = vmul.f32 1.442695, %v2235_v38  ;;  %v2236_v41 = vsub.f32 %v2218_v4, %v2232_v39 }
0x13b9   :  { %v2483_v46 = vpop.permute.xlu1 %2482 }
0x13ba   :  { %v2243_v42 = vmul.f32 1.442695, %v2236_v41  ;;  %4254 = vpow2.f32 %v2241_v40  ;;  %v2488_v48 = vsel %vm196_vm2, %v2483_v46, 0 }
0x13bb   :  { %v2307_v43 = vpop.permute.xlu0 %2306 }
0x13bc   :  { %4256 = vpow2.f32 %v2243_v42  ;;  %3965 = vmatpush3.bf16.msra.mxu0 %v2307_v43 }
0x13bd   :  { %3982 = vmatprep.subr.bf16.mxu0 %v4330_v62  ;;  %v2481_v50 = vpop.permute.xlu1 %2480 }
0x13bf   :  { %v2534_v49 = vpop.permute.xlu0 %2533 }
0x13c0   :  { %v2539_v51 = vsel %vm196_vm2, %v2534_v49, 0 }
0x13c1   :  { %v2532_v52 = vpop.permute.xlu1 %2531 }
0x13c4   :  { %v4255_v44 = vpop.eup %4254 }
0x13c5   :  { %v2251_v61 = vsel %vm294_vm5, %v4255_v44, 0.0 }
0x13c6   :  { %v4257_v45 = vpop.eup %4256 }
0x13c7   :  { %v2258_v47 = vpack.c.bf16 %v4257_v45, %v4255_v44  ;;  %v2254_v8 = vsel %vm294_vm5, %v4257_v45, 0.0 }
0x13c9   :  { %3967 = vmatmul.mubr.msk.bf16.vlgmr.msra.gmra.mrb[52].mxu0 %vm294_vm5, %v2258_v47 }
0x13ca   :  { %3983 = vmatpush3.bf16.xpose.msra.mxu0 %v2488_v48  ;;  %3984 = vmatprep.mubr.msk.bf16.mxu0 %vm4331_vm1, %v4330_v62 }
0x13cb   :  { %3988 = vmatprep.subr.bf16.mxu0 %v4330_v62 }
0x13d1   :  { %3985 = vmatmul.mubr.msk.bf16.vlgmr.msra.gmra.mrb[56].mxu0 %vm196_vm2, %v2481_v50 }
0x13d2   :  { %3989 = vmatpush3.bf16.xpose.msra.mxu0 %v2539_v51  ;;  %3990 = vmatprep.mubr.msk.bf16.mxu0 %vm4331_vm1, %v4330_v62 }
0x13d3   :  { %4000 = vmatprep.subr.bf16.mxu0 %v4330_v62 }
0x13d9   :  { %3991 = vmatmul.mubr.msk.bf16.vlgmr.msra.gmra.mrb[60].mxu0 %vm196_vm2, %v2532_v52 }
0x13da   :  { %4002 = vmatprep.mubr.msk.bf16.mxu0 %vm4331_vm1, %v4330_v62 }
0x13f0   :  { %v2223_v53 = vpop.xlane.xlu0 %2222 }
0x13f1   :  { %v2233_v54 = vsub.f32 %v2164_v28, %v2223_v53 }
0x13f2   :  { %v2226_v56 = vpop.xlane.xlu1 %2225 }
0x13f3   :  { %v2237_v57 = vmul.f32 1.442695, %v2233_v54  ;;  %v2234_v59 = vsub.f32 %v2167_v30, %v2226_v56  ;;  %v2371_v30 = vsel %vm689_vm6, %v3566_v29, 0 }
0x13f4   :  { %v2260_v63 = vpop.permute.xlu0 %2259 }
0x13f5   :  { %4258 = vpow2.f32 %v2237_v57  ;;  %v2239_v6 = vmul.f32 1.442695, %v2234_v59  ;;  %3959 = vmatpush3.bf16.msra.mxu1 %v2260_v63 }
0x13f6   :  { %v2004_v7 = vpop.xlane.xlu1 %2003  ;;  %4106 = vmatprep.subr.msk.bf16.mxu1 %vm689_vm6, %v3566_v29 }
0x13f7   :  { %4260 = vpow2.f32 %v2239_v6 }
0x13fa   :  { %v2007_v10 = vpop.xlane.xlu1 %2006 }
0x13fb   :  { %4262 = vrcp.f32 %v2007_v10 }
0x13fe   :  { %v2010_v58 = vpop.xlane.xlu1 %2009 }
0x13ff   :  { %v4259_v0 = vpop.eup %4258  ;;  %4264 = vrcp.f32 %v2010_v58 }
0x1400   :  { %v2245_v5 = vsel %vm294_vm5, %v4259_v0, 0.0  ;;  %4266 = vrcp.f32 %v2004_v7 }
0x1401   :  { %v4261_v13 = vpop.eup %4260  ;;  %2246 = vadd.xlane.f32.xlu1 %v2245_v5 }
0x1402   :  { %v2257_v2 = vpack.c.bf16 %v4261_v13, %v4259_v0  ;;  %v2248_v18 = vsel %vm294_vm5, %v4261_v13, 0.0 }
0x1404   :  { %3961 = vmatmul.mubr.msk.bf16.vlgmr.msra.gmra.mrb[56].mxu1 %vm294_vm5, %v2257_v2 }
0x1405   :  { %2249 = vadd.xlane.f32.xlu1 %v2248_v18  ;;  %v4263_v55 = vpop.eup %4262  ;;  %3971 = vmatpush3.bf16.msra.mxu1 %v2371_v30 }
0x1406   :  { %v4906_v19 = vmul.f32 %v4263_v55, %v4851_v1  ;;  %4107 = vmatprep.subr.msk.bf16.mxu1 %vm689_vm6, %v3561_v31  ;;  %v2429_v55 = vsel %vm689_vm6, %v3561_v31, 0 }
0x1409   :  { %v4265_v4 = vpop.eup %4264  ;;  %2252 = vadd.xlane.f32.xlu1 %v2251_v61 }
0x140a   :  { %v4909_v20 = vmul.f32 %v4265_v4, %v4853_v12  ;;  %v4267_v26 = vpop.eup %4266 }
0x140b   :  { %v2112_v12 = vmul.f32 %v4267_v26, %v4871_v23 }
0x140c   :  { %v2116_v22 = vpack.c.bf16 %v4909_v20, %v4906_v19 }
0x140d   :  { %2255 = vadd.xlane.f32.xlu1 %v2254_v8 }
0x1425   :  { %v2001_v24 = vpop.xlane.xlu0 %2000 }
0x1426   :  { %4268 = vrcp.f32 %v2001_v24 }
0x1429   :  { %v2668_v25 = vpop.permute.xlu0 %2667 }
0x142a   :  { %4001 = vmatpush3.bf16.msra.mxu0 %v2668_v25 }
0x142b   :  { %4012 = vmatprep.subr.bf16.mxu0 %v4330_v62 }
0x1430   :  { %v4269_v27 = vpop.eup %4268 }
0x1431   :  { %v2111_v1 = vmul.f32 %v4269_v27, %v4869_v21 }
0x1433   :  { %v2115_v28 = vpack.c.bf16 %v2112_v12, %v2111_v1 }
0x148e   :  { %v2247_v32 = vpop.xlane.xlu1 %2246 }
0x1492   :  { %v2250_v21 = vpop.xlane.xlu1 %2249 }
0x1496   :  { %v2253_v33 = vpop.xlane.xlu1 %2252 }
0x1497   :  { %4270 = vrcp.f32 %v2253_v33 }
0x149a   :  { %v2256_v23 = vpop.xlane.xlu1 %2255 }
0x149b   :  { %4272 = vrcp.f32 %v2256_v23 }
0x149c   :  { %v2346_v34 = vpop.f32.mrb[52].mxu0  ;;  %4274 = vrcp.f32 %v2247_v32 }
0x149d   :  { %v3968_v35 = vpop.f32.mrb[53].mxu0  ;;  %4276 = vrcp.f32 %v2250_v21 }
0x149e   :  { %v2349_v36 = vpop.f32.mrb[54].mxu0 }
0x149f   :  { %v3969_v37 = vpop.f32.mrb[55].mxu0 }
0x14a1   :  { %v4271_v38 = vpop.eup %4270 }
0x14a2   :  { %v2359_v43 = vmul.f32 %v4271_v38, %v2346_v34 }
0x14a4   :  { %v2524_v39 = vpop.f32.mrb[56].mxu0 }
0x14a5   :  { %v4273_v40 = vpop.eup %4272  ;;  %v2525_v41 = vadd.f32 %v2524_v39, %v4454_v14  ;;  %v3986_v42 = vpop.f32.mrb[57].mxu0  ;;  %v3575_v39 = vld [vmem:[%s5110_s4 + $0x18] sm:$0xf] }
0x14a6   :  { %v2360_v44 = vmul.f32 %v4273_v40, %v2349_v36  ;;  %v2527_v45 = vpop.f32.mrb[58].mxu0  ;;  %v4275_v7 = vpop.eup %4274  ;;  %v2732_v40 = vsel %vm689_vm6, %v3575_v39, 0 }
0x14a7   :  { %v2528_v46 = vadd.f32 %v2527_v45, %v4456_v16  ;;  %v3987_v47 = vpop.f32.mrb[59].mxu0  ;;  %v2582_v48 = vsel %vm294_vm5, %v2525_v41, -inf  ;;  %v4277_v58 = vpop.eup %4276 }
0x14a8   :  { %v2362_v49 = vpack.c.bf16 %v2360_v44, %v2359_v43  ;;  %2583 = vmax.xlane.f32.xlu1 %v2582_v48 }
0x14a9   :  { %v2585_v50 = vsel %vm294_vm5, %v2528_v46, -inf }
0x14ac   :  { %v2575_v51 = vpop.f32.mrb[60].mxu0  ;;  %2586 = vmax.xlane.f32.xlu1 %v2585_v50 }
0x14ad   :  { %v2576_v52 = vadd.f32 %v2575_v51, %v4454_v14  ;;  %v3992_v53 = vpop.f32.mrb[61].mxu0 }
0x14ae   :  { %v2578_v54 = vpop.f32.mrb[62].mxu0 }
0x14af   :  { %v2579_v56 = vadd.f32 %v2578_v54, %v4456_v16  ;;  %v3993_v57 = vpop.f32.mrb[63].mxu0  ;;  %v2588_v59 = vsel %vm294_vm5, %v2576_v52, -inf }
0x14b0   :  { %2589 = vmax.xlane.f32.xlu1 %v2588_v59 }
0x14b1   :  { %v2591_v63 = vsel %vm294_vm5, %v2579_v56, -inf }
0x14b4   :  { %2592 = vmax.xlane.f32.xlu1 %v2591_v63 }
0x14c5   :  { %2620 = vrot.lane.b32.xlu1 %v4789_v11, %s4340_s11 }
0x14c9   :  { %2789 = vrot.lane.b32.xlu1 %v4789_v11, %s4341_s16 }
0x14d7   :  { %v2299_v6 = vpop.f32.mrb[56].mxu1 }
0x14d8   :  { %v3962_v10 = vpop.f32.mrb[57].mxu1  ;;  %v2357_v5 = vmul.f32 %v4275_v7, %v2299_v6 }
0x14d9   :  { %v2302_v0 = vpop.f32.mrb[58].mxu1 }
0x14da   :  { %v2358_v13 = vmul.f32 %v4277_v58, %v2302_v0  ;;  %v3963_v2 = vpop.f32.mrb[59].mxu1 }
0x14dc   :  { %v2361_v18 = vpack.c.bf16 %v2358_v13, %v2357_v5 }
0x14de   :  { %3972 = vmatprep.mubr.msk.bf16.mxu1 %vm196_vm2, %v2361_v18 }
0x14df   :  { %3973 = vmatmul.mubr.msk.bf16.vlgmr.msra.gmra.mrb[60].mxu1 %vm196_vm2, %v2362_v49 }
0x14e0   :  { %3978 = vmatprep.mubr.msk.bf16.mxu1 %vm196_vm2, %v2115_v28  ;;  %3977 = vmatpush3.bf16.msra.mxu1 %v2429_v55 }
0x14e1   :  { %3994 = vmatprep.subr.bf16.mxu1 %v4330_v62 }
0x14eb   :  { %3979 = vmatmul.mubr.msk.bf16.vlgmr.msra.gmra.mrb[60].mxu1 %vm196_vm2, %v2116_v22 }
0x14ec   :  { %3996 = vmatprep.mubr.msk.bf16.mxu1 %vm4331_vm1, %v4330_v62 }
0x1535   :  { %v2584_v61 = vpop.xlane.xlu1 %2583 }
0x1536   :  { %v2594_v4 = vsub.f32 %v2525_v41, %v2584_v61 }
0x1538   :  { %v2598_v8 = vmul.f32 1.442695, %v2594_v4 }
0x1539   :  { %v2587_v24 = vpop.xlane.xlu1 %2586 }
0x153a   :  { %4278 = vpow2.f32 %v2598_v8  ;;  %v2595_v25 = vsub.f32 %v2528_v46, %v2587_v24 }
0x153c   :  { %v2600_v26 = vmul.f32 1.442695, %v2595_v25 }
0x153d   :  { %v2590_v27 = vpop.xlane.xlu1 %2589 }
0x153e   :  { %4280 = vpow2.f32 %v2600_v26  ;;  %v2596_v1 = vsub.f32 %v2576_v52, %v2590_v27 }
0x1540   :  { %v2602_v12 = vmul.f32 1.442695, %v2596_v1 }
0x1541   :  { %v2593_v28 = vpop.xlane.xlu1 %2592 }
0x1542   :  { %4282 = vpow2.f32 %v2602_v12  ;;  %v2597_v29 = vsub.f32 %v2579_v56, %v2593_v28 }
0x1544   :  { %v4279_v19 = vpop.eup %4278  ;;  %v2604_v20 = vmul.f32 1.442695, %v2597_v29 }
0x1545   :  { %v2621_v22 = vpop.permute.xlu1 %2620  ;;  %v2606_v30 = vsel %vm294_vm5, %v4279_v19, 0.0 }
0x1546   :  { %4284 = vpow2.f32 %v2604_v20  ;;  %2607 = vadd.xlane.f32.xlu1 %v2606_v30  ;;  %3995 = vmatpush3.bf16.msra.mxu1 %v2621_v22 }
0x1547   :  { %4108 = vmatprep.subr.msk.bf16.mxu1 %vm689_vm6, %v3575_v39 }
0x1548   :  { %v4281_v31 = vpop.eup %4280 }
0x1549   :  { %v2609_v32 = vsel %vm294_vm5, %v4281_v31, 0.0  ;;  %v2618_v21 = vpack.c.bf16 %v4281_v31, %v4279_v19  ;;  %v2790_v35 = vpop.permute.xlu1 %2789 }
0x154a   :  { %2610 = vadd.xlane.f32.xlu0 %v2609_v32  ;;  %v2795_v38 = vsel %vm196_vm2, %v2790_v35, 0 }
0x154b   :  { %3997 = vmatmul.mubr.msk.bf16.vlgmr.msra.gmra.mrb[64].mxu1 %vm294_vm5, %v2618_v21 }
0x154c   :  { %v4283_v33 = vpop.eup %4282  ;;  %4007 = vmatpush3.bf16.msra.mxu1 %v2732_v40 }
0x154d   :  { %v2612_v23 = vsel %vm294_vm5, %v4283_v33, 0.0  ;;  %4018 = vmatprep.subr.bf16.mxu1 %v4330_v62 }
0x154e   :  { %2613 = vadd.xlane.f32.xlu1 %v2612_v23 }
0x1550   :  { %v4285_v34 = vpop.eup %4284 }
0x1551   :  { %v2615_v36 = vsel %vm294_vm5, %v4285_v34, 0.0  ;;  %v2619_v37 = vpack.c.bf16 %v4285_v34, %v4283_v33 }
0x1552   :  { %2616 = vadd.xlane.f32.xlu0 %v2615_v36 }
0x1553   :  { %4003 = vmatmul.mubr.msk.bf16.vlgmr.msra.gmra.mrb[64].mxu0 %vm294_vm5, %v2619_v37 }
0x1554   :  { %4013 = vmatpush3.bf16.xpose.msra.mxu0 %v2795_v38  ;;  %4014 = vmatprep.mubr.msk.bf16.mxu0 %vm4331_vm1, %v4330_v62 }
0x1555   :  { %4024 = vmatprep.subr.bf16.mxu0 %v4330_v62 }
0x155f   :  { %2787 = vrot.lane.b32.xlu1 %v4789_v11, %s4342_s17 }
0x1563   :  { %2838 = vrot.lane.b32.xlu1 %v4787_v3, %s4342_s17 }
0x1568   :  { %2840 = vrot.lane.b32.xlu0 %v4787_v3, %s4341_s16 }
0x15d3   :  { %v2608_v41 = vpop.xlane.xlu1 %2607 }
0x15d4   :  { %4286 = vrcp.f32 %v2608_v41 }
0x15d7   :  { %v2611_v44 = vpop.xlane.xlu0 %2610 }
0x15d8   :  { %4288 = vrcp.f32 %v2611_v44 }
0x15db   :  { %v2614_v42 = vpop.xlane.xlu1 %2613 }
0x15dc   :  { %4290 = vrcp.f32 %v2614_v42 }
0x15de   :  { %v4287_v47 = vpop.eup %4286 }
0x15df   :  { %v2788_v43 = vpop.permute.xlu1 %2787  ;;  %v2617_v45 = vpop.xlane.xlu0 %2616 }
0x15e0   :  { %4015 = vmatmul.mubr.msk.bf16.vlgmr.msra.gmra.mrb[68].mxu0 %vm196_vm2, %v2788_v43  ;;  %4292 = vrcp.f32 %v2617_v45 }
0x15e1   :  { %4026 = vmatprep.mubr.msk.bf16.mxu0 %vm4331_vm1, %v4330_v62 }
0x15e2   :  { %v4289_v49 = vpop.eup %4288 }
0x15e3   :  { %v2841_v0 = vpop.permute.xlu0 %2840  ;;  %v2839_v2 = vpop.permute.xlu1 %2838 }
0x15e4   :  { %v2846_v13 = vsel %vm196_vm2, %v2841_v0, 0 }
0x15e6   :  { %v4291_v56 = vpop.eup %4290 }
0x15ea   :  { %v4293_v6 = vpop.eup %4292 }
0x161e   :  { %v2660_v46 = vpop.f32.mrb[64].mxu1 }
0x161f   :  { %v3998_v48 = vpop.f32.mrb[65].mxu1  ;;  %v2718_v51 = vmul.f32 %v4287_v47, %v2660_v46  ;;  %v3582_v47 = vld [vmem:[%s5110_s4 + $0x1c] sm:$0xf] }
0x1620   :  { %v2663_v50 = vpop.f32.mrb[66].mxu1  ;;  %v3039_v48 = vsel %vm689_vm6, %v3582_v47, 0 }
0x1621   :  { %v2719_v52 = vmul.f32 %v4289_v49, %v2663_v50  ;;  %v3999_v53 = vpop.f32.mrb[67].mxu1 }
0x1623   :  { %v2722_v54 = vpack.c.bf16 %v2719_v52, %v2718_v51 }
0x1625   :  { %4008 = vmatprep.mubr.msk.bf16.mxu1 %vm196_vm2, %v2722_v54 }
0x1626   :  { %v2707_v57 = vpop.f32.mrb[64].mxu0 }
0x1627   :  { %v2720_v59 = vmul.f32 %v4291_v56, %v2707_v57  ;;  %v4004_v63 = vpop.f32.mrb[65].mxu0 }
0x1628   :  { %v2710_v7 = vpop.f32.mrb[66].mxu0 }
0x1629   :  { %v2721_v10 = vmul.f32 %v4293_v6, %v2710_v7  ;;  %v4005_v58 = vpop.f32.mrb[67].mxu0 }
0x162b   :  { %v2723_v5 = vpack.c.bf16 %v2721_v10, %v2720_v59 }
0x162d   :  { %4009 = vmatmul.mubr.msk.bf16.vlgmr.msra.gmra.mrb[60].mxu1 %vm196_vm2, %v2723_v5 }
0x162e   :  { %4019 = vmatpush3.bf16.xpose.msra.mxu1 %v2846_v13  ;;  %4020 = vmatprep.mubr.msk.bf16.mxu1 %vm4331_vm1, %v4330_v62 }
0x162f   :  { %4030 = vmatprep.subr.bf16.mxu1 %v4330_v62 }
0x1635   :  { %4021 = vmatmul.mubr.msk.bf16.vlgmr.msra.gmra.mrb[68].mxu1 %vm196_vm2, %v2839_v2 }
0x1636   :  { %4032 = vmatprep.mubr.msk.bf16.mxu1 %vm4331_vm1, %v4330_v62 }
0x16b3   :  { %v2831_v18 = vpop.f32.mrb[68].mxu0 }
0x16b4   :  { %v2832_v55 = vadd.f32 %v2831_v18, %v4454_v14  ;;  %v4016_v61 = vpop.f32.mrb[69].mxu0 }
0x16b5   :  { %v2834_v4 = vpop.f32.mrb[70].mxu0 }
0x16b6   :  { %v2835_v8 = vadd.f32 %v2834_v4, %v4456_v16  ;;  %v4017_v24 = vpop.f32.mrb[71].mxu0  ;;  %v2889_v25 = vsel %vm294_vm5, %v2832_v55, -inf }
0x16b7   :  { %2890 = vmax.xlane.f32.xlu0 %v2889_v25 }
0x16b8   :  { %v2892_v26 = vsel %vm294_vm5, %v2835_v8, -inf }
0x16b9   :  { %2893 = vmax.xlane.f32.xlu1 %v2892_v26 }
0x16ca   :  { %2927 = vrot.lane.b32.xlu1 %v4789_v11, %s4343_s20 }
0x1708   :  { %v2882_v27 = vpop.f32.mrb[68].mxu1 }
0x1709   :  { %v2883_v62 = vadd.f32 %v2882_v27, %v4454_v14  ;;  %v4022_v1 = vpop.f32.mrb[69].mxu1 }
0x170a   :  { %v2885_v12 = vpop.f32.mrb[70].mxu1 }
0x170b   :  { %v2886_v28 = vadd.f32 %v2885_v12, %v4456_v16  ;;  %v4023_v29 = vpop.f32.mrb[71].mxu1  ;;  %v2895_v19 = vsel %vm294_vm5, %v2883_v62, -inf }
0x170c   :  { %2896 = vmax.xlane.f32.xlu0 %v2895_v19 }
0x170d   :  { %v2898_v20 = vsel %vm294_vm5, %v2886_v28, -inf }
0x1710   :  { %2899 = vmax.xlane.f32.xlu0 %v2898_v20 }
0x1726   :  { %2974 = vrot.lane.b32.xlu0 %v4787_v3, %s4343_s20 }
0x1744   :  { %v2891_v22 = vpop.xlane.xlu0 %2890 }
0x1745   :  { %v2901_v30 = vsub.f32 %v2832_v55, %v2891_v22 }
0x1746   :  { %v2894_v11 = vpop.xlane.xlu1 %2893 }
0x1747   :  { %v2905_v31 = vmul.f32 1.442695, %v2901_v30  ;;  %v2902_v32 = vsub.f32 %v2835_v8, %v2894_v11 }
0x1749   :  { %4294 = vpow2.f32 %v2905_v31  ;;  %v2907_v14 = vmul.f32 1.442695, %v2902_v32 }
0x174a   :  { %v2928_v21 = vpop.permute.xlu1 %2927 }
0x174b   :  { %4296 = vpow2.f32 %v2907_v14  ;;  %4025 = vmatpush3.bf16.msra.mxu0 %v2928_v21 }
0x1753   :  { %v4295_v16 = vpop.eup %4294 }
0x1754   :  { %v2913_v33 = vsel %vm294_vm5, %v4295_v16, 0.0 }
0x1755   :  { %v4297_v23 = vpop.eup %4296  ;;  %2914 = vadd.xlane.f32.xlu1 %v2913_v33 }
0x1756   :  { %v2916_v34 = vsel %vm294_vm5, %v4297_v23, 0.0  ;;  %v2925_v35 = vpack.c.bf16 %v4297_v23, %v4295_v16 }
0x1757   :  { %2917 = vadd.xlane.f32.xlu0 %v2916_v34 }
0x1758   :  { %4027 = vmatmul.mubr.msk.bf16.vlgmr.msra.gmra.mrb[72].mxu0 %vm294_vm5, %v2925_v35 }
0x1799   :  { %v2897_v3 = vpop.xlane.xlu0 %2896 }
0x179a   :  { %v2903_v36 = vsub.f32 %v2883_v62, %v2897_v3 }
0x179c   :  { %v2909_v37 = vmul.f32 1.442695, %v2903_v36 }
0x179d   :  { %v2900_v38 = vpop.xlane.xlu0 %2899 }
0x179e   :  { %4298 = vpow2.f32 %v2909_v37  ;;  %v2904_v39 = vsub.f32 %v2886_v28, %v2900_v38 }
0x17a0   :  { %v2911_v40 = vmul.f32 1.442695, %v2904_v39  ;;  %v4138_v39 = vld [vmem:[%s5111_s5 + $0x10] sm:$0xff]  }
0x17a1   :  { %v2975_v41 = vpop.permute.xlu0 %2974  ;;  %4042 = vmatprep.subr.bf16.mxu0 %v4138_v39 }
0x17a2   :  { %4300 = vpow2.f32 %v2911_v40  ;;  %4031 = vmatpush3.bf16.msra.mxu1 %v2975_v41  ;;  %4043 = vmatpush3.bf16.msra.mxu0 %v4138_v39  ;;  %v4139_v40 = vld [vmem:[%s5111_s5 + $0x18] sm:$0xff]  }
0x17a3   :  { %4109 = vmatprep.subr.msk.bf16.mxu1 %vm689_vm6, %v3582_v47  ;;  %4044 = vmatprep.subr.bf16.mxu0 %v4139_v40 }
0x17a6   :  { %4045 = vmatpush3.bf16.msra.mxu0 %v4139_v40 }
0x17a8   :  { %v4299_v42 = vpop.eup %4298 }
0x17a9   :  { %v2919_v43 = vsel %vm294_vm5, %v4299_v42, 0.0 }
0x17aa   :  { %2920 = vadd.xlane.f32.xlu1 %v2919_v43 }
0x17ac   :  { %v4301_v44 = vpop.eup %4300 }
0x17ad   :  { %v2922_v45 = vsel %vm294_vm5, %v4301_v44, 0.0  ;;  %v2926_v46 = vpack.c.bf16 %v4301_v44, %v4299_v42 }
0x17ae   :  { %2923 = vadd.xlane.f32.xlu0 %v2922_v45 }
0x17af   :  { %4033 = vmatmul.mubr.msk.bf16.vlgmr.msra.gmra.mrb[72].mxu1 %vm294_vm5, %v2926_v46 }
0x17b0   :  { %4037 = vmatpush3.bf16.msra.mxu1 %v3039_v48 }
0x17e2   :  { %v2915_v49 = vpop.xlane.xlu1 %2914 }
0x17e3   :  { %4302 = vrcp.f32 %v2915_v49 }
0x17e4   :  { %v2918_v50 = vpop.xlane.xlu0 %2917 }
0x17e5   :  { %4304 = vrcp.f32 %v2918_v50 }
0x17ed   :  { %v4303_v52 = vpop.eup %4302 }
0x17ef   :  { %v4305_v54 = vpop.eup %4304 }
0x182b   :  { %v2967_v51 = vpop.f32.mrb[72].mxu0 }
0x182c   :  { %v4028_v53 = vpop.f32.mrb[73].mxu0  ;;  %v3025_v57 = vmul.f32 %v4303_v52, %v2967_v51 }
0x182d   :  { %v2970_v56 = vpop.f32.mrb[74].mxu0 }
0x182e   :  { %v3026_v59 = vmul.f32 %v4305_v54, %v2970_v56  ;;  %v4029_v63 = vpop.f32.mrb[75].mxu0  ;;  %v3587_v54 = vld [vmem:[%s5109_s1 + $0xa] ss:$0 sm:$0xff] }
0x1830   :  { %v3029_v6 = vpack.c.bf16 %v3026_v59, %v3025_v57 }
0x1832   :  { %4038 = vmatprep.mubr.msk.bf16.mxu1 %vm196_vm2, %v3029_v6 }
0x1837   :  { %v2921_v7 = vpop.xlane.xlu1 %2920 }
0x1838   :  { %4306 = vrcp.f32 %v2921_v7  ;;  %v3588_v7 = vld [vmem:[%s5109_s1 + $0xb] ss:$0 sm:$0xff] }
0x183b   :  { %v2924_v10 = vpop.xlane.xlu0 %2923 }
0x183c   :  { %4308 = vrcp.f32 %v2924_v10 }
0x1842   :  { %v4307_v0 = vpop.eup %4306 }
0x1846   :  { %v4309_v13 = vpop.eup %4308 }
0x1882   :  { %v3014_v58 = vpop.f32.mrb[72].mxu1 }
0x1883   :  { %v4034_v5 = vpop.f32.mrb[73].mxu1  ;;  %v3027_v18 = vmul.f32 %v4307_v0, %v3014_v58 }
0x1884   :  { %v3017_v2 = vpop.f32.mrb[74].mxu1 }
0x1885   :  { %v3028_v55 = vmul.f32 %v4309_v13, %v3017_v2  ;;  %v4035_v61 = vpop.f32.mrb[75].mxu1 }
0x1887   :  { %v3030_v4 = vpack.c.bf16 %v3028_v55, %v3027_v18 }
0x1889   :  { %4039 = vmatmul.mubr.msk.bf16.vlgmr.msra.gmra.mrb[60].mxu1 %vm196_vm2, %v3030_v4 }
0x195c   :  { %v4040_v8 = vpop.f32.mrb[60].mxu1 }
0x195d   :  { %v3075_v24 = vpop.f32.mrb[61].mxu1  ;;  %v5012_v62 = vadd.f32 %v4040_v8, %v4746_v15 }
0x195e   :  { %v5009_v25 = vadd.f32 %v3075_v24, %v4743_v60  ;;  %v4041_v26 = vpop.f32.mrb[62].mxu1 }
0x195f   :  { %v3078_v27 = vpop.f32.mrb[63].mxu1  ;;  %v5020_v28 = vadd.f32 %v4041_v26, %v4754_v9  ;;  %v3106_v60 = vsel %vm48_vm0, %v5012_v62, 0.0  ;;  %v4140_v26 = vld [vmem:[%s5112_s6 + $0x40] sm:$0xff]  }
0x1960   :  { %v5015_v1 = vadd.f32 %v3078_v27, %v4749_v17  ;;  %v3100_v12 = vsel %vm48_vm0, %v5009_v25, 0.0  ;;  %4050 = vmatprep.subr.bf16.mxu0 %v4140_v26  ;;  %v4141_v27 = vld [vmem:[%s5112_s6 + $0x48] sm:$0xff]  }
0x1961   :  { %3101 = vadd.xlane.f32.xlu1 %v3100_v12  ;;  %v3109_v15 = vsel %vm48_vm0, %v5020_v28, 0.0  ;;  %v4142_v12 = vld [vmem:[%s5112_s6 + $0x50] sm:$0xff]  }
0x1962   :  { %v3103_v29 = vsel %vm48_vm0, %v5015_v1, 0.0 }
0x1963   :  { %3104 = vadd.xlane.f32.xlu0 %v3103_v29  ;;  %v4143_v29 = vld [vmem:[%s5112_s6 + $0x58] sm:$0xff]  }
0x1965   :  { %3107 = vadd.xlane.f32.xlu1 %v3106_v60  ;;  %v4144_v60 = vld [vmem:[%s5112_s6 + $0x60] sm:$0xff]  }
0x1967   :  { %3110 = vadd.xlane.f32.xlu0 %v3109_v15  ;;  %v4145_v15 = vld [vmem:[%s5112_s6 + $0x68] sm:$0xff]  }
0x19ee   :  { %v3102_v17 = vpop.xlane.xlu1 %3101 }
0x19ef   :  { %v3112_v19 = vmul.f32 0.03125, %v3102_v17  ;;  %v4146_v17 = vld [vmem:[%s5112_s6 + $0x70] sm:$0xff]  }
0x19f0   :  { %v3105_v20 = vpop.xlane.xlu0 %3104 }
0x19f1   :  { %v3116_v22 = vsub.f32 %v5009_v25, %v3112_v19  ;;  %v3113_v30 = vmul.f32 0.03125, %v3105_v20  ;;  %v4147_v19 = vld [vmem:[%s5112_s6 + $0x78] sm:$0xff]   ;;  %v3594_v20 = vld [vmem:[%s5113_s2 + $0x1] ss:$0 sm:$0xff] }
0x19f2   :  { %v3108_v9 = vpop.xlane.xlu1 %3107 }
0x19f3   :  { %v3117_v11 = vsub.f32 %v5015_v1, %v3113_v30  ;;  %v3114_v31 = vmul.f32 0.03125, %v3108_v9  ;;  %v3120_v32 = vmul.f32 %v3116_v22, %v3116_v22 }
0x19f4   :  { %v3111_v14 = vpop.xlane.xlu0 %3110 }
0x19f5   :  { %v3118_v21 = vsub.f32 %v5012_v62, %v3114_v31  ;;  %v3115_v16 = vmul.f32 0.03125, %v3111_v14  ;;  %v3124_v33 = vsel %vm48_vm0, %v3120_v32, 0.0  ;;  %v3121_v23 = vmul.f32 %v3117_v11, %v3117_v11 }
0x19f6   :  { %3125 = vadd.xlane.f32.xlu1 %v3124_v33 }
0x19f7   :  { %v3119_v34 = vsub.f32 %v5020_v28, %v3115_v16  ;;  %v3127_v35 = vsel %vm48_vm0, %v3121_v23, 0.0  ;;  %v3122_v3 = vmul.f32 %v3118_v21, %v3118_v21 }
0x19f8   :  { %3128 = vadd.xlane.f32.xlu0 %v3127_v35 }
0x19f9   :  { %v3130_v36 = vsel %vm48_vm0, %v3122_v3, 0.0  ;;  %v3123_v37 = vmul.f32 %v3119_v34, %v3119_v34 }
0x19fa   :  { %3131 = vadd.xlane.f32.xlu1 %v3130_v36 }
0x19fb   :  { %v3133_v38 = vsel %vm48_vm0, %v3123_v37, 0.0 }
0x19fc   :  { %3134 = vadd.xlane.f32.xlu0 %v3133_v38 }
0x1a83   :  { %v3126_v41 = vpop.xlane.xlu1 %3125 }
0x1a84   :  { %v3136_v42 = vmul.f32 0.03125, %v3126_v41 }
0x1a85   :  { %v3129_v43 = vpop.xlane.xlu0 %3128 }
0x1a86   :  { %v3140_v44 = vadd.f32 1e-05, %v3136_v42  ;;  %v3137_v45 = vmul.f32 0.03125, %v3129_v43 }
0x1a87   :  { %v3132_v46 = vpop.xlane.xlu1 %3131 }
0x1a88   :  { %4310 = vrsqrt.f32 %v3140_v44  ;;  %v3141_v47 = vadd.f32 1e-05, %v3137_v45  ;;  %v3138_v48 = vmul.f32 0.03125, %v3132_v46 }
0x1a89   :  { %v3135_v49 = vpop.xlane.xlu0 %3134 }
0x1a8a   :  { %4312 = vrsqrt.f32 %v3141_v47  ;;  %v3142_v50 = vadd.f32 1e-05, %v3138_v48  ;;  %v3139_v51 = vmul.f32 0.03125, %v3135_v49 }
0x1a8c   :  { %4314 = vrsqrt.f32 %v3142_v50  ;;  %v3143_v52 = vadd.f32 1e-05, %v3139_v51 }
0x1a8e   :  { %4316 = vrsqrt.f32 %v3143_v52 }
0x1a92   :  { %v4311_v53 = vpop.eup %4310 }
0x1a93   :  { %v3148_v56 = vmul.f32 %v4311_v53, %v3116_v22 }
0x1a94   :  { %v4313_v57 = vpop.eup %4312 }
0x1a95   :  { %v3149_v59 = vmul.f32 %v4313_v57, %v3117_v11  ;;  %v3156_v63 = vmul.f32 %v3587_v54, %v3148_v56 }
0x1a96   :  { %v4315_v6 = vpop.eup %4314 }
0x1a97   :  { %v3150_v10 = vmul.f32 %v4315_v6, %v3118_v21  ;;  %v3157_v58 = vmul.f32 %v3587_v54, %v3149_v59  ;;  %v3164_v2 = vadd.f32 %v3588_v7, %v3156_v63 }
0x1a98   :  { %v4317_v0 = vpop.eup %4316 }
0x1a99   :  { %v3158_v5 = vmul.f32 %v3587_v54, %v3150_v10  ;;  %v3151_v13 = vmul.f32 %v4317_v0, %v3119_v34  ;;  %v3165_v18 = vadd.f32 %v3588_v7, %v3157_v58 }
0x1a9b   :  { %v3159_v55 = vmul.f32 %v3587_v54, %v3151_v13  ;;  %v3168_v61 = vpack.c.bf16 %v3165_v18, %v3164_v2  ;;  %v3166_v4 = vadd.f32 %v3588_v7, %v3158_v5 }
0x1a9d   :  { %4046 = vmatprep.mubr.msk.bf16.mxu0 %vm48_vm0, %v3168_v61  ;;  %v3167_v8 = vadd.f32 %v3588_v7, %v3159_v55  ;;  %v4148_v55 = vld [vmem:[%s5114_s7] sm:$0xff]   ;;  %v4149_v61 = vld [vmem:[%s5114_s7 + $0x8] sm:$0xff]  }
0x1a9e   :  { %4070 = vmatprep.subr.bf16.mxu1 %v4148_v55 }
0x1a9f   :  { %v3169_v24 = vpack.c.bf16 %v3167_v8, %v3166_v4  ;;  %4071 = vmatpush3.bf16.msra.mxu1 %v4148_v55  ;;  %v3616_v4 = vld [vmem:[%s5109_s1 + $0xc] ss:$0 sm:$0xff] }
0x1aa0   :  { %4072 = vmatprep.subr.bf16.mxu1 %v4149_v61 }
0x1aa1   :  { %4047 = vmatmul.mubr.msk.bf16.vlgmr.msra.gmra.mrb[76].mxu0 %vm48_vm0, %v3169_v24 }
0x1aa2   :  { %4051 = vmatpush3.bf16.msra.mxu0 %v4140_v26 }
0x1aa3   :  { %4052 = vmatprep.subr.bf16.mxu0 %v4141_v27  ;;  %4073 = vmatpush3.bf16.msra.mxu1 %v4149_v61 }
0x1aa6   :  { %4053 = vmatpush3.bf16.msra.mxu0 %v4141_v27 }
0x1aa7   :  { %4054 = vmatprep.subr.bf16.mxu0 %v4142_v12 }
0x1aaa   :  { %4055 = vmatpush3.bf16.msra.mxu0 %v4142_v12 }
0x1aab   :  { %4056 = vmatprep.subr.bf16.mxu0 %v4143_v29 }
0x1aae   :  { %4057 = vmatpush3.bf16.msra.mxu0 %v4143_v29 }
0x1aaf   :  { %4058 = vmatprep.subr.bf16.mxu0 %v4144_v60 }
0x1ab2   :  { %4059 = vmatpush3.bf16.msra.mxu0 %v4144_v60 }
0x1ab3   :  { %4060 = vmatprep.subr.bf16.mxu0 %v4145_v15 }
0x1ab6   :  { %4061 = vmatpush3.bf16.msra.mxu0 %v4145_v15 }
0x1ab7   :  { %4062 = vmatprep.subr.bf16.mxu0 %v4146_v17 }
0x1aba   :  { %4063 = vmatpush3.bf16.msra.mxu0 %v4146_v17 }
0x1abb   :  { %4064 = vmatprep.subr.bf16.mxu0 %v4147_v19 }
0x1abe   :  { %4065 = vmatpush3.bf16.msra.mxu0 %v4147_v19 }
0x1b74   :  { %v4048_v22 = vpop.f32.mrb[76].mxu0 }
0x1b75   :  { %v3244_v30 = vadd.f32 %v4048_v22, %v3594_v20  ;;  %v3235_v9 = vpop.f32.mrb[77].mxu0 }
0x1b76   :  { %v3236_v11 = vadd.f32 %v3594_v20, %v3235_v9  ;;  %v4049_v31 = vpop.f32.mrb[78].mxu0 }
0x1b77   :  { %v3256_v32 = vmul.f32 0.044715, %v3244_v30  ;;  %v3247_v14 = vadd.f32 %v4049_v31, %v3594_v20  ;;  %v3238_v21 = vpop.f32.mrb[79].mxu0  ;;  %v3252_v57 = vmul.f32 0.5, %v3244_v30 }
0x1b78   :  { %v3254_v16 = vmul.f32 0.044715, %v3236_v11  ;;  %v3239_v33 = vadd.f32 %v3594_v20, %v3238_v21  ;;  %v3250_v6 = vmul.f32 0.5, %v3236_v11 }
0x1b79   :  { %v3260_v23 = vmul.f32 %v3256_v32, %v3244_v30  ;;  %v3257_v34 = vmul.f32 0.044715, %v3247_v14  ;;  %v3253_v59 = vmul.f32 0.5, %v3247_v14 }
0x1b7a   :  { %v3258_v35 = vmul.f32 %v3254_v16, %v3236_v11  ;;  %v3255_v3 = vmul.f32 0.044715, %v3239_v33  ;;  %v3251_v7 = vmul.f32 0.5, %v3239_v33 }
0x1b7b   :  { %v3264_v36 = vmul.f32 %v3260_v23, %v3244_v30  ;;  %v3261_v37 = vmul.f32 %v3257_v34, %v3247_v14 }
0x1b7c   :  { %v3262_v38 = vmul.f32 %v3258_v35, %v3236_v11  ;;  %v3259_v39 = vmul.f32 %v3255_v3, %v3239_v33 }
0x1b7d   :  { %v3268_v40 = vadd.f32 %v3264_v36, %v3244_v30  ;;  %v3265_v41 = vmul.f32 %v3261_v37, %v3247_v14 }
0x1b7e   :  { %v3263_v42 = vmul.f32 %v3259_v39, %v3239_v33  ;;  %v3266_v43 = vadd.f32 %v3262_v38, %v3236_v11  ;;  %v3625_v11 = vld [vmem:[%s5115_s8] ss:$0 sm:$0xff] }
0x1b7f   :  { %v3272_v44 = vmul.f32 0.7978846, %v3268_v40  ;;  %v3269_v45 = vadd.f32 %v3265_v41, %v3247_v14 }
0x1b80   :  { %v3267_v46 = vadd.f32 %v3263_v42, %v3239_v33  ;;  %v3270_v47 = vmul.f32 0.7978846, %v3266_v43 }
0x1b81   :  { %4318 = vtanh.f32 %v3272_v44  ;;  %v3273_v48 = vmul.f32 0.7978846, %v3269_v45 }
0x1b82   :  { %v3271_v49 = vmul.f32 0.7978846, %v3267_v46  ;;  %4320 = vtanh.f32 %v3270_v47 }
0x1b83   :  { %4322 = vtanh.f32 %v3273_v48 }
0x1b84   :  { %4324 = vtanh.f32 %v3271_v49 }
0x1b8b   :  { %v4319_v50 = vpop.eup %4318 }
0x1b8c   :  { %v4321_v51 = vpop.eup %4320  ;;  %v3280_v52 = vadd.f32 1.0, %v4319_v50 }
0x1b8d   :  { %v4323_v53 = vpop.eup %4322  ;;  %v3278_v54 = vadd.f32 1.0, %v4321_v51 }
0x1b8e   :  { %v4325_v56 = vpop.eup %4324  ;;  %v3281_v63 = vadd.f32 1.0, %v4323_v53  ;;  %v3284_v58 = vmul.f32 %v3280_v52, %v3252_v57 }
0x1b8f   :  { %v3279_v10 = vadd.f32 1.0, %v4325_v56  ;;  %v3282_v5 = vmul.f32 %v3278_v54, %v3250_v6 }
0x1b90   :  { %v3285_v0 = vmul.f32 %v3281_v63, %v3253_v59 }
0x1b91   :  { %v3283_v13 = vmul.f32 %v3279_v10, %v3251_v7 }
0x1b92   :  { %v3287_v2 = vpack.c.bf16 %v3285_v0, %v3284_v58 }
0x1b93   :  { %v3286_v18 = vpack.c.bf16 %v3283_v13, %v3282_v5 }
0x1b95   :  { %4066 = vmatprep.mubr.bf16.mxu0 %v3286_v18 }
0x1b96   :  { %4067 = vmatmul.mubr.bf16.vlgmr.msra.gmra.mrb[80].mxu0 %v3287_v2 }
0x1c69   :  { %v4068_v8 = vpop.f32.mrb[80].mxu0 }
0x1c6a   :  { %v3401_v24 = vadd.f32 %v4068_v8, %v3616_v4  ;;  %v3392_v26 = vpop.f32.mrb[81].mxu0 }
0x1c6b   :  { %v3393_v27 = vadd.f32 %v3616_v4, %v3392_v26  ;;  %v4069_v12 = vpop.f32.mrb[82].mxu0 }
0x1c6c   :  { %v3404_v29 = vadd.f32 %v4069_v12, %v3616_v4  ;;  %v3395_v60 = vpop.f32.mrb[83].mxu0  ;;  %v3409_v17 = vadd.f32 %v3401_v24, %v5012_v62 }
0x1c6d   :  { %v3396_v15 = vadd.f32 %v3616_v4, %v3395_v60  ;;  %v3407_v20 = vadd.f32 %v3393_v27, %v5009_v25 }
0x1c6e   :  { %v3410_v19 = vadd.f32 %v3404_v29, %v5020_v28 }
0x1c6f   :  { %v3408_v22 = vadd.f32 %v3396_v15, %v5015_v1 }
0x1c70   :  { %v3412_v30 = vpack.c.bf16 %v3410_v19, %v3409_v17 }
0x1c71   :  { %v3411_v9 = vpack.c.bf16 %v3408_v22, %v3407_v20 }
0x1c73   :  { %4074 = vmatprep.mubr.msk.bf16.mxu1 %vm48_vm0, %v3411_v9 }
0x1c74   :  { %4075 = vmatmul.mubr.msk.bf16.vlgmr.msra.gmra.mrb[76].mxu1 %vm48_vm0, %v3412_v30 }
0x1d47   :  { %v4076_v31 = vpop.f32.mrb[76].mxu1 }
0x1d48   :  { %v3485_v32 = vadd.f32 %v4076_v31, %v3625_v11  ;;  %v3476_v14 = vpop.f32.mrb[77].mxu1 }
0x1d49   :  { %v3477_v62 = vadd.f32 %v3625_v11, %v3476_v14  ;;  %v4077_v21 = vpop.f32.mrb[78].mxu1 }
0x1d4a   :  { %3493 = vst [vmem:[%s5116_s9 + $0x10] sm:$0xff] %v3485_v32  ;;  %v3488_v25 = vadd.f32 %v4077_v21, %v3625_v11  ;;  %v3479_v1 = vpop.f32.mrb[79].mxu1 }
0x1d4b   :  { %3491 = vst [vmem:[%s5116_s9] sm:$0xff] %v3477_v62  ;;  %v3480_v28 = vadd.f32 %v3625_v11, %v3479_v1 }
0x1d4c   :  { %3494 = vst [vmem:[%s5116_s9 + $0x18] sm:$0xff] %v3488_v25 }
0x1d4d   :  { %3492 = vst [vmem:[%s5116_s9 + $0x8] sm:$0xff] %v3480_v28 }

</bundles_post_ra>
